<compile_context>
chip_gen: v5e
topology: v5e:2x2
jax: 0.10.0
libtpu: 0.0.40
codegen_flags: <defaults>
</compile_context>

<pallas_src>
import functools

import jax
import jax.numpy as jnp
import numpy as np
from jax.experimental import pallas as pl
from jax.experimental.pallas import tpu as pltpu

LN_EPS = 1e-5  # torch.nn.LayerNorm default


# ----------------------------------------------------------------------------
# helpers
# ----------------------------------------------------------------------------
def _round_up(x, m):
    return ((x + m - 1) // m) * m


def _pad_axis(a, axis, new_size):
    pad = new_size - a.shape[axis]
    if pad == 0:
        return a
    widths = [(0, 0)] * a.ndim
    widths[axis] = (0, pad)
    return jnp.pad(a, widths)


def _pick_block(total, target, align):
    """Block size: multiple of `align`, at most `target`, >=2 grid steps if possible."""
    target = max(align, (target // align) * align)
    if total >= 2 * target:
        return target
    half = _round_up(max(1, (total + 1) // 2), align)
    return min(target, max(align, half))


def _masked_layernorm(x_f32, gamma_f32, beta_f32, d_real):
    """LayerNorm over the (possibly zero-padded) last dim; stats use d_real lanes."""
    inv_d = 1.0 / float(d_real)
    mean = jnp.sum(x_f32, axis=-1, keepdims=True) * inv_d
    if d_real == x_f32.shape[-1]:
        centered = x_f32 - mean
    else:
        lane = jax.lax.broadcasted_iota(jnp.int32, x_f32.shape, x_f32.ndim - 1)
        centered = jnp.where(lane < d_real, x_f32 - mean, 0.0)
    var = jnp.sum(centered * centered, axis=-1, keepdims=True) * inv_d
    return centered * jax.lax.rsqrt(var + LN_EPS) * gamma_f32 + beta_f32


# ----------------------------------------------------------------------------
# fused per-layer kernel: PreNorm(Attention)+residual, PreNorm(FF)+residual
# ----------------------------------------------------------------------------
def layer_kernel(x_ref, g1_ref, b1_ref, wqkv_ref, wo_ref, bo_ref,
                 g2_ref, b2_ref, w1_ref, bf1_ref, w2_ref, bf2_ref, o_ref,
                 *, d_real, heads, dim_head, scale):
    # x_ref: (BG, N, Dp) block of token groups; pad lanes (>= d_real) are zero.
    xf = x_ref[...].astype(jnp.float32)
    bg, n, dp = xf.shape
    rows = bg * n
    inner = heads * dim_head
    cdt = wqkv_ref.dtype                                       # feed MXU in param dtype

    # ---------------- PreNorm(Attention) + residual ----------------
    y = _masked_layernorm(xf,
                          g1_ref[...].astype(jnp.float32),
                          b1_ref[...].astype(jnp.float32),
                          d_real)                              # (BG, N, Dp)
    qkv = jnp.dot(y.reshape(rows, dp).astype(cdt), wqkv_ref[...],
                  preferred_element_type=jnp.float32)          # (rows, 3*inner), f32

    head_outs = []
    for h in range(heads):                                     # static unroll over heads
        q = qkv[:, h * dim_head:(h + 1) * dim_head].reshape(bg, n, dim_head)
        k = qkv[:, inner + h * dim_head:
                   inner + (h + 1) * dim_head].reshape(bg, n, dim_head)
        v = qkv[:, 2 * inner + h * dim_head:
                   2 * inner + (h + 1) * dim_head].reshape(bg, n, dim_head)
        dots = jnp.einsum('gnd,gmd->gnm', q, k,
                          preferred_element_type=jnp.float32) * scale
        dots = dots - jnp.max(dots, axis=-1, keepdims=True)    # stable softmax
        p = jnp.exp(dots)
        attn = p / jnp.sum(p, axis=-1, keepdims=True)
        head_outs.append(jnp.einsum('gnm,gmd->gnd', attn, v,
                                    preferred_element_type=jnp.float32))
    o_all = jnp.concatenate(head_outs, axis=-1).reshape(rows, inner)   # (h d) order
    attn_out = jnp.dot(o_all.astype(cdt), wo_ref[...],
                       preferred_element_type=jnp.float32)
    x1 = attn_out + bo_ref[...].astype(jnp.float32) + xf.reshape(rows, dp)

    # ---------------- PreNorm(FeedForward) + residual ----------------
    y2 = _masked_layernorm(x1,
                           g2_ref[...].astype(jnp.float32),
                           b2_ref[...].astype(jnp.float32),
                           d_real)
    h1 = jnp.dot(y2.astype(cdt), w1_ref[...],
                 preferred_element_type=jnp.float32) + bf1_ref[...].astype(jnp.float32)
    h1 = h1 * jax.nn.sigmoid(h1)                               # SiLU in f32 (VPU/EUP)
    out = jnp.dot(h1.astype(cdt), w2_ref[...],
                  preferred_element_type=jnp.float32) + bf2_ref[...].astype(jnp.float32)
    o_ref[...] = (out + x1).reshape(bg, n, dp).astype(o_ref.dtype)


# ----------------------------------------------------------------------------
# wrapper: one pallas_call per layer
# ----------------------------------------------------------------------------
def transformer_layer(xg, lp, *, heads, dim_head, target_rows=256):
    """xg: (G, N, Dp) channel-padded token groups -> (G, N, Dp)."""
    G, N, Dp = xg.shape
    D = lp["ln1_g"].shape[0]
    inner = heads * dim_head
    M = lp["w1"].shape[1]

    g1 = _pad_axis(lp["ln1_g"].reshape(1, D), 1, Dp)
    b1 = _pad_axis(lp["ln1_b"].reshape(1, D), 1, Dp)
    wqkv = _pad_axis(lp["w_qkv"], 0, Dp)                       # (Dp, 3*inner) pad rows=0
    wo = _pad_axis(lp["w_o"], 1, Dp)                           # (inner, Dp) pad cols=0
    bo = _pad_axis(lp["b_o"].reshape(1, D), 1, Dp)
    g2 = _pad_axis(lp["ln2_g"].reshape(1, D), 1, Dp)
    b2 = _pad_axis(lp["ln2_b"].reshape(1, D), 1, Dp)
    w1 = _pad_axis(lp["w1"], 0, Dp)                            # (Dp, M) pad rows=0
    bf1 = lp["b1"].reshape(1, M)
    w2 = _pad_axis(lp["w2"], 1, Dp)                            # (M, Dp) pad cols=0
    bf2 = _pad_axis(lp["b2"].reshape(1, D), 1, Dp)

    bg = _pick_block(G, max(1, target_rows // max(N, 1)), 1)
    Gp = _round_up(G, bg)
    xg_p = _pad_axis(xg, 0, Gp)
    grid = (Gp // bg,)

    kernel = functools.partial(layer_kernel, d_real=D, heads=heads,
                               dim_head=dim_head, scale=float(dim_head) ** -0.5)
    out = pl.pallas_call(
        kernel,
        out_shape=jax.ShapeDtypeStruct((Gp, N, Dp), xg.dtype),
        grid_spec=pltpu.PrefetchScalarGridSpec(
            num_scalar_prefetch=0,
            grid=grid,
            in_specs=[
                pl.BlockSpec((bg, N, Dp), lambda i: (i, 0, 0)),       # x tile
                pl.BlockSpec((1, Dp), lambda i: (0, 0)),              # ln1 gamma
                pl.BlockSpec((1, Dp), lambda i: (0, 0)),              # ln1 beta
                pl.BlockSpec((Dp, 3 * inner), lambda i: (0, 0)),      # W_qkv
                pl.BlockSpec((inner, Dp), lambda i: (0, 0)),          # W_o
                pl.BlockSpec((1, Dp), lambda i: (0, 0)),              # b_o
                pl.BlockSpec((1, Dp), lambda i: (0, 0)),              # ln2 gamma
                pl.BlockSpec((1, Dp), lambda i: (0, 0)),              # ln2 beta
                pl.BlockSpec((Dp, M), lambda i: (0, 0)),              # W1
                pl.BlockSpec((1, M), lambda i: (0, 0)),               # b1
                pl.BlockSpec((M, Dp), lambda i: (0, 0)),              # W2
                pl.BlockSpec((1, Dp), lambda i: (0, 0)),              # b2
            ],
            out_specs=pl.BlockSpec((bg, N, Dp), lambda i: (i, 0, 0)),
        ),
        compiler_params=pltpu.CompilerParams(dimension_semantics=("parallel",)),
    )(xg_p, g1, b1, wqkv, wo, bo, g2, b2, w1, bf1, w2, bf2)
    return out[:G]


@functools.partial(jax.jit, static_argnames=("heads", "dim_head"))
def transformer_forward(x, params, *, heads, dim_head):
    """x: (B, P, N, D) -> (B, P, N, D); Pallas Transformer stack."""
    B, P, N, D = x.shape
    Dp = _round_up(D, 128)                     # lane-dense channel dim
    xg = _pad_axis(x, 3, Dp).reshape(B * P, N, Dp)
    for lp in params:
        xg = transformer_layer(xg, lp, heads=heads, dim_head=dim_head)
    return xg.reshape(B, P, N, Dp)[..., :D]


# ----------------------------------------------------------------------------
# pure-JAX reference (mirrors the PyTorch module)
# ----------------------------------------------------------------------------
def _layernorm_ref(x, g, b):
    mean = jnp.mean(x, axis=-1, keepdims=True)
    var = jnp.mean((x - mean) ** 2, axis=-1, keepdims=True)
    return (x - mean) * jax.lax.rsqrt(var + LN_EPS) * g + b


def transformer_ref(x, params, *, heads, dim_head):
    B, P, N, D = x.shape
    scale = float(dim_head) ** -0.5
    for lp in params:
        y = _layernorm_ref(x, lp["ln1_g"], lp["ln1_b"])
        qkv = jnp.dot(y, lp["w_qkv"])
        q, k, v = jnp.split(qkv, 3, axis=-1)

        def heads_split(t):
            return t.reshape(B, P, N, heads, dim_head).transpose(0, 1, 3, 2, 4)

        q, k, v = map(heads_split, (q, k, v))                  # (B,P,H,N,DH)
        dots = jnp.einsum('bphnd,bphmd->bphnm', q, k) * scale
        attn = jax.nn.softmax(dots, axis=-1)
        o = jnp.einsum('bphnm,bphmd->bphnd', attn, v)
        o = o.transpose(0, 1, 3, 2, 4).reshape(B, P, N, heads * dim_head)
        x = jnp.dot(o, lp["w_o"]) + lp["b_o"] + x

        y = _layernorm_ref(x, lp["ln2_g"], lp["ln2_b"])
        h = jnp.dot(y, lp["w1"]) + lp["b1"]
        h = h * jax.nn.sigmoid(h)
        x = jnp.dot(h, lp["w2"]) + lp["b2"] + x
    return x


def init_params(key, depth, dim, heads, dim_head, mlp_dim):
    inner = heads * dim_head
    params = []
    for _ in range(depth):
        key, *ks = jax.random.split(key, 12)
        params.append(dict(
            ln1_g=1.0 + 0.1 * jax.random.normal(ks[0], (dim,), jnp.float32),
            ln1_b=0.05 * jax.random.normal(ks[1], (dim,), jnp.float32),
            w_qkv=jax.random.normal(ks[2], (dim, 3 * inner), jnp.float32) / np.sqrt(dim),
            w_o=jax.random.normal(ks[3], (inner, dim), jnp.float32) / np.sqrt(inner),
            b_o=0.02 * jax.random.normal(ks[4], (dim,), jnp.float32),
            ln2_g=1.0 + 0.1 * jax.random.normal(ks[5], (dim,), jnp.float32),
            ln2_b=0.05 * jax.random.normal(ks[6], (dim,), jnp.float32),
            w1=jax.random.normal(ks[7], (dim, mlp_dim), jnp.float32) / np.sqrt(dim),
            b1=0.02 * jax.random.normal(ks[8], (mlp_dim,), jnp.float32),
            w2=jax.random.normal(ks[9], (mlp_dim, dim), jnp.float32) / np.sqrt(mlp_dim),
            b2=0.02 * jax.random.normal(ks[10], (dim,), jnp.float32),
        ))
    return params


if __name__ == "__main__":
    # Small shapes consistent with mobileViT's Transformer: x is (B, P, N, D)
    B, P, N, D = 2, 4, 8, 32
    heads, dim_head, mlp_dim, depth = 4, 8, 64, 2

    key = jax.random.PRNGKey(0)
    kx, kp = jax.random.split(key)
    x = jax.random.normal(kx, (B, P, N, D), dtype=jnp.float32)
    params = init_params(kp, depth, D, heads, dim_head, mlp_dim)

    out = transformer_forward(x, params, heads=heads, dim_head=dim_head)
    out = jax.block_until_ready(out)

    ref = transformer_ref(x, params, heads=heads, dim_head=dim_head)
    np.testing.assert_allclose(np.asarray(out), np.asarray(ref), rtol=1e-3, atol=1e-3)

    print("KERNEL_OK")
</pallas_src>

<mosaic_0001>
module attributes {stable_mosaic.version = 11 : i64} {
  func.func @layer_kernel(%arg0: i32, %arg1: memref<4x8x128xf32, #tpu.memory_space<vmem>>, %arg2: memref<1x128xf32, #tpu.memory_space<vmem>>, %arg3: memref<1x128xf32, #tpu.memory_space<vmem>>, %arg4: memref<128x96xf32, #tpu.memory_space<vmem>>, %arg5: memref<32x128xf32, #tpu.memory_space<vmem>>, %arg6: memref<1x128xf32, #tpu.memory_space<vmem>>, %arg7: memref<1x128xf32, #tpu.memory_space<vmem>>, %arg8: memref<1x128xf32, #tpu.memory_space<vmem>>, %arg9: memref<128x64xf32, #tpu.memory_space<vmem>>, %arg10: memref<1x64xf32, #tpu.memory_space<vmem>>, %arg11: memref<64x128xf32, #tpu.memory_space<vmem>>, %arg12: memref<1x128xf32, #tpu.memory_space<vmem>>, %arg13: memref<4x8x128xf32, #tpu.memory_space<vmem>>) attributes {dimension_semantics = [#tpu.dimension_semantics<parallel>], iteration_bounds = array<i64: 2>, scalar_prefetch = 0 : i64, scratch_operands = 0 : i64, tpu.core_type = #tpu.core_type<tc>, window_params = [{transform_indices = @transform_0, window_bounds = array<i64: 4, 8, 128>}, {pipeline_mode = #tpu.pipeline_mode<synchronous>, transform_indices = @transform_1, window_bounds = array<i64: 1, 128>}, {pipeline_mode = #tpu.pipeline_mode<synchronous>, transform_indices = @transform_2, window_bounds = array<i64: 1, 128>}, {pipeline_mode = #tpu.pipeline_mode<synchronous>, transform_indices = @transform_3, window_bounds = array<i64: 128, 96>}, {pipeline_mode = #tpu.pipeline_mode<synchronous>, transform_indices = @transform_4, window_bounds = array<i64: 32, 128>}, {pipeline_mode = #tpu.pipeline_mode<synchronous>, transform_indices = @transform_5, window_bounds = array<i64: 1, 128>}, {pipeline_mode = #tpu.pipeline_mode<synchronous>, transform_indices = @transform_6, window_bounds = array<i64: 1, 128>}, {pipeline_mode = #tpu.pipeline_mode<synchronous>, transform_indices = @transform_7, window_bounds = array<i64: 1, 128>}, {pipeline_mode = #tpu.pipeline_mode<synchronous>, transform_indices = @transform_8, window_bounds = array<i64: 128, 64>}, {pipeline_mode = #tpu.pipeline_mode<synchronous>, transform_indices = @transform_9, window_bounds = array<i64: 1, 64>}, {pipeline_mode = #tpu.pipeline_mode<synchronous>, transform_indices = @transform_10, window_bounds = array<i64: 64, 128>}, {pipeline_mode = #tpu.pipeline_mode<synchronous>, transform_indices = @transform_11, window_bounds = array<i64: 1, 128>}, {transform_indices = @transform_12, window_bounds = array<i64: 4, 8, 128>}]} {
    %c0 = arith.constant 0 : index
    %c0_0 = arith.constant 0 : index
    %c0_1 = arith.constant 0 : index
    %0 = vector.load %arg1[%c0, %c0_0, %c0_1] : memref<4x8x128xf32, #tpu.memory_space<vmem>>, vector<4x8x128xf32>
    %c0_2 = arith.constant 0 : index
    %c0_3 = arith.constant 0 : index
    %1 = vector.load %arg2[%c0_2, %c0_3] : memref<1x128xf32, #tpu.memory_space<vmem>>, vector<1x128xf32>
    %c0_4 = arith.constant 0 : index
    %c0_5 = arith.constant 0 : index
    %2 = vector.load %arg3[%c0_4, %c0_5] : memref<1x128xf32, #tpu.memory_space<vmem>>, vector<1x128xf32>
    %cst = arith.constant dense<0.000000e+00> : vector<4x8xf32>
    %3 = vector.multi_reduction <add>, %0, %cst [2] : vector<4x8x128xf32> to vector<4x8xf32>
    %4 = vector.shape_cast %3 : vector<4x8xf32> to vector<4x8x1xf32>
    %cst_6 = arith.constant 3.125000e-02 : f32
    %5 = vector.broadcast %cst_6 : f32 to vector<4x8x1xf32>
    %6 = arith.mulf %4, %5 : vector<4x8x1xf32>
    %7 = tpu.iota {dimensions = array<i32: 2>} : vector<4x8x128xi32>
    %c32_i32 = arith.constant 32 : i32
    %8 = vector.broadcast %c32_i32 : i32 to vector<4x8x128xi32>
    %9 = arith.cmpi slt, %7, %8 : vector<4x8x128xi32>
    %10 = vector.broadcast %6 : vector<4x8x1xf32> to vector<4x8x128xf32>
    %11 = arith.subf %0, %10 : vector<4x8x128xf32>
    %cst_7 = arith.constant 0.000000e+00 : f32
    %12 = vector.broadcast %cst_7 : f32 to vector<4x8x128xf32>
    %13 = arith.select %9, %11, %12 : vector<4x8x128xi1>, vector<4x8x128xf32>
    %14 = arith.mulf %13, %13 : vector<4x8x128xf32>
    %cst_8 = arith.constant dense<0.000000e+00> : vector<4x8xf32>
    %15 = vector.multi_reduction <add>, %14, %cst_8 [2] : vector<4x8x128xf32> to vector<4x8xf32>
    %16 = vector.shape_cast %15 : vector<4x8xf32> to vector<4x8x1xf32>
    %cst_9 = arith.constant 3.125000e-02 : f32
    %17 = vector.broadcast %cst_9 : f32 to vector<4x8x1xf32>
    %18 = arith.mulf %16, %17 : vector<4x8x1xf32>
    %cst_10 = arith.constant 9.99999974E-6 : f32
    %19 = vector.broadcast %cst_10 : f32 to vector<4x8x1xf32>
    %20 = arith.addf %18, %19 : vector<4x8x1xf32>
    %21 = math.rsqrt %20 : vector<4x8x1xf32>
    %22 = vector.broadcast %21 : vector<4x8x1xf32> to vector<4x8x128xf32>
    %23 = arith.mulf %13, %22 : vector<4x8x128xf32>
    %24 = vector.shape_cast %1 : vector<1x128xf32> to vector<1x1x128xf32>
    %25 = vector.broadcast %24 : vector<1x1x128xf32> to vector<4x8x128xf32>
    %26 = arith.mulf %23, %25 : vector<4x8x128xf32>
    %27 = vector.shape_cast %2 : vector<1x128xf32> to vector<1x1x128xf32>
    %28 = vector.broadcast %27 : vector<1x1x128xf32> to vector<4x8x128xf32>
    %29 = arith.addf %26, %28 : vector<4x8x128xf32>
    %30 = vector.shape_cast %29 : vector<4x8x128xf32> to vector<32x128xf32>
    %c0_11 = arith.constant 0 : index
    %c0_12 = arith.constant 0 : index
    %31 = vector.load %arg4[%c0_11, %c0_12] : memref<128x96xf32, #tpu.memory_space<vmem>>, vector<128x96xf32>
    %cst_13 = arith.constant dense<0.000000e+00> : vector<32x96xf32>
    %32 = tpu.matmul %30, %31, %cst_13 {dimension_numbers = #tpu.dot_dimension_numbers<[1], [0], [0], [1], [0, 0, 1, 1], [], []>} : vector<32x128xf32>, vector<128x96xf32>, vector<32x96xf32> -> vector<32x96xf32>
    %33 = vector.extract_strided_slice %32 {offsets = [0, 0], sizes = [32, 8], strides = [1, 1]} : vector<32x96xf32> to vector<32x8xf32>
    %34 = vector.shape_cast %33 : vector<32x8xf32> to vector<4x8x8xf32>
    %35 = vector.extract_strided_slice %32 {offsets = [0, 32], sizes = [32, 8], strides = [1, 1]} : vector<32x96xf32> to vector<32x8xf32>
    %36 = vector.shape_cast %35 : vector<32x8xf32> to vector<4x8x8xf32>
    %37 = vector.extract_strided_slice %32 {offsets = [0, 64], sizes = [32, 8], strides = [1, 1]} : vector<32x96xf32> to vector<32x8xf32>
    %38 = vector.shape_cast %37 : vector<32x8xf32> to vector<4x8x8xf32>
    "tpu.trace_start"() <{level = 10 : i32, message = "gnd,gmd->gnm"}> : () -> ()
    %cst_14 = arith.constant dense<0.000000e+00> : vector<4x8x8xf32>
    %39 = tpu.matmul %34, %36, %cst_14 {dimension_numbers = #tpu.dot_dimension_numbers<[2], [2], [1], [1], [0, 0, 0, 1, 1, 1], [0], [0]>} : vector<4x8x8xf32>, vector<4x8x8xf32>, vector<4x8x8xf32> -> vector<4x8x8xf32>
    "tpu.trace_stop"() : () -> ()
    %cst_15 = arith.constant 0.353553385 : f32
    %40 = vector.broadcast %cst_15 : f32 to vector<4x8x8xf32>
    %41 = arith.mulf %39, %40 : vector<4x8x8xf32>
    %cst_16 = arith.constant dense<0xFF800000> : vector<4x8xf32>
    %42 = vector.multi_reduction <maximumf>, %41, %cst_16 [2] : vector<4x8x8xf32> to vector<4x8xf32>
    %43 = vector.shape_cast %42 : vector<4x8xf32> to vector<4x8x1xf32>
    %44 = vector.broadcast %43 : vector<4x8x1xf32> to vector<4x8x8xf32>
    %45 = arith.subf %41, %44 : vector<4x8x8xf32>
    %46 = math.exp %45 : vector<4x8x8xf32>
    %cst_17 = arith.constant dense<0.000000e+00> : vector<4x8xf32>
    %47 = vector.multi_reduction <add>, %46, %cst_17 [2] : vector<4x8x8xf32> to vector<4x8xf32>
    %48 = vector.shape_cast %47 : vector<4x8xf32> to vector<4x8x1xf32>
    %49 = vector.broadcast %48 : vector<4x8x1xf32> to vector<4x8x8xf32>
    %50 = arith.divf %46, %49 : vector<4x8x8xf32>
    "tpu.trace_start"() <{level = 10 : i32, message = "gnm,gmd->gnd"}> : () -> ()
    %cst_18 = arith.constant dense<0.000000e+00> : vector<4x8x8xf32>
    %51 = tpu.matmul %50, %38, %cst_18 {dimension_numbers = #tpu.dot_dimension_numbers<[2], [1], [1], [2], [0, 0, 0, 1, 1, 2], [0], [0]>} : vector<4x8x8xf32>, vector<4x8x8xf32>, vector<4x8x8xf32> -> vector<4x8x8xf32>
    "tpu.trace_stop"() : () -> ()
    %52 = vector.extract_strided_slice %32 {offsets = [0, 8], sizes = [32, 8], strides = [1, 1]} : vector<32x96xf32> to vector<32x8xf32>
    %53 = vector.shape_cast %52 : vector<32x8xf32> to vector<4x8x8xf32>
    %54 = vector.extract_strided_slice %32 {offsets = [0, 40], sizes = [32, 8], strides = [1, 1]} : vector<32x96xf32> to vector<32x8xf32>
    %55 = vector.shape_cast %54 : vector<32x8xf32> to vector<4x8x8xf32>
    %56 = vector.extract_strided_slice %32 {offsets = [0, 72], sizes = [32, 8], strides = [1, 1]} : vector<32x96xf32> to vector<32x8xf32>
    %57 = vector.shape_cast %56 : vector<32x8xf32> to vector<4x8x8xf32>
    "tpu.trace_start"() <{level = 10 : i32, message = "gnd,gmd->gnm"}> : () -> ()
    %cst_19 = arith.constant dense<0.000000e+00> : vector<4x8x8xf32>
    %58 = tpu.matmul %53, %55, %cst_19 {dimension_numbers = #tpu.dot_dimension_numbers<[2], [2], [1], [1], [0, 0, 0, 1, 1, 1], [0], [0]>} : vector<4x8x8xf32>, vector<4x8x8xf32>, vector<4x8x8xf32> -> vector<4x8x8xf32>
    "tpu.trace_stop"() : () -> ()
    %cst_20 = arith.constant 0.353553385 : f32
    %59 = vector.broadcast %cst_20 : f32 to vector<4x8x8xf32>
    %60 = arith.mulf %58, %59 : vector<4x8x8xf32>
    %cst_21 = arith.constant dense<0xFF800000> : vector<4x8xf32>
    %61 = vector.multi_reduction <maximumf>, %60, %cst_21 [2] : vector<4x8x8xf32> to vector<4x8xf32>
    %62 = vector.shape_cast %61 : vector<4x8xf32> to vector<4x8x1xf32>
    %63 = vector.broadcast %62 : vector<4x8x1xf32> to vector<4x8x8xf32>
    %64 = arith.subf %60, %63 : vector<4x8x8xf32>
    %65 = math.exp %64 : vector<4x8x8xf32>
    %cst_22 = arith.constant dense<0.000000e+00> : vector<4x8xf32>
    %66 = vector.multi_reduction <add>, %65, %cst_22 [2] : vector<4x8x8xf32> to vector<4x8xf32>
    %67 = vector.shape_cast %66 : vector<4x8xf32> to vector<4x8x1xf32>
    %68 = vector.broadcast %67 : vector<4x8x1xf32> to vector<4x8x8xf32>
    %69 = arith.divf %65, %68 : vector<4x8x8xf32>
    "tpu.trace_start"() <{level = 10 : i32, message = "gnm,gmd->gnd"}> : () -> ()
    %cst_23 = arith.constant dense<0.000000e+00> : vector<4x8x8xf32>
    %70 = tpu.matmul %69, %57, %cst_23 {dimension_numbers = #tpu.dot_dimension_numbers<[2], [1], [1], [2], [0, 0, 0, 1, 1, 2], [0], [0]>} : vector<4x8x8xf32>, vector<4x8x8xf32>, vector<4x8x8xf32> -> vector<4x8x8xf32>
    "tpu.trace_stop"() : () -> ()
    %71 = vector.extract_strided_slice %32 {offsets = [0, 16], sizes = [32, 8], strides = [1, 1]} : vector<32x96xf32> to vector<32x8xf32>
    %72 = vector.shape_cast %71 : vector<32x8xf32> to vector<4x8x8xf32>
    %73 = vector.extract_strided_slice %32 {offsets = [0, 48], sizes = [32, 8], strides = [1, 1]} : vector<32x96xf32> to vector<32x8xf32>
    %74 = vector.shape_cast %73 : vector<32x8xf32> to vector<4x8x8xf32>
    %75 = vector.extract_strided_slice %32 {offsets = [0, 80], sizes = [32, 8], strides = [1, 1]} : vector<32x96xf32> to vector<32x8xf32>
    %76 = vector.shape_cast %75 : vector<32x8xf32> to vector<4x8x8xf32>
    "tpu.trace_start"() <{level = 10 : i32, message = "gnd,gmd->gnm"}> : () -> ()
    %cst_24 = arith.constant dense<0.000000e+00> : vector<4x8x8xf32>
    %77 = tpu.matmul %72, %74, %cst_24 {dimension_numbers = #tpu.dot_dimension_numbers<[2], [2], [1], [1], [0, 0, 0, 1, 1, 1], [0], [0]>} : vector<4x8x8xf32>, vector<4x8x8xf32>, vector<4x8x8xf32> -> vector<4x8x8xf32>
    "tpu.trace_stop"() : () -> ()
    %cst_25 = arith.constant 0.353553385 : f32
    %78 = vector.broadcast %cst_25 : f32 to vector<4x8x8xf32>
    %79 = arith.mulf %77, %78 : vector<4x8x8xf32>
    %cst_26 = arith.constant dense<0xFF800000> : vector<4x8xf32>
    %80 = vector.multi_reduction <maximumf>, %79, %cst_26 [2] : vector<4x8x8xf32> to vector<4x8xf32>
    %81 = vector.shape_cast %80 : vector<4x8xf32> to vector<4x8x1xf32>
    %82 = vector.broadcast %81 : vector<4x8x1xf32> to vector<4x8x8xf32>
    %83 = arith.subf %79, %82 : vector<4x8x8xf32>
    %84 = math.exp %83 : vector<4x8x8xf32>
    %cst_27 = arith.constant dense<0.000000e+00> : vector<4x8xf32>
    %85 = vector.multi_reduction <add>, %84, %cst_27 [2] : vector<4x8x8xf32> to vector<4x8xf32>
    %86 = vector.shape_cast %85 : vector<4x8xf32> to vector<4x8x1xf32>
    %87 = vector.broadcast %86 : vector<4x8x1xf32> to vector<4x8x8xf32>
    %88 = arith.divf %84, %87 : vector<4x8x8xf32>
    "tpu.trace_start"() <{level = 10 : i32, message = "gnm,gmd->gnd"}> : () -> ()
    %cst_28 = arith.constant dense<0.000000e+00> : vector<4x8x8xf32>
    %89 = tpu.matmul %88, %76, %cst_28 {dimension_numbers = #tpu.dot_dimension_numbers<[2], [1], [1], [2], [0, 0, 0, 1, 1, 2], [0], [0]>} : vector<4x8x8xf32>, vector<4x8x8xf32>, vector<4x8x8xf32> -> vector<4x8x8xf32>
    "tpu.trace_stop"() : () -> ()
    %90 = vector.extract_strided_slice %32 {offsets = [0, 24], sizes = [32, 8], strides = [1, 1]} : vector<32x96xf32> to vector<32x8xf32>
    %91 = vector.shape_cast %90 : vector<32x8xf32> to vector<4x8x8xf32>
    %92 = vector.extract_strided_slice %32 {offsets = [0, 56], sizes = [32, 8], strides = [1, 1]} : vector<32x96xf32> to vector<32x8xf32>
    %93 = vector.shape_cast %92 : vector<32x8xf32> to vector<4x8x8xf32>
    %94 = vector.extract_strided_slice %32 {offsets = [0, 88], sizes = [32, 8], strides = [1, 1]} : vector<32x96xf32> to vector<32x8xf32>
    %95 = vector.shape_cast %94 : vector<32x8xf32> to vector<4x8x8xf32>
    "tpu.trace_start"() <{level = 10 : i32, message = "gnd,gmd->gnm"}> : () -> ()
    %cst_29 = arith.constant dense<0.000000e+00> : vector<4x8x8xf32>
    %96 = tpu.matmul %91, %93, %cst_29 {dimension_numbers = #tpu.dot_dimension_numbers<[2], [2], [1], [1], [0, 0, 0, 1, 1, 1], [0], [0]>} : vector<4x8x8xf32>, vector<4x8x8xf32>, vector<4x8x8xf32> -> vector<4x8x8xf32>
    "tpu.trace_stop"() : () -> ()
    %cst_30 = arith.constant 0.353553385 : f32
    %97 = vector.broadcast %cst_30 : f32 to vector<4x8x8xf32>
    %98 = arith.mulf %96, %97 : vector<4x8x8xf32>
    %cst_31 = arith.constant dense<0xFF800000> : vector<4x8xf32>
    %99 = vector.multi_reduction <maximumf>, %98, %cst_31 [2] : vector<4x8x8xf32> to vector<4x8xf32>
    %100 = vector.shape_cast %99 : vector<4x8xf32> to vector<4x8x1xf32>
    %101 = vector.broadcast %100 : vector<4x8x1xf32> to vector<4x8x8xf32>
    %102 = arith.subf %98, %101 : vector<4x8x8xf32>
    %103 = math.exp %102 : vector<4x8x8xf32>
    %cst_32 = arith.constant dense<0.000000e+00> : vector<4x8xf32>
    %104 = vector.multi_reduction <add>, %103, %cst_32 [2] : vector<4x8x8xf32> to vector<4x8xf32>
    %105 = vector.shape_cast %104 : vector<4x8xf32> to vector<4x8x1xf32>
    %106 = vector.broadcast %105 : vector<4x8x1xf32> to vector<4x8x8xf32>
    %107 = arith.divf %103, %106 : vector<4x8x8xf32>
    "tpu.trace_start"() <{level = 10 : i32, message = "gnm,gmd->gnd"}> : () -> ()
    %cst_33 = arith.constant dense<0.000000e+00> : vector<4x8x8xf32>
    %108 = tpu.matmul %107, %95, %cst_33 {dimension_numbers = #tpu.dot_dimension_numbers<[2], [1], [1], [2], [0, 0, 0, 1, 1, 2], [0], [0]>} : vector<4x8x8xf32>, vector<4x8x8xf32>, vector<4x8x8xf32> -> vector<4x8x8xf32>
    "tpu.trace_stop"() : () -> ()
    %109 = tpu.concatenate %51, %70, %89, %108 in 2 : vector<4x8x8xf32>, vector<4x8x8xf32>, vector<4x8x8xf32>, vector<4x8x8xf32> -> vector<4x8x32xf32>
    %110 = vector.shape_cast %109 : vector<4x8x32xf32> to vector<32x32xf32>
    %c0_34 = arith.constant 0 : index
    %c0_35 = arith.constant 0 : index
    %111 = vector.load %arg5[%c0_34, %c0_35] : memref<32x128xf32, #tpu.memory_space<vmem>>, vector<32x128xf32>
    %cst_36 = arith.constant dense<0.000000e+00> : vector<32x128xf32>
    %112 = tpu.matmul %110, %111, %cst_36 {dimension_numbers = #tpu.dot_dimension_numbers<[1], [0], [0], [1], [0, 0, 1, 1], [], []>} : vector<32x32xf32>, vector<32x128xf32>, vector<32x128xf32> -> vector<32x128xf32>
    %c0_37 = arith.constant 0 : index
    %c0_38 = arith.constant 0 : index
    %113 = vector.load %arg6[%c0_37, %c0_38] : memref<1x128xf32, #tpu.memory_space<vmem>>, vector<1x128xf32>
    %114 = vector.broadcast %113 : vector<1x128xf32> to vector<32x128xf32>
    %115 = arith.addf %112, %114 : vector<32x128xf32>
    %116 = vector.shape_cast %0 : vector<4x8x128xf32> to vector<32x128xf32>
    %117 = arith.addf %115, %116 : vector<32x128xf32>
    %c0_39 = arith.constant 0 : index
    %c0_40 = arith.constant 0 : index
    %118 = vector.load %arg7[%c0_39, %c0_40] : memref<1x128xf32, #tpu.memory_space<vmem>>, vector<1x128xf32>
    %c0_41 = arith.constant 0 : index
    %c0_42 = arith.constant 0 : index
    %119 = vector.load %arg8[%c0_41, %c0_42] : memref<1x128xf32, #tpu.memory_space<vmem>>, vector<1x128xf32>
    %cst_43 = arith.constant dense<0.000000e+00> : vector<32xf32>
    %120 = vector.multi_reduction <add>, %117, %cst_43 [1] : vector<32x128xf32> to vector<32xf32>
    %121 = vector.shape_cast %120 : vector<32xf32> to vector<32x1xf32>
    %cst_44 = arith.constant 3.125000e-02 : f32
    %122 = vector.broadcast %cst_44 : f32 to vector<32x1xf32>
    %123 = arith.mulf %121, %122 : vector<32x1xf32>
    %124 = tpu.iota {dimensions = array<i32: 1>} : vector<32x128xi32>
    %c32_i32_45 = arith.constant 32 : i32
    %125 = vector.broadcast %c32_i32_45 : i32 to vector<32x128xi32>
    %126 = arith.cmpi slt, %124, %125 : vector<32x128xi32>
    %127 = vector.broadcast %123 : vector<32x1xf32> to vector<32x128xf32>
    %128 = arith.subf %117, %127 : vector<32x128xf32>
    %cst_46 = arith.constant 0.000000e+00 : f32
    %129 = vector.broadcast %cst_46 : f32 to vector<32x128xf32>
    %130 = arith.select %126, %128, %129 : vector<32x128xi1>, vector<32x128xf32>
    %131 = arith.mulf %130, %130 : vector<32x128xf32>
    %cst_47 = arith.constant dense<0.000000e+00> : vector<32xf32>
    %132 = vector.multi_reduction <add>, %131, %cst_47 [1] : vector<32x128xf32> to vector<32xf32>
    %133 = vector.shape_cast %132 : vector<32xf32> to vector<32x1xf32>
    %cst_48 = arith.constant 3.125000e-02 : f32
    %134 = vector.broadcast %cst_48 : f32 to vector<32x1xf32>
    %135 = arith.mulf %133, %134 : vector<32x1xf32>
    %cst_49 = arith.constant 9.99999974E-6 : f32
    %136 = vector.broadcast %cst_49 : f32 to vector<32x1xf32>
    %137 = arith.addf %135, %136 : vector<32x1xf32>
    %138 = math.rsqrt %137 : vector<32x1xf32>
    %139 = vector.broadcast %138 : vector<32x1xf32> to vector<32x128xf32>
    %140 = arith.mulf %130, %139 : vector<32x128xf32>
    %141 = vector.broadcast %118 : vector<1x128xf32> to vector<32x128xf32>
    %142 = arith.mulf %140, %141 : vector<32x128xf32>
    %143 = vector.broadcast %119 : vector<1x128xf32> to vector<32x128xf32>
    %144 = arith.addf %142, %143 : vector<32x128xf32>
    %c0_50 = arith.constant 0 : index
    %c0_51 = arith.constant 0 : index
    %145 = vector.load %arg9[%c0_50, %c0_51] : memref<128x64xf32, #tpu.memory_space<vmem>>, vector<128x64xf32>
    %cst_52 = arith.constant dense<0.000000e+00> : vector<32x64xf32>
    %146 = tpu.matmul %144, %145, %cst_52 {dimension_numbers = #tpu.dot_dimension_numbers<[1], [0], [0], [1], [0, 0, 1, 1], [], []>} : vector<32x128xf32>, vector<128x64xf32>, vector<32x64xf32> -> vector<32x64xf32>
    %c0_53 = arith.constant 0 : index
    %c0_54 = arith.constant 0 : index
    %147 = vector.load %arg10[%c0_53, %c0_54] : memref<1x64xf32, #tpu.memory_space<vmem>>, vector<1x64xf32>
    %148 = vector.broadcast %147 : vector<1x64xf32> to vector<32x64xf32>
    %149 = arith.addf %146, %148 : vector<32x64xf32>
    %150 = arith.negf %149 : vector<32x64xf32>
    %151 = math.exp %150 : vector<32x64xf32>
    %cst_55 = arith.constant 1.000000e+00 : f32
    %152 = vector.broadcast %cst_55 : f32 to vector<32x64xf32>
    %153 = arith.addf %152, %151 : vector<32x64xf32>
    %154 = arith.divf %152, %153 : vector<32x64xf32>
    %155 = arith.mulf %149, %154 : vector<32x64xf32>
    %c0_56 = arith.constant 0 : index
    %c0_57 = arith.constant 0 : index
    %156 = vector.load %arg11[%c0_56, %c0_57] : memref<64x128xf32, #tpu.memory_space<vmem>>, vector<64x128xf32>
    %cst_58 = arith.constant dense<0.000000e+00> : vector<32x128xf32>
    %157 = tpu.matmul %155, %156, %cst_58 {dimension_numbers = #tpu.dot_dimension_numbers<[1], [0], [0], [1], [0, 0, 1, 1], [], []>} : vector<32x64xf32>, vector<64x128xf32>, vector<32x128xf32> -> vector<32x128xf32>
    %c0_59 = arith.constant 0 : index
    %c0_60 = arith.constant 0 : index
    %158 = vector.load %arg12[%c0_59, %c0_60] : memref<1x128xf32, #tpu.memory_space<vmem>>, vector<1x128xf32>
    %159 = vector.broadcast %158 : vector<1x128xf32> to vector<32x128xf32>
    %160 = arith.addf %157, %159 : vector<32x128xf32>
    %161 = arith.addf %160, %117 : vector<32x128xf32>
    %162 = vector.shape_cast %161 : vector<32x128xf32> to vector<4x8x128xf32>
    %c0_61 = arith.constant 0 : index
    %c0_62 = arith.constant 0 : index
    %c0_63 = arith.constant 0 : index
    %163 = vector.load %arg13[%c0_61, %c0_62, %c0_63] : memref<4x8x128xf32, #tpu.memory_space<vmem>>, vector<4x8x128xf32>
    tpu.vector_store %arg13[%c0_61, %c0_62, %c0_63], %162 {strides = array<i32>} : memref<4x8x128xf32, #tpu.memory_space<vmem>>, vector<4x8x128xf32>,
    return
  }
  func.func @transform_0(%arg0: i32) -> (i32, i32, i32) {
    %c0_i32 = arith.constant 0 : i32
    %c0_i32_0 = arith.constant 0 : i32
    %c0_i32_1 = arith.constant 0 : i32
    return %arg0, %c0_i32, %c0_i32_0 : i32, i32, i32
  }
  func.func @transform_1(%arg0: i32) -> (i32, i32) {
    %c0_i32 = arith.constant 0 : i32
    %c0_i32_0 = arith.constant 0 : i32
    %c0_i32_1 = arith.constant 0 : i32
    return %c0_i32, %c0_i32_0 : i32, i32
  }
  func.func @transform_2(%arg0: i32) -> (i32, i32) {
    %c0_i32 = arith.constant 0 : i32
    %c0_i32_0 = arith.constant 0 : i32
    %c0_i32_1 = arith.constant 0 : i32
    return %c0_i32, %c0_i32_0 : i32, i32
  }
  func.func @transform_3(%arg0: i32) -> (i32, i32) {
    %c0_i32 = arith.constant 0 : i32
    %c0_i32_0 = arith.constant 0 : i32
    %c0_i32_1 = arith.constant 0 : i32
    return %c0_i32, %c0_i32_0 : i32, i32
  }
  func.func @transform_4(%arg0: i32) -> (i32, i32) {
    %c0_i32 = arith.constant 0 : i32
    %c0_i32_0 = arith.constant 0 : i32
    %c0_i32_1 = arith.constant 0 : i32
    return %c0_i32, %c0_i32_0 : i32, i32
  }
  func.func @transform_5(%arg0: i32) -> (i32, i32) {
    %c0_i32 = arith.constant 0 : i32
    %c0_i32_0 = arith.constant 0 : i32
    %c0_i32_1 = arith.constant 0 : i32
    return %c0_i32, %c0_i32_0 : i32, i32
  }
  func.func @transform_6(%arg0: i32) -> (i32, i32) {
    %c0_i32 = arith.constant 0 : i32
    %c0_i32_0 = arith.constant 0 : i32
    %c0_i32_1 = arith.constant 0 : i32
    return %c0_i32, %c0_i32_0 : i32, i32
  }
  func.func @transform_7(%arg0: i32) -> (i32, i32) {
    %c0_i32 = arith.constant 0 : i32
    %c0_i32_0 = arith.constant 0 : i32
    %c0_i32_1 = arith.constant 0 : i32
    return %c0_i32, %c0_i32_0 : i32, i32
  }
  func.func @transform_8(%arg0: i32) -> (i32, i32) {
    %c0_i32 = arith.constant 0 : i32
    %c0_i32_0 = arith.constant 0 : i32
    %c0_i32_1 = arith.constant 0 : i32
    return %c0_i32, %c0_i32_0 : i32, i32
  }
  func.func @transform_9(%arg0: i32) -> (i32, i32) {
    %c0_i32 = arith.constant 0 : i32
    %c0_i32_0 = arith.constant 0 : i32
    %c0_i32_1 = arith.constant 0 : i32
    return %c0_i32, %c0_i32_0 : i32, i32
  }
  func.func @transform_10(%arg0: i32) -> (i32, i32) {
    %c0_i32 = arith.constant 0 : i32
    %c0_i32_0 = arith.constant 0 : i32
    %c0_i32_1 = arith.constant 0 : i32
    return %c0_i32, %c0_i32_0 : i32, i32
  }
  func.func @transform_11(%arg0: i32) -> (i32, i32) {
    %c0_i32 = arith.constant 0 : i32
    %c0_i32_0 = arith.constant 0 : i32
    %c0_i32_1 = arith.constant 0 : i32
    return %c0_i32, %c0_i32_0 : i32, i32
  }
  func.func @transform_12(%arg0: i32) -> (i32, i32, i32) {
    %c0_i32 = arith.constant 0 : i32
    %c0_i32_0 = arith.constant 0 : i32
    %c0_i32_1 = arith.constant 0 : i32
    return %arg0, %c0_i32, %c0_i32_0 : i32, i32, i32
  }
}

module attributes {stable_mosaic.version = 11 : i64} {
  func.func @layer_kernel(%arg0: i32, %arg1: memref<4x8x128xf32, #tpu.memory_space<vmem>>, %arg2: memref<1x128xf32, #tpu.memory_space<vmem>>, %arg3: memref<1x128xf32, #tpu.memory_space<vmem>>, %arg4: memref<128x96xf32, #tpu.memory_space<vmem>>, %arg5: memref<32x128xf32, #tpu.memory_space<vmem>>, %arg6: memref<1x128xf32, #tpu.memory_space<vmem>>, %arg7: memref<1x128xf32, #tpu.memory_space<vmem>>, %arg8: memref<1x128xf32, #tpu.memory_space<vmem>>, %arg9: memref<128x64xf32, #tpu.memory_space<vmem>>, %arg10: memref<1x64xf32, #tpu.memory_space<vmem>>, %arg11: memref<64x128xf32, #tpu.memory_space<vmem>>, %arg12: memref<1x128xf32, #tpu.memory_space<vmem>>, %arg13: memref<4x8x128xf32, #tpu.memory_space<vmem>>) attributes {dimension_semantics = [#tpu.dimension_semantics<parallel>], iteration_bounds = array<i64: 2>, scalar_prefetch = 0 : i64, scratch_operands = 0 : i64, tpu.core_type = #tpu.core_type<tc>, window_params = [{transform_indices = @transform_0, window_bounds = array<i64: 4, 8, 128>}, {pipeline_mode = #tpu.pipeline_mode<synchronous>, transform_indices = @transform_1, window_bounds = array<i64: 1, 128>}, {pipeline_mode = #tpu.pipeline_mode<synchronous>, transform_indices = @transform_2, window_bounds = array<i64: 1, 128>}, {pipeline_mode = #tpu.pipeline_mode<synchronous>, transform_indices = @transform_3, window_bounds = array<i64: 128, 96>}, {pipeline_mode = #tpu.pipeline_mode<synchronous>, transform_indices = @transform_4, window_bounds = array<i64: 32, 128>}, {pipeline_mode = #tpu.pipeline_mode<synchronous>, transform_indices = @transform_5, window_bounds = array<i64: 1, 128>}, {pipeline_mode = #tpu.pipeline_mode<synchronous>, transform_indices = @transform_6, window_bounds = array<i64: 1, 128>}, {pipeline_mode = #tpu.pipeline_mode<synchronous>, transform_indices = @transform_7, window_bounds = array<i64: 1, 128>}, {pipeline_mode = #tpu.pipeline_mode<synchronous>, transform_indices = @transform_8, window_bounds = array<i64: 128, 64>}, {pipeline_mode = #tpu.pipeline_mode<synchronous>, transform_indices = @transform_9, window_bounds = array<i64: 1, 64>}, {pipeline_mode = #tpu.pipeline_mode<synchronous>, transform_indices = @transform_10, window_bounds = array<i64: 64, 128>}, {pipeline_mode = #tpu.pipeline_mode<synchronous>, transform_indices = @transform_11, window_bounds = array<i64: 1, 128>}, {transform_indices = @transform_12, window_bounds = array<i64: 4, 8, 128>}]} {
    %c0 = arith.constant 0 : index
    %c0_0 = arith.constant 0 : index
    %c0_1 = arith.constant 0 : index
    %0 = vector.load %arg1[%c0, %c0_0, %c0_1] : memref<4x8x128xf32, #tpu.memory_space<vmem>>, vector<4x8x128xf32>
    %c0_2 = arith.constant 0 : index
    %c0_3 = arith.constant 0 : index
    %1 = vector.load %arg2[%c0_2, %c0_3] : memref<1x128xf32, #tpu.memory_space<vmem>>, vector<1x128xf32>
    %c0_4 = arith.constant 0 : index
    %c0_5 = arith.constant 0 : index
    %2 = vector.load %arg3[%c0_4, %c0_5] : memref<1x128xf32, #tpu.memory_space<vmem>>, vector<1x128xf32>
    %cst = arith.constant dense<0.000000e+00> : vector<4x8xf32>
    %3 = vector.multi_reduction <add>, %0, %cst [2] : vector<4x8x128xf32> to vector<4x8xf32>
    %4 = vector.shape_cast %3 : vector<4x8xf32> to vector<4x8x1xf32>
    %cst_6 = arith.constant 3.125000e-02 : f32
    %5 = vector.broadcast %cst_6 : f32 to vector<4x8x1xf32>
    %6 = arith.mulf %4, %5 : vector<4x8x1xf32>
    %7 = tpu.iota {dimensions = array<i32: 2>} : vector<4x8x128xi32>
    %c32_i32 = arith.constant 32 : i32
    %8 = vector.broadcast %c32_i32 : i32 to vector<4x8x128xi32>
    %9 = arith.cmpi slt, %7, %8 : vector<4x8x128xi32>
    %10 = vector.broadcast %6 : vector<4x8x1xf32> to vector<4x8x128xf32>
    %11 = arith.subf %0, %10 : vector<4x8x128xf32>
    %cst_7 = arith.constant 0.000000e+00 : f32
    %12 = vector.broadcast %cst_7 : f32 to vector<4x8x128xf32>
    %13 = arith.select %9, %11, %12 : vector<4x8x128xi1>, vector<4x8x128xf32>
    %14 = arith.mulf %13, %13 : vector<4x8x128xf32>
    %cst_8 = arith.constant dense<0.000000e+00> : vector<4x8xf32>
    %15 = vector.multi_reduction <add>, %14, %cst_8 [2] : vector<4x8x128xf32> to vector<4x8xf32>
    %16 = vector.shape_cast %15 : vector<4x8xf32> to vector<4x8x1xf32>
    %cst_9 = arith.constant 3.125000e-02 : f32
    %17 = vector.broadcast %cst_9 : f32 to vector<4x8x1xf32>
    %18 = arith.mulf %16, %17 : vector<4x8x1xf32>
    %cst_10 = arith.constant 9.99999974E-6 : f32
    %19 = vector.broadcast %cst_10 : f32 to vector<4x8x1xf32>
    %20 = arith.addf %18, %19 : vector<4x8x1xf32>
    %21 = math.rsqrt %20 : vector<4x8x1xf32>
    %22 = vector.broadcast %21 : vector<4x8x1xf32> to vector<4x8x128xf32>
    %23 = arith.mulf %13, %22 : vector<4x8x128xf32>
    %24 = vector.shape_cast %1 : vector<1x128xf32> to vector<1x1x128xf32>
    %25 = vector.broadcast %24 : vector<1x1x128xf32> to vector<4x8x128xf32>
    %26 = arith.mulf %23, %25 : vector<4x8x128xf32>
    %27 = vector.shape_cast %2 : vector<1x128xf32> to vector<1x1x128xf32>
    %28 = vector.broadcast %27 : vector<1x1x128xf32> to vector<4x8x128xf32>
    %29 = arith.addf %26, %28 : vector<4x8x128xf32>
    %30 = vector.shape_cast %29 : vector<4x8x128xf32> to vector<32x128xf32>
    %c0_11 = arith.constant 0 : index
    %c0_12 = arith.constant 0 : index
    %31 = vector.load %arg4[%c0_11, %c0_12] : memref<128x96xf32, #tpu.memory_space<vmem>>, vector<128x96xf32>
    %cst_13 = arith.constant dense<0.000000e+00> : vector<32x96xf32>
    %32 = tpu.matmul %30, %31, %cst_13 {dimension_numbers = #tpu.dot_dimension_numbers<[1], [0], [0], [1], [0, 0, 1, 1], [], []>} : vector<32x128xf32>, vector<128x96xf32>, vector<32x96xf32> -> vector<32x96xf32>
    %33 = vector.extract_strided_slice %32 {offsets = [0, 0], sizes = [32, 8], strides = [1, 1]} : vector<32x96xf32> to vector<32x8xf32>
    %34 = vector.shape_cast %33 : vector<32x8xf32> to vector<4x8x8xf32>
    %35 = vector.extract_strided_slice %32 {offsets = [0, 32], sizes = [32, 8], strides = [1, 1]} : vector<32x96xf32> to vector<32x8xf32>
    %36 = vector.shape_cast %35 : vector<32x8xf32> to vector<4x8x8xf32>
    %37 = vector.extract_strided_slice %32 {offsets = [0, 64], sizes = [32, 8], strides = [1, 1]} : vector<32x96xf32> to vector<32x8xf32>
    %38 = vector.shape_cast %37 : vector<32x8xf32> to vector<4x8x8xf32>
    "tpu.trace_start"() <{level = 10 : i32, message = "gnd,gmd->gnm"}> : () -> ()
    %cst_14 = arith.constant dense<0.000000e+00> : vector<4x8x8xf32>
    %39 = tpu.matmul %34, %36, %cst_14 {dimension_numbers = #tpu.dot_dimension_numbers<[2], [2], [1], [1], [0, 0, 0, 1, 1, 1], [0], [0]>} : vector<4x8x8xf32>, vector<4x8x8xf32>, vector<4x8x8xf32> -> vector<4x8x8xf32>
    "tpu.trace_stop"() : () -> ()
    %cst_15 = arith.constant 0.353553385 : f32
    %40 = vector.broadcast %cst_15 : f32 to vector<4x8x8xf32>
    %41 = arith.mulf %39, %40 : vector<4x8x8xf32>
    %cst_16 = arith.constant dense<0xFF800000> : vector<4x8xf32>
    %42 = vector.multi_reduction <maximumf>, %41, %cst_16 [2] : vector<4x8x8xf32> to vector<4x8xf32>
    %43 = vector.shape_cast %42 : vector<4x8xf32> to vector<4x8x1xf32>
    %44 = vector.broadcast %43 : vector<4x8x1xf32> to vector<4x8x8xf32>
    %45 = arith.subf %41, %44 : vector<4x8x8xf32>
    %46 = math.exp %45 : vector<4x8x8xf32>
    %cst_17 = arith.constant dense<0.000000e+00> : vector<4x8xf32>
    %47 = vector.multi_reduction <add>, %46, %cst_17 [2] : vector<4x8x8xf32> to vector<4x8xf32>
    %48 = vector.shape_cast %47 : vector<4x8xf32> to vector<4x8x1xf32>
    %49 = vector.broadcast %48 : vector<4x8x1xf32> to vector<4x8x8xf32>
    %50 = arith.divf %46, %49 : vector<4x8x8xf32>
    "tpu.trace_start"() <{level = 10 : i32, message = "gnm,gmd->gnd"}> : () -> ()
    %cst_18 = arith.constant dense<0.000000e+00> : vector<4x8x8xf32>
    %51 = tpu.matmul %50, %38, %cst_18 {dimension_numbers = #tpu.dot_dimension_numbers<[2], [1], [1], [2], [0, 0, 0, 1, 1, 2], [0], [0]>} : vector<4x8x8xf32>, vector<4x8x8xf32>, vector<4x8x8xf32> -> vector<4x8x8xf32>
    "tpu.trace_stop"() : () -> ()
    %52 = vector.extract_strided_slice %32 {offsets = [0, 8], sizes = [32, 8], strides = [1, 1]} : vector<32x96xf32> to vector<32x8xf32>
    %53 = vector.shape_cast %52 : vector<32x8xf32> to vector<4x8x8xf32>
    %54 = vector.extract_strided_slice %32 {offsets = [0, 40], sizes = [32, 8], strides = [1, 1]} : vector<32x96xf32> to vector<32x8xf32>
    %55 = vector.shape_cast %54 : vector<32x8xf32> to vector<4x8x8xf32>
    %56 = vector.extract_strided_slice %32 {offsets = [0, 72], sizes = [32, 8], strides = [1, 1]} : vector<32x96xf32> to vector<32x8xf32>
    %57 = vector.shape_cast %56 : vector<32x8xf32> to vector<4x8x8xf32>
    "tpu.trace_start"() <{level = 10 : i32, message = "gnd,gmd->gnm"}> : () -> ()
    %cst_19 = arith.constant dense<0.000000e+00> : vector<4x8x8xf32>
    %58 = tpu.matmul %53, %55, %cst_19 {dimension_numbers = #tpu.dot_dimension_numbers<[2], [2], [1], [1], [0, 0, 0, 1, 1, 1], [0], [0]>} : vector<4x8x8xf32>, vector<4x8x8xf32>, vector<4x8x8xf32> -> vector<4x8x8xf32>
    "tpu.trace_stop"() : () -> ()
    %cst_20 = arith.constant 0.353553385 : f32
    %59 = vector.broadcast %cst_20 : f32 to vector<4x8x8xf32>
    %60 = arith.mulf %58, %59 : vector<4x8x8xf32>
    %cst_21 = arith.constant dense<0xFF800000> : vector<4x8xf32>
    %61 = vector.multi_reduction <maximumf>, %60, %cst_21 [2] : vector<4x8x8xf32> to vector<4x8xf32>
    %62 = vector.shape_cast %61 : vector<4x8xf32> to vector<4x8x1xf32>
    %63 = vector.broadcast %62 : vector<4x8x1xf32> to vector<4x8x8xf32>
    %64 = arith.subf %60, %63 : vector<4x8x8xf32>
    %65 = math.exp %64 : vector<4x8x8xf32>
    %cst_22 = arith.constant dense<0.000000e+00> : vector<4x8xf32>
    %66 = vector.multi_reduction <add>, %65, %cst_22 [2] : vector<4x8x8xf32> to vector<4x8xf32>
    %67 = vector.shape_cast %66 : vector<4x8xf32> to vector<4x8x1xf32>
    %68 = vector.broadcast %67 : vector<4x8x1xf32> to vector<4x8x8xf32>
    %69 = arith.divf %65, %68 : vector<4x8x8xf32>
    "tpu.trace_start"() <{level = 10 : i32, message = "gnm,gmd->gnd"}> : () -> ()
    %cst_23 = arith.constant dense<0.000000e+00> : vector<4x8x8xf32>
    %70 = tpu.matmul %69, %57, %cst_23 {dimension_numbers = #tpu.dot_dimension_numbers<[2], [1], [1], [2], [0, 0, 0, 1, 1, 2], [0], [0]>} : vector<4x8x8xf32>, vector<4x8x8xf32>, vector<4x8x8xf32> -> vector<4x8x8xf32>
    "tpu.trace_stop"() : () -> ()
    %71 = vector.extract_strided_slice %32 {offsets = [0, 16], sizes = [32, 8], strides = [1, 1]} : vector<32x96xf32> to vector<32x8xf32>
    %72 = vector.shape_cast %71 : vector<32x8xf32> to vector<4x8x8xf32>
    %73 = vector.extract_strided_slice %32 {offsets = [0, 48], sizes = [32, 8], strides = [1, 1]} : vector<32x96xf32> to vector<32x8xf32>
    %74 = vector.shape_cast %73 : vector<32x8xf32> to vector<4x8x8xf32>
    %75 = vector.extract_strided_slice %32 {offsets = [0, 80], sizes = [32, 8], strides = [1, 1]} : vector<32x96xf32> to vector<32x8xf32>
    %76 = vector.shape_cast %75 : vector<32x8xf32> to vector<4x8x8xf32>
    "tpu.trace_start"() <{level = 10 : i32, message = "gnd,gmd->gnm"}> : () -> ()
    %cst_24 = arith.constant dense<0.000000e+00> : vector<4x8x8xf32>
    %77 = tpu.matmul %72, %74, %cst_24 {dimension_numbers = #tpu.dot_dimension_numbers<[2], [2], [1], [1], [0, 0, 0, 1, 1, 1], [0], [0]>} : vector<4x8x8xf32>, vector<4x8x8xf32>, vector<4x8x8xf32> -> vector<4x8x8xf32>
    "tpu.trace_stop"() : () -> ()
    %cst_25 = arith.constant 0.353553385 : f32
    %78 = vector.broadcast %cst_25 : f32 to vector<4x8x8xf32>
    %79 = arith.mulf %77, %78 : vector<4x8x8xf32>
    %cst_26 = arith.constant dense<0xFF800000> : vector<4x8xf32>
    %80 = vector.multi_reduction <maximumf>, %79, %cst_26 [2] : vector<4x8x8xf32> to vector<4x8xf32>
    %81 = vector.shape_cast %80 : vector<4x8xf32> to vector<4x8x1xf32>
    %82 = vector.broadcast %81 : vector<4x8x1xf32> to vector<4x8x8xf32>
    %83 = arith.subf %79, %82 : vector<4x8x8xf32>
    %84 = math.exp %83 : vector<4x8x8xf32>
    %cst_27 = arith.constant dense<0.000000e+00> : vector<4x8xf32>
    %85 = vector.multi_reduction <add>, %84, %cst_27 [2] : vector<4x8x8xf32> to vector<4x8xf32>
    %86 = vector.shape_cast %85 : vector<4x8xf32> to vector<4x8x1xf32>
    %87 = vector.broadcast %86 : vector<4x8x1xf32> to vector<4x8x8xf32>
    %88 = arith.divf %84, %87 : vector<4x8x8xf32>
    "tpu.trace_start"() <{level = 10 : i32, message = "gnm,gmd->gnd"}> : () -> ()
    %cst_28 = arith.constant dense<0.000000e+00> : vector<4x8x8xf32>
    %89 = tpu.matmul %88, %76, %cst_28 {dimension_numbers = #tpu.dot_dimension_numbers<[2], [1], [1], [2], [0, 0, 0, 1, 1, 2], [0], [0]>} : vector<4x8x8xf32>, vector<4x8x8xf32>, vector<4x8x8xf32> -> vector<4x8x8xf32>
    "tpu.trace_stop"() : () -> ()
    %90 = vector.extract_strided_slice %32 {offsets = [0, 24], sizes = [32, 8], strides = [1, 1]} : vector<32x96xf32> to vector<32x8xf32>
    %91 = vector.shape_cast %90 : vector<32x8xf32> to vector<4x8x8xf32>
    %92 = vector.extract_strided_slice %32 {offsets = [0, 56], sizes = [32, 8], strides = [1, 1]} : vector<32x96xf32> to vector<32x8xf32>
    %93 = vector.shape_cast %92 : vector<32x8xf32> to vector<4x8x8xf32>
    %94 = vector.extract_strided_slice %32 {offsets = [0, 88], sizes = [32, 8], strides = [1, 1]} : vector<32x96xf32> to vector<32x8xf32>
    %95 = vector.shape_cast %94 : vector<32x8xf32> to vector<4x8x8xf32>
    "tpu.trace_start"() <{level = 10 : i32, message = "gnd,gmd->gnm"}> : () -> ()
    %cst_29 = arith.constant dense<0.000000e+00> : vector<4x8x8xf32>
    %96 = tpu.matmul %91, %93, %cst_29 {dimension_numbers = #tpu.dot_dimension_numbers<[2], [2], [1], [1], [0, 0, 0, 1, 1, 1], [0], [0]>} : vector<4x8x8xf32>, vector<4x8x8xf32>, vector<4x8x8xf32> -> vector<4x8x8xf32>
    "tpu.trace_stop"() : () -> ()
    %cst_30 = arith.constant 0.353553385 : f32
    %97 = vector.broadcast %cst_30 : f32 to vector<4x8x8xf32>
    %98 = arith.mulf %96, %97 : vector<4x8x8xf32>
    %cst_31 = arith.constant dense<0xFF800000> : vector<4x8xf32>
    %99 = vector.multi_reduction <maximumf>, %98, %cst_31 [2] : vector<4x8x8xf32> to vector<4x8xf32>
    %100 = vector.shape_cast %99 : vector<4x8xf32> to vector<4x8x1xf32>
    %101 = vector.broadcast %100 : vector<4x8x1xf32> to vector<4x8x8xf32>
    %102 = arith.subf %98, %101 : vector<4x8x8xf32>
    %103 = math.exp %102 : vector<4x8x8xf32>
    %cst_32 = arith.constant dense<0.000000e+00> : vector<4x8xf32>
    %104 = vector.multi_reduction <add>, %103, %cst_32 [2] : vector<4x8x8xf32> to vector<4x8xf32>
    %105 = vector.shape_cast %104 : vector<4x8xf32> to vector<4x8x1xf32>
    %106 = vector.broadcast %105 : vector<4x8x1xf32> to vector<4x8x8xf32>
    %107 = arith.divf %103, %106 : vector<4x8x8xf32>
    "tpu.trace_start"() <{level = 10 : i32, message = "gnm,gmd->gnd"}> : () -> ()
    %cst_33 = arith.constant dense<0.000000e+00> : vector<4x8x8xf32>
    %108 = tpu.matmul %107, %95, %cst_33 {dimension_numbers = #tpu.dot_dimension_numbers<[2], [1], [1], [2], [0, 0, 0, 1, 1, 2], [0], [0]>} : vector<4x8x8xf32>, vector<4x8x8xf32>, vector<4x8x8xf32> -> vector<4x8x8xf32>
    "tpu.trace_stop"() : () -> ()
    %109 = tpu.concatenate %51, %70, %89, %108 in 2 : vector<4x8x8xf32>, vector<4x8x8xf32>, vector<4x8x8xf32>, vector<4x8x8xf32> -> vector<4x8x32xf32>
    %110 = vector.shape_cast %109 : vector<4x8x32xf32> to vector<32x32xf32>
    %c0_34 = arith.constant 0 : index
    %c0_35 = arith.constant 0 : index
    %111 = vector.load %arg5[%c0_34, %c0_35] : memref<32x128xf32, #tpu.memory_space<vmem>>, vector<32x128xf32>
    %cst_36 = arith.constant dense<0.000000e+00> : vector<32x128xf32>
    %112 = tpu.matmul %110, %111, %cst_36 {dimension_numbers = #tpu.dot_dimension_numbers<[1], [0], [0], [1], [0, 0, 1, 1], [], []>} : vector<32x32xf32>, vector<32x128xf32>, vector<32x128xf32> -> vector<32x128xf32>
    %c0_37 = arith.constant 0 : index
    %c0_38 = arith.constant 0 : index
    %113 = vector.load %arg6[%c0_37, %c0_38] : memref<1x128xf32, #tpu.memory_space<vmem>>, vector<1x128xf32>
    %114 = vector.broadcast %113 : vector<1x128xf32> to vector<32x128xf32>
    %115 = arith.addf %112, %114 : vector<32x128xf32>
    %116 = vector.shape_cast %0 : vector<4x8x128xf32> to vector<32x128xf32>
    %117 = arith.addf %115, %116 : vector<32x128xf32>
    %c0_39 = arith.constant 0 : index
    %c0_40 = arith.constant 0 : index
    %118 = vector.load %arg7[%c0_39, %c0_40] : memref<1x128xf32, #tpu.memory_space<vmem>>, vector<1x128xf32>
    %c0_41 = arith.constant 0 : index
    %c0_42 = arith.constant 0 : index
    %119 = vector.load %arg8[%c0_41, %c0_42] : memref<1x128xf32, #tpu.memory_space<vmem>>, vector<1x128xf32>
    %cst_43 = arith.constant dense<0.000000e+00> : vector<32xf32>
    %120 = vector.multi_reduction <add>, %117, %cst_43 [1] : vector<32x128xf32> to vector<32xf32>
    %121 = vector.shape_cast %120 : vector<32xf32> to vector<32x1xf32>
    %cst_44 = arith.constant 3.125000e-02 : f32
    %122 = vector.broadcast %cst_44 : f32 to vector<32x1xf32>
    %123 = arith.mulf %121, %122 : vector<32x1xf32>
    %124 = tpu.iota {dimensions = array<i32: 1>} : vector<32x128xi32>
    %c32_i32_45 = arith.constant 32 : i32
    %125 = vector.broadcast %c32_i32_45 : i32 to vector<32x128xi32>
    %126 = arith.cmpi slt, %124, %125 : vector<32x128xi32>
    %127 = vector.broadcast %123 : vector<32x1xf32> to vector<32x128xf32>
    %128 = arith.subf %117, %127 : vector<32x128xf32>
    %cst_46 = arith.constant 0.000000e+00 : f32
    %129 = vector.broadcast %cst_46 : f32 to vector<32x128xf32>
    %130 = arith.select %126, %128, %129 : vector<32x128xi1>, vector<32x128xf32>
    %131 = arith.mulf %130, %130 : vector<32x128xf32>
    %cst_47 = arith.constant dense<0.000000e+00> : vector<32xf32>
    %132 = vector.multi_reduction <add>, %131, %cst_47 [1] : vector<32x128xf32> to vector<32xf32>
    %133 = vector.shape_cast %132 : vector<32xf32> to vector<32x1xf32>
    %cst_48 = arith.constant 3.125000e-02 : f32
    %134 = vector.broadcast %cst_48 : f32 to vector<32x1xf32>
    %135 = arith.mulf %133, %134 : vector<32x1xf32>
    %cst_49 = arith.constant 9.99999974E-6 : f32
    %136 = vector.broadcast %cst_49 : f32 to vector<32x1xf32>
    %137 = arith.addf %135, %136 : vector<32x1xf32>
    %138 = math.rsqrt %137 : vector<32x1xf32>
    %139 = vector.broadcast %138 : vector<32x1xf32> to vector<32x128xf32>
    %140 = arith.mulf %130, %139 : vector<32x128xf32>
    %141 = vector.broadcast %118 : vector<1x128xf32> to vector<32x128xf32>
    %142 = arith.mulf %140, %141 : vector<32x128xf32>
    %143 = vector.broadcast %119 : vector<1x128xf32> to vector<32x128xf32>
    %144 = arith.addf %142, %143 : vector<32x128xf32>
    %c0_50 = arith.constant 0 : index
    %c0_51 = arith.constant 0 : index
    %145 = vector.load %arg9[%c0_50, %c0_51] : memref<128x64xf32, #tpu.memory_space<vmem>>, vector<128x64xf32>
    %cst_52 = arith.constant dense<0.000000e+00> : vector<32x64xf32>
    %146 = tpu.matmul %144, %145, %cst_52 {dimension_numbers = #tpu.dot_dimension_numbers<[1], [0], [0], [1], [0, 0, 1, 1], [], []>} : vector<32x128xf32>, vector<128x64xf32>, vector<32x64xf32> -> vector<32x64xf32>
    %c0_53 = arith.constant 0 : index
    %c0_54 = arith.constant 0 : index
    %147 = vector.load %arg10[%c0_53, %c0_54] : memref<1x64xf32, #tpu.memory_space<vmem>>, vector<1x64xf32>
    %148 = vector.broadcast %147 : vector<1x64xf32> to vector<32x64xf32>
    %149 = arith.addf %146, %148 : vector<32x64xf32>
    %150 = arith.negf %149 : vector<32x64xf32>
    %151 = math.exp %150 : vector<32x64xf32>
    %cst_55 = arith.constant 1.000000e+00 : f32
    %152 = vector.broadcast %cst_55 : f32 to vector<32x64xf32>
    %153 = arith.addf %152, %151 : vector<32x64xf32>
    %154 = arith.divf %152, %153 : vector<32x64xf32>
    %155 = arith.mulf %149, %154 : vector<32x64xf32>
    %c0_56 = arith.constant 0 : index
    %c0_57 = arith.constant 0 : index
    %156 = vector.load %arg11[%c0_56, %c0_57] : memref<64x128xf32, #tpu.memory_space<vmem>>, vector<64x128xf32>
    %cst_58 = arith.constant dense<0.000000e+00> : vector<32x128xf32>
    %157 = tpu.matmul %155, %156, %cst_58 {dimension_numbers = #tpu.dot_dimension_numbers<[1], [0], [0], [1], [0, 0, 1, 1], [], []>} : vector<32x64xf32>, vector<64x128xf32>, vector<32x128xf32> -> vector<32x128xf32>
    %c0_59 = arith.constant 0 : index
    %c0_60 = arith.constant 0 : index
    %158 = vector.load %arg12[%c0_59, %c0_60] : memref<1x128xf32, #tpu.memory_space<vmem>>, vector<1x128xf32>
    %159 = vector.broadcast %158 : vector<1x128xf32> to vector<32x128xf32>
    %160 = arith.addf %157, %159 : vector<32x128xf32>
    %161 = arith.addf %160, %117 : vector<32x128xf32>
    %162 = vector.shape_cast %161 : vector<32x128xf32> to vector<4x8x128xf32>
    %c0_61 = arith.constant 0 : index
    %c0_62 = arith.constant 0 : index
    %c0_63 = arith.constant 0 : index
    %163 = vector.load %arg13[%c0_61, %c0_62, %c0_63] : memref<4x8x128xf32, #tpu.memory_space<vmem>>, vector<4x8x128xf32>
    tpu.vector_store %arg13[%c0_61, %c0_62, %c0_63], %162 {strides = array<i32>} : memref<4x8x128xf32, #tpu.memory_space<vmem>>, vector<4x8x128xf32>,
    return
  }
  func.func @transform_0(%arg0: i32) -> (i32, i32, i32) {
    %c0_i32 = arith.constant 0 : i32
    %c0_i32_0 = arith.constant 0 : i32
    %c0_i32_1 = arith.constant 0 : i32
    return %arg0, %c0_i32, %c0_i32_0 : i32, i32, i32
  }
  func.func @transform_1(%arg0: i32) -> (i32, i32) {
    %c0_i32 = arith.constant 0 : i32
    %c0_i32_0 = arith.constant 0 : i32
    %c0_i32_1 = arith.constant 0 : i32
    return %c0_i32, %c0_i32_0 : i32, i32
  }
  func.func @transform_2(%arg0: i32) -> (i32, i32) {
    %c0_i32 = arith.constant 0 : i32
    %c0_i32_0 = arith.constant 0 : i32
    %c0_i32_1 = arith.constant 0 : i32
    return %c0_i32, %c0_i32_0 : i32, i32
  }
  func.func @transform_3(%arg0: i32) -> (i32, i32) {
    %c0_i32 = arith.constant 0 : i32
    %c0_i32_0 = arith.constant 0 : i32
    %c0_i32_1 = arith.constant 0 : i32
    return %c0_i32, %c0_i32_0 : i32, i32
  }
  func.func @transform_4(%arg0: i32) -> (i32, i32) {
    %c0_i32 = arith.constant 0 : i32
    %c0_i32_0 = arith.constant 0 : i32
    %c0_i32_1 = arith.constant 0 : i32
    return %c0_i32, %c0_i32_0 : i32, i32
  }
  func.func @transform_5(%arg0: i32) -> (i32, i32) {
    %c0_i32 = arith.constant 0 : i32
    %c0_i32_0 = arith.constant 0 : i32
    %c0_i32_1 = arith.constant 0 : i32
    return %c0_i32, %c0_i32_0 : i32, i32
  }
  func.func @transform_6(%arg0: i32) -> (i32, i32) {
    %c0_i32 = arith.constant 0 : i32
    %c0_i32_0 = arith.constant 0 : i32
    %c0_i32_1 = arith.constant 0 : i32
    return %c0_i32, %c0_i32_0 : i32, i32
  }
  func.func @transform_7(%arg0: i32) -> (i32, i32) {
    %c0_i32 = arith.constant 0 : i32
    %c0_i32_0 = arith.constant 0 : i32
    %c0_i32_1 = arith.constant 0 : i32
    return %c0_i32, %c0_i32_0 : i32, i32
  }
  func.func @transform_8(%arg0: i32) -> (i32, i32) {
    %c0_i32 = arith.constant 0 : i32
    %c0_i32_0 = arith.constant 0 : i32
    %c0_i32_1 = arith.constant 0 : i32
    return %c0_i32, %c0_i32_0 : i32, i32
  }
  func.func @transform_9(%arg0: i32) -> (i32, i32) {
    %c0_i32 = arith.constant 0 : i32
    %c0_i32_0 = arith.constant 0 : i32
    %c0_i32_1 = arith.constant 0 : i32
    return %c0_i32, %c0_i32_0 : i32, i32
  }
  func.func @transform_10(%arg0: i32) -> (i32, i32) {
    %c0_i32 = arith.constant 0 : i32
    %c0_i32_0 = arith.constant 0 : i32
    %c0_i32_1 = arith.constant 0 : i32
    return %c0_i32, %c0_i32_0 : i32, i32
  }
  func.func @transform_11(%arg0: i32) -> (i32, i32) {
    %c0_i32 = arith.constant 0 : i32
    %c0_i32_0 = arith.constant 0 : i32
    %c0_i32_1 = arith.constant 0 : i32
    return %c0_i32, %c0_i32_0 : i32, i32
  }
  func.func @transform_12(%arg0: i32) -> (i32, i32, i32) {
    %c0_i32 = arith.constant 0 : i32
    %c0_i32_0 = arith.constant 0 : i32
    %c0_i32_1 = arith.constant 0 : i32
    return %arg0, %c0_i32, %c0_i32_0 : i32, i32, i32
  }
}

</mosaic_0001>

<bundles_post_ra>
// kernel: transformer_forward.2
= control target key start
LH: loop header
LB: loop body
LE: loop exit
PB: predicated region body
PF: predicated region fallthrough
CT: control target
= control target key end

     0   :  { %s2631_s21 = smov 0   ;;  %s3168_s0 = inlined_call_operand.vmem [shape: f32[8,8,128], index: 0, kind: input, shape index: {}]   ;;  %s3169_s1 = inlined_call_operand.vmem [shape: f32[1,128], index: 1, kind: input, shape index: {}]   ;;  %s3170_s2 = inlined_call_operand.vmem [shape: f32[1,128], index: 2, kind: input, shape index: {}]   ;;  %s3171_s3 = inlined_call_operand.vmem [shape: f32[128,96], index: 3, kind: input, shape index: {}]   ;;  %s3172_s4 = inlined_call_operand.vmem [shape: f32[32,128], index: 4, kind: input, shape index: {}]   ;;  %s3173_s5 = inlined_call_operand.vmem [shape: f32[1,128], index: 5, kind: input, shape index: {}]   ;;  %s3174_s6 = inlined_call_operand.vmem [shape: f32[1,128], index: 6, kind: input, shape index: {}]   ;;  %s3175_s7 = inlined_call_operand.vmem [shape: f32[1,128], index: 7, kind: input, shape index: {}]   ;;  %s3176_s8 = inlined_call_operand.vmem [shape: f32[128,64], index: 8, kind: input, shape index: {}]   ;;  %s3177_s9 = inlined_call_operand.vmem [shape: f32[1,64], index: 9, kind: input, shape index: {}]   ;;  %s3178_s10 = inlined_call_operand.vmem [shape: f32[64,128], index: 10, kind: input, shape index: {}]   ;;  %s3179_s11 = inlined_call_operand.vmem [shape: f32[1,128], index: 11, kind: input, shape index: {}]   ;;  %s3180_s12 = inlined_call_operand.vmem [shape: f32[8,8,128], index: 12, kind: output, shape index: {}]  }
   0x1 LB: > { %s2293_s22 = sadd.s32 4294967295, %s2550_s21   ;;  %p2297_p0 = scmp.ge.s32.totalorder %s2550_s21, 1  ;;  %s2550_s21 = sphi %s2631_s21, %s22_s21  }
   0x2   : > { %p363_p1 = scmp.lt.s32.totalorder %s2550_s21, 3 }
   0x4   : > { %p364_p2 = pnand %p2297_p0, %p363_p1 }
   0x5   : > { %s2298_s23 = sshll.u32 (!%p364_p2), %s2293_s22, 2  ;;  %s2552_s18 = smov (!%p364_p2), 96  }
   0x6   : > { %367 = sbr.rel (%p364_p2) target bundleno = 3113 (0xc29), region = 68  ;;  %p406_p3 = scmp.lt.s32.totalorder (!%p364_p2), %s2298_s23, 7 }
   0x7   : > { %s2553_s19 = smov (!%p364_p2), 120   ;;  %s2554_s20 = smov (!%p364_p2), 64  }
   0x8   : > { %s2555_s22 = smov (!%p364_p2), 88   ;;  %s2556_s25 = smov (!%p364_p2), 56  }
   0x9   : > { %s2557_s26 = smov (!%p364_p2), 112   ;;  %s2558_s28 = smov (!%p364_p2), 80  }
   0xa   : > { %s2559_s29 = smov (!%p364_p2), 48   ;;  %s2560_s30 = smov (!%p364_p2), 104  }
   0xb   : > { %s3182_s23 = smov (!%p406_p3, %s2298_s23), 7  ;;  %v539_v4 = vld [vmem:[%s3171_s3 + $0x78] sm:$0xff]  ;;  %v538_v5 = vld [vmem:[%s3171_s3 + $0x70] sm:$0xff]  ;;  %v435_v6 = vlaneseq  ;;  %v537_v28 = vld [vmem:[%s3171_s3 + $0x68] sm:$0xff]  ;;  %vm572_vm13 = vcmask 64512   ;;  %s2561_s13 = smov 72  }
   0xc   : > { %s2299_s24 = sshll.u32 %s3182_s23, 3  ;;  %540 = vmatpush.msra.mxu0 %v539_v4  ;;  %v536_v29 = vld [vmem:[%s3171_s3 + $0x60] sm:$0xff]  ;;  %v535_v30 = vld [vmem:[%s3171_s3 + $0x58] sm:$0xff]  ;;  %v534_v31 = vld [vmem:[%s3171_s3 + $0x50] sm:$0xff]  ;;  %s2562_s14 = smov 40  }
   0xd   : > { %s2647_s27 = scalar_lea.vmem %s3168_s0, %s2299_s24  ;;  %v2659_v7 = vand.u32 127, %v435_v6  ;;  %v533_v32 = vld [vmem:[%s3171_s3 + $0x48] sm:$0xff]  ;;  %v532_v33 = vld [vmem:[%s3171_s3 + $0x40] sm:$0xff]  ;;  %v531_v34 = vld [vmem:[%s3171_s3 + $0x38] sm:$0xff]  ;;  %s2563_s15 = smov 8  }
   0xe   : > { %v419_v0 = vld [vmem:[%s2647_s27 + $0x10] sm:$0xff]  ;;  %v417_v1 = vld [vmem:[%s2647_s27] sm:$0xff]  ;;  %v420_v2 = vld [vmem:[%s2647_s27 + $0x18] sm:$0xff]  ;;  %541 = vmatpush.msra.mxu0 %v538_v5  ;;  %s2564_s16 = smov 16   ;;  %s2565_s17 = smov 24  }
   0xf   : > { %427 = vadd.xlane.f32.xlu1 %v419_v0  ;;  %423 = vadd.xlane.f32.xlu0 %v417_v1  ;;  %v418_v3 = vld [vmem:[%s2647_s27 + $0x8] sm:$0xff]  ;;  %vm437_vm0 = vcmp.lt.s32.totalorder %v2659_v7, 32  ;;  %v530_v35 = vld [vmem:[%s3171_s3 + $0x30] sm:$0xff]  ;;  %v528_v37 = vld [vmem:[%s3171_s3 + $0x20] sm:$0xff] }
  0x10   : > { %542 = vmatpush.msra.mxu0 %v537_v28  ;;  %v529_v36 = vld [vmem:[%s3171_s3 + $0x28] sm:$0xff]  ;;  %v527_v38 = vld [vmem:[%s3171_s3 + $0x18] sm:$0xff]  ;;  %v526_v39 = vld [vmem:[%s3171_s3 + $0x10] sm:$0xff] }
  0x11   : > { %v525_v40 = vld [vmem:[%s3171_s3 + $0x8] sm:$0xff]  ;;  %v524_v41 = vld [vmem:[%s3171_s3] sm:$0xff]  ;;  %v2057_v7 = vld [vmem:[%s3176_s8 + $0x58] sm:$0xff] }
  0x12   : > { %543 = vmatpush.msra.mxu0 %v536_v29  ;;  %v2437_v4 = vld [vmem:[%s3169_s1] ss:$0 sm:$0xff] }
  0x14   : > { %544 = vmatpush.msra.mxu0 %v535_v30 }
  0x16   : > { %545 = vmatpush.msra.mxu0 %v534_v31 }
  0x17   : > { %429 = vadd.xlane.f32.xlu1 %v420_v2  ;;  %425 = vadd.xlane.f32.xlu0 %v418_v3 }
  0x18   : > { %546 = vmatpush.msra.mxu0 %v533_v32 }
  0x1a   : > { %547 = vmatpush.msra.mxu0 %v532_v33 }
  0x1c   : > { %548 = vmatpush.msra.mxu0 %v531_v34 }
  0x1e   : > { %549 = vmatpush.msra.mxu0 %v530_v35 }
  0x20   : > { %550 = vmatpush.msra.mxu0 %v529_v36 }
  0x22   : > { %551 = vmatpush.msra.mxu0 %v528_v37 }
  0x24   : > { %552 = vmatpush.msra.mxu0 %v527_v38 }
  0x26   : > { %553 = vmatpush.msra.mxu0 %v526_v39 }
  0x28   : > { %554 = vmatpush.msra.mxu0 %v525_v40 }
  0x2a   : > { %555 = vmatpush.msra.mxu0 %v524_v41 }
  0x82   : > { %v428_v8 = vpop.xlane.xlu1 %427  ;;  %v424_v9 = vpop.xlane.xlu0 %423 }
  0x83   : > { %v433_v10 = vmul.f32 0.03125, %v428_v8  ;;  %v431_v11 = vmul.f32 0.03125, %v424_v9  ;;  %v2438_v9 = vld [vmem:[%s3170_s2] ss:$0 sm:$0xff] }
  0x85   : > { %v440_v12 = vsub.f32 %v419_v0, %v433_v10  ;;  %v438_v13 = vsub.f32 %v417_v1, %v431_v11 }
  0x87   : > { %v2664_v14 = vsel %vm437_vm0, %v440_v12, 0.0  ;;  %v2668_v15 = vsel %vm437_vm0, %v438_v13, 0.0 }
  0x88   : > { %v448_v16 = vmul.f32 %v2664_v14, %v2664_v14  ;;  %v446_v17 = vmul.f32 %v2668_v15, %v2668_v15 }
  0x8a   : > { %v430_v18 = vpop.xlane.xlu1 %429  ;;  %454 = vadd.xlane.f32.xlu0 %v448_v16  ;;  %450 = vadd.xlane.f32.xlu2 %v446_v17  ;;  %v426_v19 = vpop.xlane.xlu0 %425 }
  0x8b   : > { %v434_v20 = vmul.f32 0.03125, %v430_v18  ;;  %v432_v21 = vmul.f32 0.03125, %v426_v19 }
  0x8d   : > { %v441_v22 = vsub.f32 %v420_v2, %v434_v20  ;;  %v439_v23 = vsub.f32 %v418_v3, %v432_v21 }
  0x8f   : > { %v2676_v24 = vsel %vm437_vm0, %v441_v22, 0.0  ;;  %v2680_v25 = vsel %vm437_vm0, %v439_v23, 0.0 }
  0x90   : > { %v449_v26 = vmul.f32 %v2676_v24, %v2676_v24  ;;  %v447_v27 = vmul.f32 %v2680_v25, %v2680_v25 }
  0x92   : > { %456 = vadd.xlane.f32.xlu1 %v449_v26  ;;  %452 = vadd.xlane.f32.xlu2 %v447_v27 }
  0xfd   : > { %v451_v42 = vpop.xlane.xlu2 %450  ;;  %v455_v43 = vpop.xlane.xlu0 %454 }
  0xfe   : > { %v458_v44 = vmul.f32 0.03125, %v451_v42  ;;  %v460_v45 = vmul.f32 0.03125, %v455_v43 }
 0x100   : > { %v462_v46 = vadd.f32 1e-05, %v458_v44  ;;  %v464_v47 = vadd.f32 1e-05, %v460_v45 }
 0x102   : > { %2444 = vrsqrt.f32 %v462_v46  ;;  %vm472_vm2 = vweird.f32 %v462_v46  ;;  %vm492_vm4 = vweird.f32 %v464_v47 }
 0x103   : > { %2446 = vrsqrt.f32 %v464_v47 }
 0x105   : > { %v457_v48 = vpop.xlane.xlu1 %456  ;;  %v453_v49 = vpop.xlane.xlu2 %452 }
 0x106   : > { %v461_v50 = vmul.f32 0.03125, %v457_v48  ;;  %v459_v51 = vmul.f32 0.03125, %v453_v49 }
 0x108   : > { %v2445_v52 = vpop.eup %2444  ;;  %v465_v53 = vadd.f32 1e-05, %v461_v50  ;;  %v463_v54 = vadd.f32 1e-05, %v459_v51 }
 0x109   : > { %v2447_v55 = vpop.eup %2446  ;;  %v467_v56 = vmul.f32 %v2445_v52, %v462_v46  ;;  %vm473_vm1 = vweird.f32 %v2445_v52 }
 0x10a   : > { %v487_v57 = vmul.f32 %v2447_v55, %v464_v47  ;;  %2448 = vrsqrt.f32 %v465_v53  ;;  %vm474_vm3 = vmor %vm472_vm2, %vm473_vm1  ;;  %vm493_vm5 = vweird.f32 %v2447_v55  ;;  %vm482_vm8 = vweird.f32 %v463_v54 }
 0x10b   : > { %v468_v58 = vmul.f32 %v2445_v52, %v467_v56  ;;  %2450 = vrsqrt.f32 %v463_v54  ;;  %vm494_vm7 = vmor %vm492_vm4, %vm493_vm5  ;;  %vm502_vm10 = vweird.f32 %v465_v53 }
 0x10c   : > { %v488_v60 = vmul.f32 %v2447_v55, %v487_v57 }
 0x10d   : > { %v469_v59 = vmul.f32 0.5, %v468_v58 }
 0x10e   : > { %v489_v1 = vmul.f32 0.5, %v488_v60 }
 0x10f   : > { %v470_v61 = vsub.f32 1.5, %v469_v59 }
 0x110   : > { %v2449_v62 = vpop.eup %2448  ;;  %v490_v10 = vsub.f32 1.5, %v489_v1 }
 0x111   : > { %v2451_v63 = vpop.eup %2450  ;;  %v471_v0 = vmul.f32 %v2445_v52, %v470_v61  ;;  %v497_v2 = vmul.f32 %v2449_v62, %v465_v53  ;;  %vm503_vm11 = vweird.f32 %v2449_v62 }
 0x112   : > { %v477_v3 = vmul.f32 %v2451_v63, %v463_v54  ;;  %vm483_vm6 = vweird.f32 %v2451_v63  ;;  %v491_v18 = vmul.f32 %v2447_v55, %v490_v10  ;;  %vm504_vm12 = vmor %vm502_vm10, %vm503_vm11 }
 0x113   : > { %v475_v5 = vsel %vm474_vm3, %v2445_v52, %v471_v0  ;;  %v498_v11 = vmul.f32 %v2449_v62, %v497_v2  ;;  %vm484_vm9 = vmor %vm482_vm8, %vm483_vm6 }
 0x114   : > { %v478_v6 = vmul.f32 %v2451_v63, %v477_v3  ;;  %v506_v8 = vmul.f32 %v475_v5, %v2668_v15  ;;  %v495_v23 = vsel %vm494_vm7, %v2447_v55, %v491_v18 }
 0x115   : > { %v499_v19 = vmul.f32 0.5, %v498_v11  ;;  %v508_v28 = vmul.f32 %v495_v23, %v2664_v14 }
 0x116   : > { %v479_v12 = vmul.f32 0.5, %v478_v6  ;;  %v513_v13 = vmul.f32 %v2437_v4, %v506_v8 }
 0x117   : > { %v500_v22 = vsub.f32 1.5, %v499_v19  ;;  %v515_v30 = vmul.f32 %v2437_v4, %v508_v28 }
 0x118   : > { %v480_v16 = vsub.f32 1.5, %v479_v12  ;;  %v520_v17 = vadd.f32 %v2438_v9, %v513_v13 }
 0x119   : > { %v501_v29 = vmul.f32 %v2449_v62, %v500_v22  ;;  %v522_v32 = vadd.f32 %v2438_v9, %v515_v30 }
 0x11a   : > { %v481_v20 = vmul.f32 %v2451_v63, %v480_v16  ;;  %556 = vmatmul.f32.vlgmr.msra.gmra.mxu0 %v520_v17 }
 0x11b   : > { %v505_v31 = vsel %vm504_vm12, %v2449_v62, %v501_v29 }
 0x11c   : > { %v485_v15 = vsel %vm484_vm9, %v2451_v63, %v481_v20  ;;  %v509_v33 = vmul.f32 %v505_v31, %v2676_v24 }
 0x11d   : > { %v507_v21 = vmul.f32 %v485_v15, %v2680_v25 }
 0x11e   : > { %v516_v34 = vmul.f32 %v2437_v4, %v509_v33 }
 0x11f   : > { %v514_v26 = vmul.f32 %v2437_v4, %v507_v21 }
 0x120   : > { %v523_v35 = vadd.f32 %v2438_v9, %v516_v34 }
 0x121   : > { %v521_v27 = vadd.f32 %v2438_v9, %v514_v26 }
 0x123   : > { %559 = vmatmul.f32.gmra.mxu0 %v521_v27 }
 0x12b   : > { %562 = vmatmul.f32.gmra.mxu0 %v522_v32 }
 0x133   : > { %565 = vmatmul.f32.gmra.mxu0 %v523_v35 }
 0x197   : > { %v2738_v25 = vpop.f32.mrf.mxu0 }
 0x198   : > { %570 = vrot.lane.b32.xlu0 %v2738_v25, %s2552_s18 }
 0x1a0   : > { %v2741_v36 = vpop.f32.mrf.mxu0  ;;  %882 = vrot.lane.b32.xlu0 %v2738_v25, %s2553_s19 }
 0x1a1   : > { %598 = vrot.lane.b32.xlu2 %v2741_v36, %s2552_s18  ;;  %v2751_v24 = vpack.i.bf16 %v2741_v36, %v2738_v25 }
 0x1a8   : > { %v2746_v14 = vpop.f32.mrf.mxu0 }
 0x1a9   : > { %625 = vrot.lane.b32.xlu1 %v2746_v14, %s2552_s18 }
 0x1b0   : > { %v2753_v37 = vpop.f32.mrf.mxu0 }
 0x1b1   : > { %2403 = vrot.lane.b32.xlu1 %v2751_v24, %s2554_s20  ;;  %652 = vrot.lane.b32.xlu2 %v2753_v37, %s2552_s18  ;;  %v2407_v38 = vpack.i.bf16 %v2746_v14, %v2753_v37  ;;  %v2417_v22 = vpack.i.bf16 %v2753_v37, %v2746_v14 }
 0x1b3   : > { %2408 = vrot.lane.b32.xlu0 %v2407_v38, %s2554_s20 }
 0x1b9   : > { %884 = vrot.lane.b32.xlu2 %v2738_v25, %s2555_s22 }
 0x1fb   : > { %v599_v39 = vpop.permute.xlu2 %598 }
 0x1fc   : > { %2304 = vmatpush.xpose.msk.msra.mxu2 %vm572_vm13, %v599_v39 }
 0x1ff   : > { %2305 = vmatmul.msk.f32.vlgmr.msra.gmra.mxu2 %vm572_vm13, %v2741_v36 }
 0x20a   : > { %v571_v40 = vpop.permute.xlu0 %570 }
 0x20b   : > { %v653_v41 = vpop.permute.xlu2 %652  ;;  %2302 = vmatpush.xpose.msk.msrb.mxu0 %vm572_vm13, %v571_v40 }
 0x20c   : > { %2308 = vmatpush.xpose.msk.msra.mxu1 %vm572_vm13, %v653_v41 }
 0x20e   : > { %2303 = vmatmul.msk.f32.vlgmr.msrb.gmra.mxu0 %vm572_vm13, %v2738_v25 }
 0x20f   : > { %2309 = vmatmul.msk.f32.vlgmr.msra.gmra.mxu1 %vm572_vm13, %v2753_v37 }
 0x212   : > { %v2771_v43 = vpop.permute.xlu0 %882 }
 0x213   : > { %v885_v48 = vpop.permute.xlu2 %884 }
 0x21b   : > { %v626_v42 = vpop.permute.xlu1 %625 }
 0x21c   : > { %2306 = vmatpush.xpose.msk.msra.mxu3 %vm572_vm13, %v626_v42 }
 0x21f   : > { %2307 = vmatmul.msk.f32.vlgmr.msra.gmra.mxu3 %vm572_vm13, %v2746_v14 }
 0x223   : > { %v2404_v44 = vpop.permute.xlu1 %2403 }
 0x224   : > { %v2405_v45 = vunpack.i.l.bf16 %v2404_v44  ;;  %v2406_v46 = vunpack.i.h.bf16 %v2404_v44 }
 0x225   : > { %v2409_v47 = vpop.permute.xlu0 %2408 }
 0x226   : > { %v2410_v49 = vunpack.i.l.bf16 %v2409_v47  ;;  %799 = vmatpush.msrb.mxu2 %v2405_v45  ;;  %825 = vmatpush.msrb.mxu3 %v2406_v46  ;;  %v2411_v50 = vunpack.i.h.bf16 %v2409_v47 }
 0x228   : > { %2314 = vmatpush.xpose.msk.msra.mxu3 %vm572_vm13, %v885_v48  ;;  %851 = vmatpush.msrb.mxu1 %v2411_v50 }
 0x229   : > { %877 = vmatpush.msra.mxu2 %v2410_v49 }
 0x282   : > { %v621_v51 = vpop.f32.mrf.mxu2 }
 0x283   : > { %v679_v52 = vmul.f32 0.35355338, %v621_v51 }
 0x285   : > { %v685_v53 = vsel %vm572_vm13, %v679_v52, -inf }
 0x286   : > { %686 = vmax.xlane.f32.xlu2 %v685_v53 }
 0x28b   : > { %v594_v54 = vpop.f32.mrf.mxu0 }
 0x28c   : > { %v678_v55 = vmul.f32 0.35355338, %v594_v54  ;;  %v675_v56 = vpop.f32.mrf.mxu1 }
 0x28d   : > { %v681_v57 = vmul.f32 0.35355338, %v675_v56 }
 0x28e   : > { %v682_v58 = vsel %vm572_vm13, %v678_v55, -inf }
 0x28f   : > { %v691_v59 = vsel %vm572_vm13, %v681_v57, -inf  ;;  %683 = vmax.xlane.f32.xlu0 %v682_v58 }
 0x290   : > { %692 = vmax.xlane.f32.xlu1 %v691_v59 }
 0x29e   : > { %912 = vrot.lane.b32.xlu2 %v2741_v36, %s2555_s22 }
 0x2a2   : > { %v648_v60 = vpop.f32.mrf.mxu3 }
 0x2a3   : > { %v680_v61 = vmul.f32 0.35355338, %v648_v60 }
 0x2a5   : > { %v688_v62 = vsel %vm572_vm13, %v680_v61, -inf }
 0x2a6   : > { %689 = vmax.xlane.f32.xlu0 %v688_v62 }
 0x2a9   : > { %940 = vrot.lane.b32.xlu1 %v2746_v14, %s2555_s22 }
 0x2ba   : > { %968 = vrot.lane.b32.xlu0 %v2753_v37, %s2555_s22 }
 0x2f9   : > { %v687_v63 = vpop.xlane.xlu2 %686 }
 0x2fa   : > { %v695_v0 = vsub.f32 %v679_v52, %v687_v63 }
 0x2fc   : > { %v700_v1 = vmul.f32 1.442695, %v695_v0 }
 0x2fe   : > { %2452 = vpow2.f32 %v700_v1 }
 0x301   : > { %v913_v2 = vpop.permute.xlu2 %912 }
 0x302   : > { %2316 = vmatpush.xpose.msk.msra.mxu1 %vm572_vm13, %v913_v2  ;;  %v684_v3 = vpop.xlane.xlu0 %683 }
 0x303   : > { %v693_v4 = vpop.xlane.xlu1 %692  ;;  %v694_v5 = vsub.f32 %v678_v55, %v684_v3 }
 0x304   : > { %v2453_v6 = vpop.eup %2452  ;;  %v697_v8 = vsub.f32 %v681_v57, %v693_v4 }
 0x305   : > { %v698_v9 = vmul.f32 1.442695, %v694_v5  ;;  %v709_v10 = vsel %vm572_vm13, %v2453_v6, 0.0 }
 0x306   : > { %v704_v11 = vmul.f32 1.442695, %v697_v8  ;;  %710 = vadd.xlane.f32.xlu1 %v709_v10 }
 0x307   : > { %2454 = vpow2.f32 %v698_v9 }
 0x308   : > { %2456 = vpow2.f32 %v704_v11 }
 0x30d   : > { %v2788_v12 = vpop.eup %2454 }
 0x30e   : > { %v2790_v13 = vpop.eup %2456  ;;  %v706_v16 = vsel %vm572_vm13, %v2788_v12, 0.0 }
 0x30f   : > { %v715_v17 = vsel %vm572_vm13, %v2790_v13, 0.0  ;;  %707 = vadd.xlane.f32.xlu2 %v706_v16 }
 0x310   : > { %716 = vadd.xlane.f32.xlu0 %v715_v17 }
 0x319   : > { %v690_v18 = vpop.xlane.xlu0 %689 }
 0x31a   : > { %v696_v19 = vsub.f32 %v680_v61, %v690_v18 }
 0x31b   : > { %v941_v23 = vpop.permute.xlu1 %940 }
 0x31c   : > { %v702_v20 = vmul.f32 1.442695, %v696_v19 }
 0x31e   : > { %2458 = vpow2.f32 %v702_v20 }
 0x31f   : > { %938 = vrot.lane.b32.xlu1 %v2746_v14, %s2553_s19 }
 0x324   : > { %v2798_v15 = vpop.eup %2458  ;;  %966 = vrot.lane.b32.xlu0 %v2753_v37, %s2553_s19 }
 0x325   : > { %v712_v21 = vsel %vm572_vm13, %v2798_v15, 0.0 }
 0x326   : > { %713 = vadd.xlane.f32.xlu2 %v712_v21 }
 0x327   : > { %2418 = vrot.lane.b32.xlu1 %v2417_v22, %s2556_s25 }
 0x32c   : > { %2413 = vrot.lane.b32.xlu0 %v2751_v24, %s2556_s25  ;;  %v969_v27 = vpop.permute.xlu0 %968 }
 0x334   : > { %1198 = vrot.lane.b32.xlu0 %v2738_v25, %s2557_s26 }
 0x33e   : > { %910 = vrot.lane.b32.xlu2 %v2741_v36, %s2553_s19 }
 0x346   : > { %1200 = vrot.lane.b32.xlu2 %v2738_v25, %s2558_s28 }
 0x379   : > { %v711_v26 = vpop.xlane.xlu1 %710 }
 0x37a   : > { %2460 = vrcp.f32 %v711_v26  ;;  %v744_v33 = vand.u32 2147483648, %v711_v26  ;;  %v742_v35 = vand.u32 2147483647, %v711_v26  ;;  %vm738_vm15 = vweird.f32 %v711_v26 }
 0x37c   : > { %v745_v38 = vor.u32 1.1754944e-38, %v744_v33  ;;  %vm743_vm2 = vcmp.eq.f32.partialorder %v742_v35, 8.507059e+37 }
 0x380   : > { %v2461_v28 = vpop.eup %2460 }
 0x381   : > { %v734_v29 = vmul.f32 %v2461_v28, %v711_v26  ;;  %vm739_vm14 = vweird.f32 %v2461_v28 }
 0x382   : > { %v708_v30 = vpop.xlane.xlu2 %707  ;;  %vm740_vm1 = vmor %vm738_vm15, %vm739_vm14 }
 0x383   : > { %v735_v31 = vsub.f32 1.0, %v734_v29  ;;  %2462 = vrcp.f32 %v708_v30  ;;  %v717_v32 = vpop.xlane.xlu0 %716  ;;  %v729_v48 = vand.u32 2147483648, %v708_v30  ;;  %v727_v51 = vand.u32 2147483647, %v708_v30 }
 0x384   : > { %2464 = vrcp.f32 %v717_v32  ;;  %vm723_vm4 = vweird.f32 %v708_v30  ;;  %v774_v58 = vand.u32 2147483648, %v717_v32  ;;  %vm768_vm8 = vweird.f32 %v717_v32 }
 0x385   : > { %v736_v34 = vmul.f32 %v2461_v28, %v735_v31  ;;  %v730_v54 = vor.u32 1.1754944e-38, %v729_v48  ;;  %vm728_vm6 = vcmp.eq.f32.partialorder %v727_v51, 8.507059e+37  ;;  %v772_v60 = vand.u32 2147483647, %v717_v32 }
 0x386   : > { %v775_v0 = vor.u32 1.1754944e-38, %v774_v58 }
 0x387   : > { %v737_v24 = vadd.f32 %v2461_v28, %v736_v34  ;;  %vm773_vm10 = vcmp.eq.f32.partialorder %v772_v60, 8.507059e+37 }
 0x389   : > { %v2463_v39 = vpop.eup %2462  ;;  %v741_v40 = vsel %vm740_vm1, %v2461_v28, %v737_v24 }
 0x38a   : > { %v2465_v41 = vpop.eup %2464  ;;  %v719_v42 = vmul.f32 %v2463_v39, %v708_v30  ;;  %v746_v44 = vsel %vm743_vm2, %v745_v38, %v741_v40  ;;  %vm724_vm3 = vweird.f32 %v2463_v39 }
 0x38b   : > { %v764_v45 = vmul.f32 %v2465_v41, %v717_v32  ;;  %v747_v46 = vmul.f32 %v2453_v6, %v746_v44  ;;  %vm725_vm5 = vmor %vm723_vm4, %vm724_vm3  ;;  %vm769_vm7 = vweird.f32 %v2465_v41 }
 0x38c   : > { %v720_v47 = vsub.f32 1.0, %v719_v42  ;;  %vm770_vm9 = vmor %vm768_vm8, %vm769_vm7 }
 0x38d   : > { %v765_v49 = vsub.f32 1.0, %v764_v45  ;;  %2311 = vmatmul.msk.f32.vlgmr.msrb.gmra.mxu3 %vm572_vm13, %v747_v46 }
 0x38e   : > { %v721_v50 = vmul.f32 %v2463_v39, %v720_v47  ;;  %2320 = vmatpush.xpose.msk.msrb.mxu3 %vm572_vm13, %v969_v27 }
 0x38f   : > { %v766_v52 = vmul.f32 %v2465_v41, %v765_v49 }
 0x390   : > { %v722_v53 = vadd.f32 %v2463_v39, %v721_v50 }
 0x391   : > { %v939_v55 = vpop.permute.xlu1 %938  ;;  %v767_v56 = vadd.f32 %v2465_v41, %v766_v52 }
 0x392   : > { %v726_v57 = vsel %vm725_vm5, %v2463_v39, %v722_v53 }
 0x393   : > { %v731_v59 = vsel %vm728_vm6, %v730_v54, %v726_v57  ;;  %v771_v62 = vsel %vm770_vm9, %v2465_v41, %v767_v56 }
 0x394   : > { %v732_v61 = vmul.f32 %v2788_v12, %v731_v59  ;;  %v776_v1 = vsel %vm773_vm10, %v775_v0, %v771_v62 }
 0x395   : > { %2315 = vmatmul.msk.f32.vlgmr.msra.gmra.mxu3 %vm572_vm13, %v2771_v43  ;;  %v777_v5 = vmul.f32 %v2790_v13, %v776_v1 }
 0x396   : > { %v967_v63 = vpop.permute.xlu0 %966  ;;  %2310 = vmatmul.msk.f32.vlgmr.msrb.gmra.mxu2 %vm572_vm13, %v732_v61 }
 0x397   : > { %2318 = vmatpush.xpose.msk.msrb.mxu2 %vm572_vm13, %v941_v23 }
 0x399   : > { %v2419_v2 = vpop.permute.xlu1 %2418  ;;  %v714_v3 = vpop.xlane.xlu2 %713 }
 0x39a   : > { %v2420_v4 = vunpack.i.l.bf16 %v2419_v2  ;;  %2466 = vrcp.f32 %v714_v3  ;;  %v759_v12 = vand.u32 2147483648, %v714_v3  ;;  %v757_v17 = vand.u32 2147483647, %v714_v3 }
 0x39b   : > { %vm753_vm12 = vweird.f32 %v714_v3  ;;  %v2421_v26 = vunpack.i.h.bf16 %v2419_v2  ;;  %v2422_v2 = vpack.i.bf16 %v2746_v14, %v2738_v25 }
 0x39c   : > { %1167 = vmatpush.msra.mxu3 %v2420_v4  ;;  %v760_v13 = vor.u32 1.1754944e-38, %v759_v12  ;;  %vm758_vm15 = vcmp.eq.f32.partialorder %v757_v17, 8.507059e+37 }
 0x39d   : > { %2321 = vmatmul.msk.f32.vlgmr.msrb.gmra.mxu3 %vm572_vm13, %v967_v63 }
 0x39e   : > { %v2414_v6 = vpop.permute.xlu0 %2413  ;;  %2313 = vmatmul.msk.f32.vlgmr.msra.gmra.mxu2 %vm572_vm13, %v777_v5 }
 0x39f   : > { %v2416_v43 = vunpack.i.h.bf16 %v2414_v6  ;;  %v2415_v23 = vunpack.i.l.bf16 %v2414_v6 }
 0x3a0   : > { %v2467_v8 = vpop.eup %2466 }
 0x3a1   : > { %v749_v9 = vmul.f32 %v2467_v8, %v714_v3  ;;  %v911_v10 = vpop.permute.xlu2 %910  ;;  %1141 = vmatpush.msra.mxu2 %v2416_v43  ;;  %vm754_vm11 = vweird.f32 %v2467_v8  ;;  %v2427_v3 = vpack.i.bf16 %v2753_v37, %v2741_v36 }
 0x3a2   : > { %vm755_vm14 = vmor %vm753_vm12, %vm754_vm11 }
 0x3a3   : > { %v750_v11 = vsub.f32 1.0, %v749_v9 }
 0x3a5   : > { %v751_v16 = vmul.f32 %v2467_v8, %v750_v11 }
 0x3a6   : > { %2319 = vmatmul.msk.f32.vlgmr.msrb.gmra.mxu2 %vm572_vm13, %v939_v55  ;;  %v2846_v48 = vpop.permute.xlu0 %1198 }
 0x3a7   : > { %v752_v18 = vadd.f32 %v2467_v8, %v751_v16 }
 0x3a9   : > { %v1201_v19 = vpop.permute.xlu2 %1200  ;;  %v756_v20 = vsel %vm755_vm14, %v2467_v8, %v752_v18 }
 0x3aa   : > { %2326 = vmatpush.xpose.msk.msrb.mxu2 %vm572_vm13, %v1201_v19  ;;  %v761_v21 = vsel %vm758_vm15, %v760_v13, %v756_v20 }
 0x3ab   : > { %v762_v22 = vmul.f32 %v2798_v15, %v761_v21 }
 0x3ad   : > { %2312 = vmatmul.msk.f32.vlgmr.msrb.gmra.mxu1 %vm572_vm13, %v762_v22 }
 0x3ae   : > { %1115 = vmatpush.msrb.mxu1 %v2415_v23 }
 0x3b5   : > { %2317 = vmatmul.msk.f32.vlgmr.msra.gmra.mxu1 %vm572_vm13, %v911_v10 }
 0x3b6   : > { %1193 = vmatpush.msra.mxu1 %v2421_v26 }
 0x410   : > { %v2828_v27 = vpop.f32.mrf.mxu3 }
 0x418   : > { %v907_v28 = vpop.f32.mrf.mxu3 }
 0x419   : > { %v994_v29 = vmul.f32 0.35355338, %v907_v28  ;;  %v2830_v30 = vpop.f32.mrf.mxu2 }
 0x41b   : > { %v998_v31 = vsel %vm572_vm13, %v994_v29, -inf }
 0x41c   : > { %999 = vmax.xlane.f32.xlu1 %v998_v31 }
 0x420   : > { %v991_v32 = vpop.f32.mrf.mxu3 }
 0x421   : > { %v997_v33 = vmul.f32 0.35355338, %v991_v32  ;;  %v2833_v15 = vpop.f32.mrf.mxu2 }
 0x423   : > { %v1007_v34 = vsel %vm572_vm13, %v997_v33, -inf }
 0x424   : > { %1008 = vmax.xlane.f32.xlu1 %v1007_v34 }
 0x429   : > { %v963_v35 = vpop.f32.mrf.mxu2 }
 0x42a   : > { %v2836_v24 = vpop.f32.mrf.mxu1  ;;  %v996_v38 = vmul.f32 0.35355338, %v963_v35 }
 0x42c   : > { %v1004_v39 = vsel %vm572_vm13, %v996_v38, -inf }
 0x42d   : > { %1005 = vmax.xlane.f32.xlu0 %v1004_v39 }
 0x432   : > { %v935_v40 = vpop.f32.mrf.mxu1 }
 0x433   : > { %v995_v41 = vmul.f32 0.35355338, %v935_v40 }
 0x435   : > { %v1001_v42 = vsel %vm572_vm13, %v995_v41, -inf }
 0x436   : > { %1002 = vmax.xlane.f32.xlu2 %v1001_v42 }
 0x43d   : > { %1228 = vrot.lane.b32.xlu1 %v2741_v36, %s2558_s28 }
 0x441   : > { %1256 = vrot.lane.b32.xlu0 %v2746_v14, %s2558_s28 }
 0x44e   : > { %1226 = vrot.lane.b32.xlu2 %v2741_v36, %s2557_s26 }
 0x48f   : > { %v1000_v44 = vpop.xlane.xlu1 %999 }
 0x490   : > { %v1010_v45 = vsub.f32 %v994_v29, %v1000_v44 }
 0x492   : > { %v1014_v46 = vmul.f32 1.442695, %v1010_v45 }
 0x494   : > { %2468 = vpow2.f32 %v1014_v46 }
 0x497   : > { %v1009_v47 = vpop.xlane.xlu1 %1008 }
 0x498   : > { %v1013_v49 = vsub.f32 %v997_v33, %v1009_v47 }
 0x49a   : > { %v2469_v50 = vpop.eup %2468  ;;  %v1020_v51 = vmul.f32 1.442695, %v1013_v49 }
 0x49b   : > { %v1022_v52 = vsel %vm572_vm13, %v2469_v50, 0.0 }
 0x49c   : > { %2470 = vpow2.f32 %v1020_v51  ;;  %1023 = vadd.xlane.f32.xlu2 %v1022_v52 }
 0x4a0   : > { %v1006_v53 = vpop.xlane.xlu0 %1005 }
 0x4a1   : > { %v1012_v54 = vsub.f32 %v996_v38, %v1006_v53 }
 0x4a2   : > { %v2849_v55 = vpop.eup %2470 }
 0x4a3   : > { %v1018_v56 = vmul.f32 1.442695, %v1012_v54  ;;  %v1031_v57 = vsel %vm572_vm13, %v2849_v55, 0.0 }
 0x4a4   : > { %1032 = vadd.xlane.f32.xlu2 %v1031_v57 }
 0x4a5   : > { %2472 = vpow2.f32 %v1018_v56 }
 0x4a9   : > { %v1003_v58 = vpop.xlane.xlu2 %1002 }
 0x4aa   : > { %v1011_v59 = vsub.f32 %v995_v41, %v1003_v58 }
 0x4ab   : > { %v2853_v60 = vpop.eup %2472 }
 0x4ac   : > { %v1016_v61 = vmul.f32 1.442695, %v1011_v59  ;;  %v1028_v62 = vsel %vm572_vm13, %v2853_v60, 0.0 }
 0x4ad   : > { %1029 = vadd.xlane.f32.xlu1 %v1028_v62 }
 0x4ae   : > { %2474 = vpow2.f32 %v1016_v61 }
 0x4af   : > { %v1229_v63 = vpop.permute.xlu1 %1228 }
 0x4b0   : > { %2328 = vmatpush.xpose.msk.msrb.mxu3 %vm572_vm13, %v1229_v63 }
 0x4b1   : > { %v2876_v4 = vpop.permute.xlu2 %1226 }
 0x4b3   : > { %v1257_v22 = vpop.permute.xlu0 %1256 }
 0x4b4   : > { %v2858_v0 = vpop.eup %2474 }
 0x4b5   : > { %v1025_v1 = vsel %vm572_vm13, %v2858_v0, 0.0 }
 0x4b6   : > { %1026 = vadd.xlane.f32.xlu0 %v1025_v1 }
 0x4bc   : > { %1282 = vrot.lane.b32.xlu2 %v2753_v37, %s2557_s26 }
 0x4c4   : > { %2423 = vrot.lane.b32.xlu2 %v2422_v2, %s2559_s29 }
 0x4c6   : > { %1284 = vrot.lane.b32.xlu1 %v2753_v37, %s2558_s28 }
 0x4ca   : > { %1254 = vrot.lane.b32.xlu0 %v2746_v14, %s2557_s26 }
 0x4cc   : > { %1514 = vrot.lane.b32.xlu2 %v2738_v25, %s2560_s30 }
 0x4ce   : > { %1516 = vrot.lane.b32.xlu1 %v2738_v25, %s2561_s13 }
 0x4d2   : > { %2428 = vrot.lane.b32.xlu0 %v2427_v3, %s2559_s29 }
 0x50f   : > { %v1024_v5 = vpop.xlane.xlu2 %1023 }
 0x510   : > { %2476 = vrcp.f32 %v1024_v5  ;;  %v1045_v10 = vand.u32 2147483648, %v1024_v5  ;;  %v1043_v12 = vand.u32 2147483647, %v1024_v5  ;;  %vm1039_vm2 = vweird.f32 %v1024_v5 }
 0x512   : > { %v1046_v18 = vor.u32 1.1754944e-38, %v1045_v10  ;;  %vm1044_vm4 = vcmp.eq.f32.partialorder %v1043_v12, 8.507059e+37 }
 0x516   : > { %v2477_v6 = vpop.eup %2476 }
 0x517   : > { %v1035_v43 = vmul.f32 %v2477_v6, %v1024_v5  ;;  %v1033_v8 = vpop.xlane.xlu2 %1032  ;;  %vm1040_vm1 = vweird.f32 %v2477_v6 }
 0x518   : > { %2478 = vrcp.f32 %v1033_v8  ;;  %vm1041_vm3 = vmor %vm1039_vm2, %vm1040_vm1  ;;  %v1090_v26 = vand.u32 2147483648, %v1033_v8  ;;  %v1088_v31 = vand.u32 2147483647, %v1033_v8  ;;  %vm1084_vm6 = vweird.f32 %v1033_v8 }
 0x519   : > { %v1036_v9 = vsub.f32 1.0, %v1035_v43 }
 0x51a   : > { %v1091_v33 = vor.u32 1.1754944e-38, %v1090_v26  ;;  %vm1089_vm8 = vcmp.eq.f32.partialorder %v1088_v31, 8.507059e+37 }
 0x51b   : > { %v1037_v11 = vmul.f32 %v2477_v6, %v1036_v9 }
 0x51d   : > { %v1038_v16 = vadd.f32 %v2477_v6, %v1037_v11 }
 0x51e   : > { %v2479_v17 = vpop.eup %2478 }
 0x51f   : > { %v1042_v13 = vsel %vm1041_vm3, %v2477_v6, %v1038_v16  ;;  %v1080_v19 = vmul.f32 %v2479_v17, %v1033_v8  ;;  %vm1085_vm5 = vweird.f32 %v2479_v17  ;;  %v1283_v34 = vpop.permute.xlu2 %1282 }
 0x520   : > { %v1047_v20 = vsel %vm1044_vm4, %v1046_v18, %v1042_v13  ;;  %v1030_v21 = vpop.xlane.xlu1 %1029  ;;  %vm1086_vm7 = vmor %vm1084_vm6, %vm1085_vm5 }
 0x521   : > { %v1081_v23 = vsub.f32 1.0, %v1080_v19  ;;  %2480 = vrcp.f32 %v1030_v21  ;;  %v1048_v28 = vmul.f32 %v2469_v50, %v1047_v20  ;;  %v1075_v45 = vand.u32 2147483648, %v1030_v21 }
 0x522   : > { %v1073_v47 = vand.u32 2147483647, %v1030_v21  ;;  %vm1069_vm10 = vweird.f32 %v1030_v21 }
 0x523   : > { %v1082_v29 = vmul.f32 %v2479_v17, %v1081_v23  ;;  %2322 = vmatmul.msk.f32.vlgmr.msrb.gmra.mxu1 %vm572_vm13, %v1048_v28  ;;  %v1076_v50 = vor.u32 1.1754944e-38, %v1075_v45 }
 0x524   : > { %2330 = vmatpush.xpose.msk.msrb.mxu1 %vm572_vm13, %v1257_v22  ;;  %vm1074_vm12 = vcmp.eq.f32.partialorder %v1073_v47, 8.507059e+37 }
 0x525   : > { %v1083_v32 = vadd.f32 %v2479_v17, %v1082_v29 }
 0x527   : > { %v2481_v35 = vpop.eup %2480  ;;  %v1087_v38 = vsel %vm1086_vm7, %v2479_v17, %v1083_v32  ;;  %v2424_v53 = vpop.permute.xlu2 %2423 }
 0x528   : > { %v1092_v39 = vsel %vm1089_vm8, %v1091_v33, %v1087_v38  ;;  %v1065_v40 = vmul.f32 %v2481_v35, %v1030_v21  ;;  %vm1070_vm9 = vweird.f32 %v2481_v35  ;;  %v2425_v57 = vunpack.i.l.bf16 %v2424_v53 }
 0x529   : > { %v1027_v41 = vpop.xlane.xlu0 %1026  ;;  %v1093_v42 = vmul.f32 %v2849_v55, %v1092_v39  ;;  %vm1071_vm11 = vmor %vm1069_vm10, %vm1070_vm9  ;;  %v2426_v9 = vunpack.i.h.bf16 %v2424_v53 }
 0x52a   : > { %v1066_v44 = vsub.f32 1.0, %v1065_v40  ;;  %2482 = vrcp.f32 %v1027_v41  ;;  %v1060_v59 = vand.u32 2147483648, %v1027_v41  ;;  %v1058_v62 = vand.u32 2147483647, %v1027_v41 }
 0x52b   : > { %2325 = vmatmul.msk.f32.vlgmr.msra.gmra.mxu1 %vm572_vm13, %v1093_v42  ;;  %vm1054_vm15 = vweird.f32 %v1027_v41 }
 0x52c   : > { %v1067_v46 = vmul.f32 %v2481_v35, %v1066_v44  ;;  %v1061_v1 = vor.u32 1.1754944e-38, %v1060_v59  ;;  %vm1059_vm2 = vcmp.eq.f32.partialorder %v1058_v62, 8.507059e+37 }
 0x52e   : > { %v1068_v49 = vadd.f32 %v2481_v35, %v1067_v46 }
 0x52f   : > { %v1515_v8 = vpop.permute.xlu2 %1514 }
 0x530   : > { %v2483_v51 = vpop.eup %2482  ;;  %v1072_v52 = vsel %vm1071_vm11, %v2481_v35, %v1068_v49 }
 0x531   : > { %v1077_v54 = vsel %vm1074_vm12, %v1076_v50, %v1072_v52  ;;  %v1050_v56 = vmul.f32 %v2483_v51, %v1027_v41  ;;  %vm1055_vm14 = vweird.f32 %v2483_v51 }
 0x532   : > { %v1078_v55 = vmul.f32 %v2853_v60, %v1077_v54  ;;  %vm1056_vm1 = vmor %vm1054_vm15, %vm1055_vm14 }
 0x533   : > { %v1051_v58 = vsub.f32 1.0, %v1050_v56 }
 0x534   : > { %2324 = vmatmul.msk.f32.vlgmr.msra.gmra.mxu3 %vm572_vm13, %v1078_v55 }
 0x535   : > { %v1052_v61 = vmul.f32 %v2483_v51, %v1051_v58  ;;  %1431 = vmatpush.msra.mxu3 %v2425_v57 }
 0x537   : > { %v1053_v63 = vadd.f32 %v2483_v51, %v1052_v61 }
 0x538   : > { %v1285_v2 = vpop.permute.xlu1 %1284 }
 0x539   : > { %v1057_v3 = vsel %vm1056_vm1, %v2483_v51, %v1053_v63 }
 0x53a   : > { %v1062_v5 = vsel %vm1059_vm2, %v1061_v1, %v1057_v3 }
 0x53b   : > { %v1063_v6 = vmul.f32 %v2858_v0, %v1062_v5 }
 0x53c   : > { %v1255_v60 = vpop.permute.xlu0 %1254  ;;  %2329 = vmatmul.msk.f32.vlgmr.msrb.gmra.mxu3 %vm572_vm13, %v2876_v4 }
 0x53d   : > { %2323 = vmatmul.msk.f32.vlgmr.msra.gmra.mxu2 %vm572_vm13, %v1063_v6  ;;  %2331 = vmatmul.msk.f32.vlgmr.msrb.gmra.mxu1 %vm572_vm13, %v1255_v60 }
 0x53e   : > { %2332 = vmatpush.xpose.msk.msra.mxu2 %vm572_vm13, %v1285_v2 }
 0x540   : > { %v1517_v43 = vpop.permute.xlu1 %1516 }
 0x541   : > { %2338 = vmatpush.xpose.msk.msra.mxu0 %vm572_vm13, %v1517_v43 }
 0x544   : > { %v2429_v10 = vpop.permute.xlu0 %2428  ;;  %2339 = vmatmul.msk.f32.vlgmr.msra.gmra.mxu0 %vm572_vm13, %v1515_v8 }
 0x545   : > { %v2431_v11 = vunpack.i.h.bf16 %v2429_v10  ;;  %v2430_v0 = vunpack.i.l.bf16 %v2429_v10  ;;  %2327 = vmatmul.msk.f32.vlgmr.msrb.gmra.mxu2 %vm572_vm13, %v2846_v48 }
 0x546   : > { %1483 = vmatpush.msrb.mxu2 %v2426_v9 }
 0x547   : > { %1457 = vmatpush.msra.mxu1 %v2430_v0  ;;  %1509 = vmatpush.msrb.mxu3 %v2431_v11 }
 0x54d   : > { %2333 = vmatmul.msk.f32.vlgmr.msra.gmra.mxu2 %vm572_vm13, %v1283_v34 }
 0x5a0   : > { %v2895_v4 = vpop.f32.mrf.mxu1 }
 0x5a8   : > { %v2897_v12 = vpop.f32.mrf.mxu1 }
 0x5b7   : > { %v2899_v16 = vpop.f32.mrf.mxu3 }
 0x5ba   : > { %v1279_v17 = vpop.f32.mrf.mxu1 }
 0x5bb   : > { %v1312_v18 = vmul.f32 0.35355338, %v1279_v17 }
 0x5bd   : > { %v1320_v13 = vsel %vm572_vm13, %v1312_v18, -inf }
 0x5be   : > { %1321 = vmax.xlane.f32.xlu0 %v1320_v13 }
 0x5bf   : > { %v1251_v19 = vpop.f32.mrf.mxu3 }
 0x5c0   : > { %v2902_v20 = vpop.f32.mrf.mxu2  ;;  %v1311_v48 = vmul.f32 0.35355338, %v1251_v19 }
 0x5c1   : > { %v1539_v58 = vpop.f32.mrf.mxu0 }
 0x5c2   : > { %v1317_v21 = vsel %vm572_vm13, %v1311_v48, -inf  ;;  %v2934_v59 = vmul.f32 0.35355338, %v1539_v58 }
 0x5c3   : > { %1318 = vmax.xlane.f32.xlu2 %v1317_v21 }
 0x5c4   : > { %v1630_v61 = vsel %vm572_vm13, %v2934_v59, -inf }
 0x5c8   : > { %v1223_v22 = vpop.f32.mrf.mxu2 }
 0x5c9   : > { %v1310_v23 = vmul.f32 0.35355338, %v1223_v22 }
 0x5cb   : > { %v1314_v26 = vsel %vm572_vm13, %v1310_v23, -inf }
 0x5cc   : > { %1315 = vmax.xlane.f32.xlu1 %v1314_v26 }
 0x5d0   : > { %v1307_v28 = vpop.f32.mrf.mxu2 }
 0x5d1   : > { %v1313_v29 = vmul.f32 0.35355338, %v1307_v28 }
 0x5d2   : > { %1572 = vrot.lane.b32.xlu0 %v2746_v14, %s2561_s13 }
 0x5d3   : > { %v1323_v31 = vsel %vm572_vm13, %v1313_v29, -inf }
 0x5d4   : > { %1324 = vmax.xlane.f32.xlu1 %v1323_v31 }
 0x5db   : > { %1544 = vrot.lane.b32.xlu2 %v2741_v36, %s2561_s13 }
 0x5ed   : > { %1570 = vrot.lane.b32.xlu1 %v2746_v14, %s2560_s30 }
 0x631   : > { %v1322_v32 = vpop.xlane.xlu0 %1321 }
 0x632   : > { %v1328_v33 = vsub.f32 %v1312_v18, %v1322_v32 }
 0x634   : > { %v1334_v34 = vmul.f32 1.442695, %v1328_v33 }
 0x636   : > { %2484 = vpow2.f32 %v1334_v34  ;;  %v1319_v35 = vpop.xlane.xlu2 %1318 }
 0x637   : > { %v1327_v38 = vsub.f32 %v1311_v48, %v1319_v35 }
 0x639   : > { %v1332_v39 = vmul.f32 1.442695, %v1327_v38 }
 0x63b   : > { %2486 = vpow2.f32 %v1332_v39 }
 0x63c   : > { %v2485_v40 = vpop.eup %2484 }
 0x63d   : > { %v1344_v41 = vsel %vm572_vm13, %v2485_v40, 0.0 }
 0x63e   : > { %1345 = vadd.xlane.f32.xlu2 %v1344_v41  ;;  %v1545_v42 = vpop.permute.xlu2 %1544 }
 0x63f   : > { %v1316_v44 = vpop.xlane.xlu1 %1315  ;;  %2340 = vmatpush.xpose.msk.msrb.mxu1 %vm572_vm13, %v1545_v42 }
 0x640   : > { %v1326_v45 = vsub.f32 %v1310_v23, %v1316_v44 }
 0x641   : > { %v2915_v46 = vpop.eup %2486 }
 0x642   : > { %v1330_v47 = vmul.f32 1.442695, %v1326_v45  ;;  %v1341_v49 = vsel %vm572_vm13, %v2915_v46, 0.0 }
 0x643   : > { %1342 = vadd.xlane.f32.xlu1 %v1341_v49 }
 0x644   : > { %2488 = vpow2.f32 %v1330_v47  ;;  %v1573_v50 = vpop.permute.xlu0 %1572 }
 0x645   : > { %2342 = vmatpush.xpose.msk.msra.mxu2 %vm572_vm13, %v1573_v50 }
 0x647   : > { %v1325_v51 = vpop.xlane.xlu1 %1324 }
 0x648   : > { %v1329_v52 = vsub.f32 %v1313_v29, %v1325_v51 }
 0x64a   : > { %v2920_v53 = vpop.eup %2488  ;;  %v1336_v54 = vmul.f32 1.442695, %v1329_v52 }
 0x64b   : > { %v1338_v56 = vsel %vm572_vm13, %v2920_v53, 0.0 }
 0x64c   : > { %2490 = vpow2.f32 %v1336_v54  ;;  %1339 = vadd.xlane.f32.xlu0 %v1338_v56 }
 0x652   : > { %v2924_v55 = vpop.eup %2490 }
 0x653   : > { %v1347_v57 = vsel %vm572_vm13, %v2924_v55, 0.0 }
 0x654   : > { %1348 = vadd.xlane.f32.xlu0 %v1347_v57 }
 0x656   : > { %1598 = vrot.lane.b32.xlu2 %v2753_v37, %s2560_s30 }
 0x65c   : > { %1600 = vrot.lane.b32.xlu1 %v2753_v37, %s2561_s13 }
 0x65f   : > { %v1571_v62 = vpop.permute.xlu1 %1570 }
 0x668   : > { %1542 = vrot.lane.b32.xlu0 %v2741_v36, %s2560_s30  ;;  %s415_s30 = scalar_lea.vmem %s3180_s12, %s2299_s24 }
 0x692   : > { %1631 = vmax.xlane.f32.xlu0 %v1630_v61 }
 0x6b1   : > { %v1346_v63 = vpop.xlane.xlu2 %1345 }
 0x6b2   : > { %2492 = vrcp.f32 %v1346_v63  ;;  %v1391_v6 = vand.u32 2147483648, %v1346_v63  ;;  %v1389_v8 = vand.u32 2147483647, %v1346_v63  ;;  %vm1385_vm4 = vweird.f32 %v1346_v63 }
 0x6b4   : > { %v1392_v0 = vor.u32 1.1754944e-38, %v1391_v6  ;;  %vm1390_vm6 = vcmp.eq.f32.partialorder %v1389_v8, 8.507059e+37 }
 0x6b6   : > { %v1343_v1 = vpop.xlane.xlu1 %1342 }
 0x6b7   : > { %2494 = vrcp.f32 %v1343_v1  ;;  %v1376_v13 = vand.u32 2147483648, %v1343_v1  ;;  %v1374_v21 = vand.u32 2147483647, %v1343_v1  ;;  %vm1370_vm8 = vweird.f32 %v1343_v1 }
 0x6b8   : > { %v2493_v2 = vpop.eup %2492 }
 0x6b9   : > { %v1381_v3 = vmul.f32 %v2493_v2, %v1346_v63  ;;  %vm1386_vm3 = vweird.f32 %v2493_v2  ;;  %v1377_v26 = vor.u32 1.1754944e-38, %v1376_v13  ;;  %vm1375_vm10 = vcmp.eq.f32.partialorder %v1374_v21, 8.507059e+37 }
 0x6ba   : > { %vm1387_vm5 = vmor %vm1385_vm4, %vm1386_vm3 }
 0x6bb   : > { %v1382_v5 = vsub.f32 1.0, %v1381_v3 }
 0x6bd   : > { %v2495_v60 = vpop.eup %2494  ;;  %v1383_v43 = vmul.f32 %v2493_v2, %v1382_v5 }
 0x6be   : > { %v1366_v9 = vmul.f32 %v2495_v60, %v1343_v1  ;;  %vm1371_vm7 = vweird.f32 %v2495_v60 }
 0x6bf   : > { %v1384_v10 = vadd.f32 %v2493_v2, %v1383_v43  ;;  %v1340_v11 = vpop.xlane.xlu0 %1339  ;;  %vm1372_vm9 = vmor %vm1370_vm8, %vm1371_vm7 }
 0x6c0   : > { %v1367_v17 = vsub.f32 1.0, %v1366_v9  ;;  %2496 = vrcp.f32 %v1340_v11  ;;  %v1361_v38 = vand.u32 2147483648, %v1340_v11  ;;  %vm1355_vm12 = vweird.f32 %v1340_v11 }
 0x6c1   : > { %v1388_v18 = vsel %vm1387_vm5, %v2493_v2, %v1384_v10 }
 0x6c2   : > { %v1393_v19 = vsel %vm1390_vm6, %v1392_v0, %v1388_v18  ;;  %v1368_v48 = vmul.f32 %v2495_v60, %v1367_v17  ;;  %v1362_v44 = vor.u32 1.1754944e-38, %v1361_v38 }
 0x6c3   : > { %v1394_v22 = vmul.f32 %v2485_v40, %v1393_v19  ;;  %v1359_v40 = vand.u32 2147483647, %v1340_v11 }
 0x6c4   : > { %v1369_v23 = vadd.f32 %v2495_v60, %v1368_v48 }
 0x6c5   : > { %2336 = vmatmul.msk.f32.vlgmr.msrb.gmra.mxu2 %vm572_vm13, %v1394_v22  ;;  %vm1360_vm15 = vcmp.eq.f32.partialorder %v1359_v40, 8.507059e+37  ;;  %v2432_v40 = vpack.i.bf16 %v2746_v14, %v2741_v36 }
 0x6c6   : > { %v2497_v28 = vpop.eup %2496  ;;  %v1373_v29 = vsel %vm1372_vm9, %v2495_v60, %v1369_v23 }
 0x6c7   : > { %v1378_v31 = vsel %vm1375_vm10, %v1377_v26, %v1373_v29  ;;  %v1351_v32 = vmul.f32 %v2497_v28, %v1340_v11  ;;  %v1349_v33 = vpop.xlane.xlu0 %1348  ;;  %vm1356_vm11 = vweird.f32 %v2497_v28 }
 0x6c8   : > { %2498 = vrcp.f32 %v1349_v33  ;;  %v1379_v35 = vmul.f32 %v2915_v46, %v1378_v31  ;;  %vm1357_vm14 = vmor %vm1355_vm12, %vm1356_vm11  ;;  %v1406_v51 = vand.u32 2147483648, %v1349_v33  ;;  %v1404_v54 = vand.u32 2147483647, %v1349_v33 }
 0x6c9   : > { %v1352_v34 = vsub.f32 1.0, %v1351_v32  ;;  %vm1400_vm2 = vweird.f32 %v1349_v33 }
 0x6ca   : > { %2335 = vmatmul.msk.f32.vlgmr.msra.gmra.mxu1 %vm572_vm13, %v1379_v35  ;;  %v1407_v58 = vor.u32 1.1754944e-38, %v1406_v51  ;;  %vm1405_vm4 = vcmp.eq.f32.partialorder %v1404_v54, 8.507059e+37 }
 0x6cb   : > { %v1353_v39 = vmul.f32 %v2497_v28, %v1352_v34 }
 0x6cd   : > { %v1354_v41 = vadd.f32 %v2497_v28, %v1353_v39  ;;  %2343 = vmatmul.msk.f32.vlgmr.msra.gmra.mxu2 %vm572_vm13, %v1571_v62 }
 0x6ce   : > { %v2499_v42 = vpop.eup %2498  ;;  %v1601_v56 = vpop.permute.xlu1 %1600 }
 0x6cf   : > { %v1358_v45 = vsel %vm1357_vm14, %v2497_v28, %v1354_v41  ;;  %v1396_v47 = vmul.f32 %v2499_v42, %v1349_v33  ;;  %vm1401_vm1 = vweird.f32 %v2499_v42 }
 0x6d0   : > { %v1363_v49 = vsel %vm1360_vm15, %v1362_v44, %v1358_v45  ;;  %vm1402_vm3 = vmor %vm1400_vm2, %vm1401_vm1 }
 0x6d1   : > { %v1397_v50 = vsub.f32 1.0, %v1396_v47  ;;  %v1364_v46 = vmul.f32 %v2920_v53, %v1363_v49  ;;  %v1599_v53 = vpop.permute.xlu2 %1598 }
 0x6d3   : > { %v1398_v52 = vmul.f32 %v2499_v42, %v1397_v50  ;;  %2334 = vmatmul.msk.f32.vlgmr.msra.gmra.mxu3 %vm572_vm13, %v1364_v46 }
 0x6d4   : > { %2344 = vmatpush.xpose.msk.msra.mxu3 %vm572_vm13, %v1601_v56 }
 0x6d5   : > { %v1399_v57 = vadd.f32 %v2499_v42, %v1398_v52 }
 0x6d7   : > { %v1403_v61 = vsel %vm1402_vm3, %v2499_v42, %v1399_v57 }
 0x6d8   : > { %v1408_v62 = vsel %vm1405_vm4, %v1407_v58, %v1403_v61 }
 0x6d9   : > { %v1409_v63 = vmul.f32 %v2924_v55, %v1408_v62 }
 0x6da   : > { %v1543_v1 = vpop.permute.xlu0 %1542 }
 0x6db   : > { %2337 = vmatmul.msk.f32.vlgmr.msrb.gmra.mxu3 %vm572_vm13, %v1409_v63  ;;  %2341 = vmatmul.msk.f32.vlgmr.msrb.gmra.mxu1 %vm572_vm13, %v1543_v1 }
 0x6e3   : > { %2345 = vmatmul.msk.f32.vlgmr.msra.gmra.mxu3 %vm572_vm13, %v1599_v53 }
 0x705   : > { %v1632_v3 = vpop.xlane.xlu0 %1631 }
 0x706   : > { %v1642_v43 = vsub.f32 %v2934_v59, %v1632_v3 }
 0x708   : > { %v1646_v9 = vmul.f32 1.442695, %v1642_v43 }
 0x70a   : > { %2500 = vpow2.f32 %v1646_v9 }
 0x710   : > { %v2952_v18 = vpop.eup %2500 }
 0x711   : > { %v1654_v13 = vsel %vm572_vm13, %v2952_v18, 0.0 }
 0x747   : > { %v1459_v5 = vpop.f32.mrf.mxu1 }
 0x748   : > { %v1485_v2 = vpop.f32.mrf.mxu2 }
 0x750   : > { %v1595_v6 = vpop.f32.mrf.mxu2 }
 0x751   : > { %v1628_v60 = vmul.f32 0.35355338, %v1595_v6 }
 0x753   : > { %v1636_v8 = vsel %vm572_vm13, %v1628_v60, -inf }
 0x754   : > { %1637 = vmax.xlane.f32.xlu2 %v1636_v8 }
 0x756   : > { %v1433_v55 = vpop.f32.mrf.mxu3 }
 0x758   : > { %v1567_v10 = vpop.f32.mrf.mxu1 }
 0x759   : > { %v1627_v11 = vmul.f32 0.35355338, %v1567_v10 }
 0x75b   : > { %v1633_v0 = vsel %vm572_vm13, %v1627_v11, -inf }
 0x75c   : > { %1634 = vmax.xlane.f32.xlu1 %v1633_v0 }
 0x75e   : > { %v1511_v17 = vpop.f32.mrf.mxu3 }
 0x764   : > { %1655 = vadd.xlane.f32.xlu1 %v1654_v13 }
 0x766   : > { %v1623_v19 = vpop.f32.mrf.mxu3 }
 0x767   : > { %v1629_v59 = vmul.f32 0.35355338, %v1623_v19 }
 0x769   : > { %v1639_v48 = vsel %vm572_vm13, %v1629_v59, -inf }
 0x76a   : > { %1640 = vmax.xlane.f32.xlu0 %v1639_v48 }
 0x7c7   : > { %v1638_v21 = vpop.xlane.xlu2 %1637 }
 0x7c8   : > { %v1644_v22 = vsub.f32 %v1628_v60, %v1638_v21 }
 0x7ca   : > { %v1650_v23 = vmul.f32 1.442695, %v1644_v22 }
 0x7cc   : > { %2502 = vpow2.f32 %v1650_v23 }
 0x7cf   : > { %v1635_v26 = vpop.xlane.xlu1 %1634 }
 0x7d0   : > { %v1643_v28 = vsub.f32 %v1627_v11, %v1635_v26 }
 0x7d2   : > { %v2957_v29 = vpop.eup %2502  ;;  %v1648_v31 = vmul.f32 1.442695, %v1643_v28 }
 0x7d3   : > { %v1660_v32 = vsel %vm572_vm13, %v2957_v29, 0.0 }
 0x7d4   : > { %2504 = vpow2.f32 %v1648_v31  ;;  %1661 = vadd.xlane.f32.xlu0 %v1660_v32 }
 0x7d7   : > { %v1656_v36 = vpop.xlane.xlu1 %1655 }
 0x7d8   : > { %v1677_v49 = vand.u32 2147483648, %v1656_v36  ;;  %vm1671_vm6 = vweird.f32 %v1656_v36 }
 0x7da   : > { %v2961_v33 = vpop.eup %2504  ;;  %v1678_v51 = vor.u32 1.1754944e-38, %v1677_v49 }
 0x7db   : > { %v1657_v34 = vsel %vm572_vm13, %v2961_v33, 0.0 }
 0x7dc   : > { %1658 = vadd.xlane.f32.xlu2 %v1657_v34 }
 0x7dd   : > { %v1641_v35 = vpop.xlane.xlu0 %1640 }
 0x7de   : > { %v1645_v38 = vsub.f32 %v1629_v59, %v1641_v35 }
 0x7e0   : > { %v1652_v39 = vmul.f32 1.442695, %v1645_v38  ;;  %v1895_v38 = vld [vmem:[%s3172_s4 + $0x18] sm:$0xff] }
 0x7e2   : > { %2506 = vpow2.f32 %v1652_v39  ;;  %v1894_v39 = vld [vmem:[%s3172_s4 + $0x10] sm:$0xff] }
 0x7e3   : > { %2508 = vrcp.f32 %v1656_v36 }
 0x7e8   : > { %v2967_v41 = vpop.eup %2506  ;;  %2433 = vrot.lane.b32.xlu0 %v2432_v40, %s2562_s14  ;;  %v1893_v40 = vld [vmem:[%s3172_s4 + $0x8] sm:$0xff] }
 0x7e9   : > { %v1663_v42 = vsel %vm572_vm13, %v2967_v41, 0.0  ;;  %v2509_v14 = vpop.eup %2508 }
 0x7ea   : > { %1664 = vadd.xlane.f32.xlu1 %v1663_v42  ;;  %v1667_v44 = vmul.f32 %v2509_v14, %v1656_v36  ;;  %vm1672_vm5 = vweird.f32 %v2509_v14 }
 0x7eb   : > { %vm1673_vm7 = vmor %vm1671_vm6, %vm1672_vm5 }
 0x7f0   : > { %1834 = vrot.lane.b32.xlu0 %v2895_v4, %s2563_s15  ;;  %v1668_v4 = vsub.f32 1.0, %v1667_v44 }
 0x7f4   : > { %1726 = vrot.lane.b32.xlu2 %v2738_v25, %s2562_s14  ;;  %v1669_v25 = vmul.f32 %v2509_v14, %v1668_v4 }
 0x7f6   : > { %v1670_v47 = vadd.f32 %v2509_v14, %v1669_v25 }
 0x7fc   : > { %1850 = vrot.lane.b32.xlu2 %v1433_v55, %s2564_s16 }
 0x803   : > { %1804 = vrot.lane.b32.xlu1 %v2753_v37, %s2562_s14 }
 0x804   : > { %1836 = vrot.lane.b32.xlu2 %v2902_v20, %s2563_s15  ;;  %v1675_v20 = vand.u32 2147483647, %v1656_v36 }
 0x806   : > { %vm1676_vm8 = vcmp.eq.f32.partialorder %v1675_v20, 8.507059e+37 }
 0x80b   : > { %1852 = vrot.lane.b32.xlu1 %v1459_v5, %s2564_s16 }
 0x80c   : > { %1838 = vrot.lane.b32.xlu2 %v2899_v16, %s2563_s15 }
 0x813   : > { %1854 = vrot.lane.b32.xlu1 %v1485_v2, %s2564_s16 }
 0x814   : > { %1840 = vrot.lane.b32.xlu2 %v2897_v12, %s2563_s15  ;;  %v1674_v12 = vsel %vm1673_vm7, %v2509_v14, %v1670_v47  ;;  %v1892_v14 = vld [vmem:[%s3172_s4] sm:$0xff]  ;;  %vm1882_vm7 = vcmask 130048  }
 0x815   : > { %v1679_v56 = vsel %vm1676_vm8, %v1678_v51, %v1674_v12  ;;  %vm1887_vm8 = vcmask 195584  }
 0x816   : > { %v1680_v2 = vmul.f32 %v2952_v18, %v1679_v56 }
 0x81b   : > { %1856 = vrot.lane.b32.xlu1 %v1511_v17, %s2564_s16 }
 0x847   : > { %v1662_v45 = vpop.xlane.xlu0 %1661 }
 0x848   : > { %2510 = vrcp.f32 %v1662_v45  ;;  %v1707_v54 = vand.u32 2147483648, %v1662_v45  ;;  %v1705_v57 = vand.u32 2147483647, %v1662_v45  ;;  %vm1701_vm10 = vweird.f32 %v1662_v45 }
 0x84a   : > { %v1708_v63 = vor.u32 1.1754944e-38, %v1707_v54  ;;  %vm1706_vm12 = vcmp.eq.f32.partialorder %v1705_v57, 8.507059e+37 }
 0x84e   : > { %v2511_v37 = vpop.eup %2510 }
 0x84f   : > { %v1697_v50 = vmul.f32 %v2511_v37, %v1662_v45  ;;  %v1659_v16 = vpop.xlane.xlu2 %1658  ;;  %vm1702_vm9 = vweird.f32 %v2511_v37 }
 0x850   : > { %2512 = vrcp.f32 %v1659_v16  ;;  %vm1703_vm11 = vmor %vm1701_vm10, %vm1702_vm9  ;;  %v1690_v6 = vand.u32 2147483647, %v1659_v16  ;;  %v1692_v60 = vand.u32 2147483648, %v1659_v16  ;;  %vm1686_vm15 = vweird.f32 %v1659_v16 }
 0x851   : > { %v1698_v46 = vsub.f32 1.0, %v1697_v50  ;;  %vm1900_vm9 = vcmask 261120  }
 0x852   : > { %v1693_v17 = vor.u32 1.1754944e-38, %v1692_v60  ;;  %vm1691_vm2 = vcmp.eq.f32.partialorder %v1690_v6, 8.507059e+37  ;;  %v2541_v60 = vld [vmem:[%s2647_s27 + $0x8] sm:$0xff] }
 0x853   : > { %v1699_v52 = vmul.f32 %v2511_v37, %v1698_v46 }
 0x855   : > { %v1700_v58 = vadd.f32 %v2511_v37, %v1699_v52 }
 0x856   : > { %v2513_v61 = vpop.eup %2512 }
 0x857   : > { %v1704_v62 = vsel %vm1703_vm11, %v2511_v37, %v1700_v58  ;;  %v1682_v1 = vmul.f32 %v2513_v61, %v1659_v16  ;;  %v1727_v53 = vpop.permute.xlu2 %1726  ;;  %vm1687_vm14 = vweird.f32 %v2513_v61 }
 0x858   : > { %1747 = vmatpush.msrb.mxu0 %v1727_v53  ;;  %v1709_v3 = vsel %vm1706_vm12, %v1708_v63, %v1704_v62  ;;  %vm1688_vm1 = vmor %vm1686_vm15, %vm1687_vm14 }
 0x859   : > { %v1683_v5 = vsub.f32 1.0, %v1682_v1  ;;  %2346 = vmatmul.msk.f32.vlgmr.msrb.gmra.mxu0 %vm572_vm13, %v1680_v2  ;;  %v1710_v10 = vmul.f32 %v2957_v29, %v1709_v3  ;;  %v2540_v3 = vld [vmem:[%s2647_s27] sm:$0xff] }
 0x85a   : > { %v2434_v43 = vpop.permute.xlu0 %2433  ;;  %1925 = vmatpush.msra.mxu0 %v1895_v38 }
 0x85b   : > { %v1684_v8 = vmul.f32 %v2513_v61, %v1683_v5  ;;  %v2436_v9 = vunpack.i.h.bf16 %v2434_v43  ;;  %v2435_v55 = vunpack.i.l.bf16 %v2434_v43 }
 0x85c   : > { %1926 = vmatpush.msra.mxu0 %v1894_v39 }
 0x85d   : > { %v1685_v11 = vadd.f32 %v2513_v61, %v1684_v8  ;;  %1773 = vmatpush.msra.mxu1 %v2435_v55  ;;  %1799 = vmatpush.msrb.mxu2 %v2436_v9  ;;  %v1665_v0 = vpop.xlane.xlu1 %1664  ;;  %v2542_v55 = vld [vmem:[%s2647_s27 + $0x10] sm:$0xff] }
 0x85e   : > { %2514 = vrcp.f32 %v1665_v0  ;;  %2348 = vmatmul.msk.f32.vlgmr.msrb.gmra.mxu2 %vm572_vm13, %v1710_v10  ;;  %v1722_v26 = vand.u32 2147483648, %v1665_v0  ;;  %vm1716_vm4 = vweird.f32 %v1665_v0  ;;  %v1720_v28 = vand.u32 2147483647, %v1665_v0  ;;  %1927 = vmatpush.msra.mxu0 %v1893_v40 }
 0x85f   : > { %v1689_v18 = vsel %vm1688_vm1, %v2513_v61, %v1685_v11  ;;  %v1851_v4 = vpop.permute.xlu2 %1850 }
 0x860   : > { %v1694_v13 = vsel %vm1691_vm2, %v1693_v17, %v1689_v18  ;;  %v1723_v31 = vor.u32 1.1754944e-38, %v1722_v26  ;;  %vm1721_vm6 = vcmp.eq.f32.partialorder %v1720_v28, 8.507059e+37  ;;  %1928 = vmatpush.msra.mxu0 %v1892_v14  ;;  %v2543_v17 = vld [vmem:[%s2647_s27 + $0x18] sm:$0xff]  ;;  %v2060_v28 = vld [vmem:[%s3176_s8 + $0x70] sm:$0xff] }
 0x861   : > { %v1695_v19 = vmul.f32 %v2961_v33, %v1694_v13  ;;  %v2061_v26 = vld [vmem:[%s3176_s8 + $0x78] sm:$0xff] }
 0x862   : > { %v1835_v44 = vpop.permute.xlu0 %1834  ;;  %2066 = vmatpush.msrb.mxu1 %v2061_v26 }
 0x863   : > { %2347 = vmatmul.msk.f32.vlgmr.msra.gmra.mxu1 %vm572_vm13, %v1695_v19  ;;  %v1878_v45 = vsel %vm572_vm13, %v2830_v30, %v1835_v44  ;;  %v2059_v44 = vld [vmem:[%s3176_s8 + $0x68] sm:$0xff] }
 0x864   : > { %v2515_v59 = vpop.eup %2514  ;;  %v1883_v25 = vsel %vm1882_vm7, %v1878_v45, %v1851_v4  ;;  %2067 = vmatpush.msrb.mxu1 %v2060_v28  ;;  %v2058_v4 = vld [vmem:[%s3176_s8 + $0x60] sm:$0xff]  ;;  %v2056_v45 = vld [vmem:[%s3176_s8 + $0x50] sm:$0xff] }
 0x865   : > { %v1712_v48 = vmul.f32 %v2515_v59, %v1665_v0  ;;  %vm1717_vm3 = vweird.f32 %v2515_v59 }
 0x866   : > { %vm1718_vm5 = vmor %vm1716_vm4, %vm1717_vm3  ;;  %2068 = vmatpush.msrb.mxu1 %v2059_v44 }
 0x867   : > { %v1713_v21 = vsub.f32 1.0, %v1712_v48  ;;  %v1837_v49 = vpop.permute.xlu2 %1836 }
 0x868   : > { %v1879_v50 = vsel %vm572_vm13, %v2828_v27, %v1837_v49  ;;  %2069 = vmatpush.msrb.mxu1 %v2058_v4  ;;  %v2052_v49 = vld [vmem:[%s3176_s8 + $0x30] sm:$0xff] }
 0x869   : > { %v1714_v22 = vmul.f32 %v2515_v59, %v1713_v21 }
 0x86a   : > { %2070 = vmatpush.msrb.mxu1 %v2057_v7 }
 0x86b   : > { %v1715_v23 = vadd.f32 %v2515_v59, %v1714_v22 }
 0x86c   : > { %2071 = vmatpush.msrb.mxu1 %v2056_v45 }
 0x86d   : > { %v1719_v29 = vsel %vm1718_vm5, %v2515_v59, %v1715_v23 }
 0x86e   : > { %v1724_v32 = vsel %vm1721_vm6, %v1723_v31, %v1719_v29 }
 0x86f   : > { %v1725_v35 = vmul.f32 %v2967_v41, %v1724_v32  ;;  %v1839_v46 = vpop.permute.xlu2 %1838 }
 0x870   : > { %v1880_v52 = vsel %vm572_vm13, %v2836_v24, %v1839_v46  ;;  %v2439_v24 = vld [vmem:[%s3173_s5] ss:$0 sm:$0xff] }
 0x871   : > { %v2046_v46 = vld [vmem:[%s3176_s8] sm:$0xff] }
 0x875   : > { %v1805_v34 = vpop.permute.xlu1 %1804 }
 0x876   : > { %1825 = vmatpush.msrb.mxu3 %v1805_v34 }
 0x877   : > { %2349 = vmatmul.msk.f32.vlgmr.msrb.gmra.mxu3 %vm572_vm13, %v1725_v35  ;;  %v1841_v27 = vpop.permute.xlu2 %1840 }
 0x878   : > { %v1881_v61 = vsel %vm572_vm13, %v2833_v15, %v1841_v27  ;;  %2364 = vmatpush.msra.mxu3 %v2061_v26 }
 0x87a   : > { %2365 = vmatpush.msra.mxu3 %v2060_v28 }
 0x87c   : > { %2366 = vmatpush.msra.mxu3 %v2059_v44 }
 0x87d   : > { %v1853_v20 = vpop.permute.xlu1 %1852 }
 0x87e   : > { %v1884_v16 = vsel %vm1882_vm7, %v1879_v50, %v1853_v20  ;;  %2367 = vmatpush.msra.mxu3 %v2058_v4  ;;  %v2051_v20 = vld [vmem:[%s3176_s8 + $0x28] sm:$0xff]  ;;  %v2050_v50 = vld [vmem:[%s3176_s8 + $0x20] sm:$0xff] }
 0x880   : > { %2368 = vmatpush.msra.mxu3 %v2057_v7 }
 0x882   : > { %2369 = vmatpush.msra.mxu3 %v2056_v45 }
 0x885   : > { %v1855_v51 = vpop.permute.xlu1 %1854 }
 0x886   : > { %v1885_v54 = vsel %vm1882_vm7, %v1880_v52, %v1855_v51 }
 0x88d   : > { %v1857_v58 = vpop.permute.xlu1 %1856 }
 0x88e   : > { %v1886_v62 = vsel %vm1882_vm7, %v1881_v61, %v1857_v58 }
 0x8d6   : > { %v1749_v33 = vpop.f32.mrf.mxu0 }
 0x8d7   : > { %1866 = vrot.lane.b32.xlu0 %v1749_v33, %s2565_s17 }
 0x8e0   : > { %v1775_v41 = vpop.f32.mrf.mxu1 }
 0x8e1   : > { %1868 = vrot.lane.b32.xlu0 %v1775_v41, %s2565_s17  ;;  %v1801_v42 = vpop.f32.mrf.mxu2 }
 0x8e9   : > { %1870 = vrot.lane.b32.xlu0 %v1801_v42, %s2565_s17 }
 0x8fa   : > { %v1827_v36 = vpop.f32.mrf.mxu3 }
 0x8fb   : > { %1872 = vrot.lane.b32.xlu0 %v1827_v36, %s2565_s17 }
 0x949   : > { %v1867_v47 = vpop.permute.xlu0 %1866 }
 0x94a   : > { %v1888_v37 = vsel %vm1887_vm8, %v1883_v25, %v1867_v47  ;;  %v2055_v25 = vld [vmem:[%s3176_s8 + $0x48] sm:$0xff]  ;;  %v2054_v47 = vld [vmem:[%s3176_s8 + $0x40] sm:$0xff] }
 0x94b   : > { %2350 = vmatmul.msk.f32.vlgmr.msra.gmra.mxu0 %vm1900_vm9, %v1888_v37  ;;  %2072 = vmatpush.msrb.mxu1 %v2055_v25  ;;  %v2053_v37 = vld [vmem:[%s3176_s8 + $0x38] sm:$0xff] }
 0x94c   : > { %2370 = vmatpush.msra.mxu3 %v2055_v25 }
 0x94d   : > { %2073 = vmatpush.msrb.mxu1 %v2054_v47 }
 0x94e   : > { %2371 = vmatpush.msra.mxu3 %v2054_v47 }
 0x94f   : > { %2074 = vmatpush.msrb.mxu1 %v2053_v37 }
 0x950   : > { %2372 = vmatpush.msra.mxu3 %v2053_v37 }
 0x951   : > { %2075 = vmatpush.msrb.mxu1 %v2052_v49 }
 0x952   : > { %2373 = vmatpush.msra.mxu3 %v2052_v49 }
 0x953   : > { %v1869_v12 = vpop.permute.xlu0 %1868  ;;  %2076 = vmatpush.msrb.mxu1 %v2051_v20 }
 0x954   : > { %v1889_v30 = vsel %vm1887_vm8, %v1884_v16, %v1869_v12  ;;  %2374 = vmatpush.msra.mxu3 %v2051_v20  ;;  %v2049_v16 = vld [vmem:[%s3176_s8 + $0x18] sm:$0xff]  ;;  %v2048_v12 = vld [vmem:[%s3176_s8 + $0x10] sm:$0xff] }
 0x955   : > { %2351 = vmatmul.msk.f32.gmra.mxu0 %vm1900_vm9, %v1889_v30  ;;  %2077 = vmatpush.msrb.mxu1 %v2050_v50  ;;  %v2047_v30 = vld [vmem:[%s3176_s8 + $0x8] sm:$0xff] }
 0x956   : > { %2375 = vmatpush.msra.mxu3 %v2050_v50 }
 0x957   : > { %2078 = vmatpush.msrb.mxu1 %v2049_v16 }
 0x958   : > { %2376 = vmatpush.msra.mxu3 %v2049_v16  ;;  %v2181_v16 = vld [vmem:[%s3178_s10 + $0x30] sm:$0xff] }
 0x959   : > { %2079 = vmatpush.msrb.mxu1 %v2048_v12 }
 0x95a   : > { %2377 = vmatpush.msra.mxu3 %v2048_v12  ;;  %v2180_v12 = vld [vmem:[%s3178_s10 + $0x28] sm:$0xff] }
 0x95b   : > { %v1871_v56 = vpop.permute.xlu0 %1870  ;;  %2080 = vmatpush.msrb.mxu1 %v2047_v30 }
 0x95c   : > { %v1890_v57 = vsel %vm1887_vm8, %v1885_v54, %v1871_v56  ;;  %2378 = vmatpush.msra.mxu3 %v2047_v30  ;;  %v2178_v30 = vld [vmem:[%s3178_s10 + $0x18] sm:$0xff] }
 0x95d   : > { %2352 = vmatmul.msk.f32.gmra.mxu0 %vm1900_vm9, %v1890_v57  ;;  %2081 = vmatpush.msrb.mxu1 %v2046_v46 }
 0x95e   : > { %2379 = vmatpush.msra.mxu3 %v2046_v46  ;;  %v2442_v46 = vld [vmem:[%s3177_s9] ss:$0 sm:$0xff] }
 0x96d   : > { %v1873_v63 = vpop.permute.xlu0 %1872 }
 0x96e   : > { %v1891_v1 = vsel %vm1887_vm8, %v1886_v62, %v1873_v63 }
 0x96f   : > { %2353 = vmatmul.msk.f32.gmra.mxu0 %vm1900_vm9, %v1891_v1 }
 0x9c8   : > { %v1930_v53 = vpop.f32.mrf.mxu0 }
 0x9c9   : > { %v1931_v2 = vadd.f32 %v2439_v24, %v1930_v53 }
 0x9cb   : > { %v3021_v5 = vadd.f32 %v2540_v3, %v1931_v2 }
 0x9cd   : > { %1948 = vadd.xlane.f32.xlu2 %v3021_v5 }
 0x9d2   : > { %v1933_v15 = vpop.f32.mrf.mxu0 }
 0x9d3   : > { %v1934_v6 = vadd.f32 %v2439_v24, %v1933_v15 }
 0x9d5   : > { %v3025_v43 = vadd.f32 %v2541_v60, %v1934_v6  ;;  %v2440_v6 = vld [vmem:[%s3174_s6] ss:$0 sm:$0xff] }
 0x9d7   : > { %1950 = vadd.xlane.f32.xlu1 %v3025_v43 }
 0x9da   : > { %v1936_v8 = vpop.f32.mrf.mxu0 }
 0x9db   : > { %v1937_v9 = vadd.f32 %v2439_v24, %v1936_v8 }
 0x9dd   : > { %v3029_v10 = vadd.f32 %v2542_v55, %v1937_v9  ;;  %v2441_v55 = vld [vmem:[%s3175_s7] ss:$0 sm:$0xff] }
 0x9df   : > { %1952 = vadd.xlane.f32.xlu0 %v3029_v10 }
 0x9ec   : > { %v1939_v11 = vpop.f32.mrf.mxu0 }
 0x9ed   : > { %v1940_v0 = vadd.f32 %v2439_v24, %v1939_v11 }
 0x9ef   : > { %v3033_v18 = vadd.f32 %v2543_v17, %v1940_v0 }
 0x9f1   : > { %1954 = vadd.xlane.f32.xlu2 %v3033_v18 }
 0xa40   : > { %v1949_v13 = vpop.xlane.xlu2 %1948 }
 0xa41   : > { %v1956_v19 = vmul.f32 0.03125, %v1949_v13 }
 0xa43   : > { %v1960_v59 = vsub.f32 %v3021_v5, %v1956_v19 }
 0xa45   : > { %v3039_v48 = vsel %vm437_vm0, %v1960_v59, 0.0 }
 0xa46   : > { %v1968_v21 = vmul.f32 %v3039_v48, %v3039_v48 }
 0xa48   : > { %1972 = vadd.xlane.f32.xlu1 %v1968_v21 }
 0xa4a   : > { %v1951_v22 = vpop.xlane.xlu1 %1950 }
 0xa4b   : > { %v1957_v23 = vmul.f32 0.03125, %v1951_v22 }
 0xa4d   : > { %v1961_v29 = vsub.f32 %v3025_v43, %v1957_v23 }
 0xa4f   : > { %v3052_v31 = vsel %vm437_vm0, %v1961_v29, 0.0 }
 0xa50   : > { %v1969_v32 = vmul.f32 %v3052_v31, %v3052_v31 }
 0xa52   : > { %v1953_v34 = vpop.xlane.xlu0 %1952  ;;  %1974 = vadd.xlane.f32.xlu2 %v1969_v32 }
 0xa53   : > { %v1958_v35 = vmul.f32 0.03125, %v1953_v34 }
 0xa55   : > { %v1962_v33 = vsub.f32 %v3029_v10, %v1958_v35 }
 0xa57   : > { %v3059_v38 = vsel %vm437_vm0, %v1962_v33, 0.0 }
 0xa58   : > { %v1970_v39 = vmul.f32 %v3059_v38, %v3059_v38 }
 0xa5a   : > { %1976 = vadd.xlane.f32.xlu0 %v1970_v39 }
 0xa64   : > { %v1955_v40 = vpop.xlane.xlu2 %1954 }
 0xa65   : > { %v1959_v41 = vmul.f32 0.03125, %v1955_v40 }
 0xa67   : > { %v1963_v42 = vsub.f32 %v3033_v18, %v1959_v41 }
 0xa69   : > { %v3066_v36 = vsel %vm437_vm0, %v1963_v42, 0.0 }
 0xa6a   : > { %v1971_v14 = vmul.f32 %v3066_v36, %v3066_v36 }
 0xa6c   : > { %1978 = vadd.xlane.f32.xlu1 %v1971_v14 }
 0xabb   : > { %v1973_v51 = vpop.xlane.xlu1 %1972 }
 0xabc   : > { %v1980_v52 = vmul.f32 0.03125, %v1973_v51  ;;  %v2177_v51 = vld [vmem:[%s3178_s10 + $0x10] sm:$0xff] }
 0xabe   : > { %v1984_v54 = vadd.f32 1e-05, %v1980_v52  ;;  %v2176_v52 = vld [vmem:[%s3178_s10 + $0x8] sm:$0xff] }
 0xac0   : > { %2516 = vrsqrt.f32 %v1984_v54  ;;  %vm1994_vm13 = vweird.f32 %v1984_v54 }
 0xac5   : > { %v1975_v56 = vpop.xlane.xlu2 %1974 }
 0xac6   : > { %v2517_v57 = vpop.eup %2516  ;;  %v1981_v27 = vmul.f32 0.03125, %v1975_v56 }
 0xac7   : > { %v1989_v58 = vmul.f32 %v2517_v57, %v1984_v54  ;;  %vm1995_vm0 = vweird.f32 %v2517_v57 }
 0xac8   : > { %v1985_v61 = vadd.f32 1e-05, %v1981_v27  ;;  %vm1996_vm10 = vmor %vm1994_vm13, %vm1995_vm0  ;;  %vm2187_vm0 = vcmask 523264  }
 0xac9   : > { %v1990_v62 = vmul.f32 %v2517_v57, %v1989_v58 }
 0xaca   : > { %2518 = vrsqrt.f32 %v1985_v61  ;;  %vm2004_vm12 = vweird.f32 %v1985_v61 }
 0xacb   : > { %v1991_v63 = vmul.f32 0.5, %v1990_v62 }
 0xacd   : > { %v1992_v1 = vsub.f32 1.5, %v1991_v63  ;;  %v1977_v24 = vpop.xlane.xlu0 %1976 }
 0xace   : > { %v1982_v53 = vmul.f32 0.03125, %v1977_v24 }
 0xacf   : > { %v1993_v2 = vmul.f32 %v2517_v57, %v1992_v1 }
 0xad0   : > { %v2519_v3 = vpop.eup %2518  ;;  %v1986_v15 = vadd.f32 1e-05, %v1982_v53 }
 0xad1   : > { %v1997_v60 = vsel %vm1996_vm10, %v2517_v57, %v1993_v2  ;;  %v1999_v8 = vmul.f32 %v2519_v3, %v1985_v61  ;;  %vm2005_vm11 = vweird.f32 %v2519_v3  ;;  %v2175_v57 = vld [vmem:[%s3178_s10] sm:$0xff] }
 0xad2   : > { %v2028_v9 = vmul.f32 %v1997_v60, %v3039_v48  ;;  %2520 = vrsqrt.f32 %v1986_v15  ;;  %vm2006_vm14 = vmor %vm2004_vm12, %vm2005_vm11  ;;  %vm2014_vm1 = vweird.f32 %v1986_v15 }
 0xad3   : > { %v2000_v11 = vmul.f32 %v2519_v3, %v1999_v8 }
 0xad4   : > { %v2035_v0 = vmul.f32 %v2440_v6, %v2028_v9 }
 0xad5   : > { %v2001_v17 = vmul.f32 0.5, %v2000_v11 }
 0xad6   : > { %v2042_v13 = vadd.f32 %v2441_v55, %v2035_v0 }
 0xad7   : > { %v2002_v19 = vsub.f32 1.5, %v2001_v17 }
 0xad8   : > { %v2521_v59 = vpop.eup %2520  ;;  %2082 = vmatmul.f32.vlgmr.msrb.gmra.mxu1 %v2042_v13 }
 0xad9   : > { %v2003_v21 = vmul.f32 %v2519_v3, %v2002_v19  ;;  %v2009_v22 = vmul.f32 %v2521_v59, %v1986_v15  ;;  %vm2015_vm15 = vweird.f32 %v2521_v59 }
 0xada   : > { %vm2016_vm2 = vmor %vm2014_vm1, %vm2015_vm15 }
 0xadb   : > { %v2010_v23 = vmul.f32 %v2521_v59, %v2009_v22  ;;  %v2007_v26 = vsel %vm2006_vm14, %v2519_v3, %v2003_v21 }
 0xadc   : > { %v2029_v48 = vmul.f32 %v2007_v26, %v3052_v31 }
 0xadd   : > { %v2011_v28 = vmul.f32 0.5, %v2010_v23 }
 0xade   : > { %v2036_v29 = vmul.f32 %v2440_v6, %v2029_v48 }
 0xadf   : > { %v2012_v32 = vsub.f32 1.5, %v2011_v28  ;;  %v1979_v34 = vpop.xlane.xlu1 %1978 }
 0xae0   : > { %v1983_v35 = vmul.f32 0.03125, %v1979_v34  ;;  %v2043_v33 = vadd.f32 %v2441_v55, %v2036_v29 }
 0xae1   : > { %v2013_v39 = vmul.f32 %v2521_v59, %v2012_v32 }
 0xae2   : > { %v1987_v40 = vadd.f32 1e-05, %v1983_v35  ;;  %2085 = vmatmul.f32.gmra.mxu1 %v2043_v33 }
 0xae3   : > { %v2017_v41 = vsel %vm2016_vm2, %v2521_v59, %v2013_v39 }
 0xae4   : > { %v2030_v42 = vmul.f32 %v2017_v41, %v3059_v38  ;;  %2522 = vrsqrt.f32 %v1987_v40  ;;  %vm2024_vm4 = vweird.f32 %v1987_v40  ;;  %v2182_v38 = vld [vmem:[%s3178_s10 + $0x38] sm:$0xff] }
 0xae5   : > { %2208 = vmatpush.msra.mxu2 %v2182_v38 }
 0xae6   : > { %v2037_v14 = vmul.f32 %v2440_v6, %v2030_v42 }
 0xae7   : > { %2209 = vmatpush.msra.mxu2 %v2181_v16 }
 0xae8   : > { %v2044_v44 = vadd.f32 %v2441_v55, %v2037_v14 }
 0xae9   : > { %2210 = vmatpush.msra.mxu2 %v2180_v12 }
 0xaea   : > { %v2523_v4 = vpop.eup %2522  ;;  %2088 = vmatmul.f32.vlgmr.msra.gmra.mxu3 %v2044_v44 }
 0xaeb   : > { %v2019_v31 = vmul.f32 %v2523_v4, %v1987_v40  ;;  %vm2025_vm3 = vweird.f32 %v2523_v4 }
 0xaec   : > { %vm2026_vm5 = vmor %vm2024_vm4, %vm2025_vm3 }
 0xaed   : > { %v2020_v7 = vmul.f32 %v2523_v4, %v2019_v31 }
 0xaef   : > { %v2021_v45 = vmul.f32 0.5, %v2020_v7 }
 0xaf1   : > { %v2022_v25 = vsub.f32 1.5, %v2021_v45 }
 0xaf3   : > { %v2023_v47 = vmul.f32 %v2523_v4, %v2022_v25 }
 0xaf5   : > { %v2027_v37 = vsel %vm2026_vm5, %v2523_v4, %v2023_v47 }
 0xaf6   : > { %v2031_v49 = vmul.f32 %v2027_v37, %v3066_v36  ;;  %v2179_v36 = vld [vmem:[%s3178_s10 + $0x20] sm:$0xff] }
 0xaf7   : > { %2211 = vmatpush.msra.mxu2 %v2179_v36 }
 0xaf8   : > { %v2038_v20 = vmul.f32 %v2440_v6, %v2031_v49 }
 0xaf9   : > { %2212 = vmatpush.msra.mxu2 %v2178_v30 }
 0xafa   : > { %v2045_v50 = vadd.f32 %v2441_v55, %v2038_v20 }
 0xafb   : > { %2213 = vmatpush.msra.mxu2 %v2177_v51 }
 0xafc   : > { %2091 = vmatmul.f32.gmra.mxu3 %v2045_v50 }
 0xafd   : > { %2214 = vmatpush.msra.mxu2 %v2176_v52 }
 0xaff   : > { %2215 = vmatpush.msra.mxu2 %v2175_v57 }
 0xb55   : > { %v2083_v54 = vpop.f32.mrf.mxu1 }
 0xb56   : > { %v2084_v56 = vadd.f32 %v2442_v46, %v2083_v54 }
 0xb58   : > { %v2354_v27 = vmul.f32 -1.442695, %v2084_v56 }
 0xb5a   : > { %2524 = vpow2.f32 %v2354_v27 }
 0xb5f   : > { %v2086_v58 = vpop.f32.mrf.mxu1 }
 0xb60   : > { %v2525_v61 = vpop.eup %2524  ;;  %v2087_v62 = vadd.f32 %v2442_v46, %v2086_v58 }
 0xb61   : > { %v2107_v63 = vadd.f32 1.0, %v2525_v61  ;;  %v2443_v61 = vld [vmem:[%s3179_s11] ss:$0 sm:$0xff] }
 0xb62   : > { %v2355_v1 = vmul.f32 -1.442695, %v2087_v62 }
 0xb63   : > { %2526 = vrcp.f32 %v2107_v63  ;;  %v2122_v6 = vand.u32 2147483648, %v2107_v63  ;;  %v2120_v9 = vand.u32 2147483647, %v2107_v63  ;;  %vm2116_vm7 = vweird.f32 %v2107_v63 }
 0xb64   : > { %2528 = vpow2.f32 %v2355_v1 }
 0xb65   : > { %v2123_v17 = vor.u32 1.1754944e-38, %v2122_v6  ;;  %vm2121_vm9 = vcmp.eq.f32.partialorder %v2120_v9, 8.507059e+37 }
 0xb69   : > { %v2527_v24 = vpop.eup %2526 }
 0xb6a   : > { %v2529_v53 = vpop.eup %2528  ;;  %v2112_v2 = vmul.f32 %v2527_v24, %v2107_v63  ;;  %vm2117_vm6 = vweird.f32 %v2527_v24 }
 0xb6b   : > { %v2108_v3 = vadd.f32 1.0, %v2529_v53  ;;  %vm2118_vm8 = vmor %vm2116_vm7, %vm2117_vm6 }
 0xb6c   : > { %v2113_v15 = vsub.f32 1.0, %v2112_v2 }
 0xb6d   : > { %2530 = vrcp.f32 %v2108_v3  ;;  %v2089_v60 = vpop.f32.mrf.mxu3  ;;  %v2137_v26 = vand.u32 2147483648, %v2108_v3  ;;  %v2135_v29 = vand.u32 2147483647, %v2108_v3  ;;  %vm2131_vm10 = vweird.f32 %v2108_v3 }
 0xb6e   : > { %v2114_v8 = vmul.f32 %v2527_v24, %v2113_v15  ;;  %v2090_v55 = vadd.f32 %v2442_v46, %v2089_v60 }
 0xb6f   : > { %v2138_v35 = vor.u32 1.1754944e-38, %v2137_v26  ;;  %vm2136_vm12 = vcmp.eq.f32.partialorder %v2135_v29, 8.507059e+37 }
 0xb70   : > { %v2115_v11 = vadd.f32 %v2527_v24, %v2114_v8  ;;  %v2356_v0 = vmul.f32 -1.442695, %v2090_v55 }
 0xb72   : > { %v2119_v13 = vsel %vm2118_vm8, %v2527_v24, %v2115_v11  ;;  %2532 = vpow2.f32 %v2356_v0 }
 0xb73   : > { %v2531_v19 = vpop.eup %2530  ;;  %v2124_v59 = vsel %vm2121_vm9, %v2123_v17, %v2119_v13 }
 0xb74   : > { %v2171_v21 = vmul.f32 %v2124_v59, %v2084_v56  ;;  %v2127_v22 = vmul.f32 %v2531_v19, %v2108_v3  ;;  %vm2132_vm13 = vweird.f32 %v2531_v19 }
 0xb75   : > { %vm2133_vm11 = vmor %vm2131_vm10, %vm2132_vm13 }
 0xb76   : > { %v2128_v23 = vsub.f32 1.0, %v2127_v22  ;;  %2358 = vmatmul.msk.f32.vlgmr.msra.gmra.mxu2 %vm2187_vm0, %v2171_v21 }
 0xb78   : > { %v2533_v48 = vpop.eup %2532  ;;  %v2129_v28 = vmul.f32 %v2531_v19, %v2128_v23 }
 0xb79   : > { %v2109_v32 = vadd.f32 1.0, %v2533_v48 }
 0xb7a   : > { %v2130_v34 = vadd.f32 %v2531_v19, %v2129_v28 }
 0xb7b   : > { %2534 = vrcp.f32 %v2109_v32  ;;  %v2152_v7 = vand.u32 2147483648, %v2109_v32  ;;  %v2150_v25 = vand.u32 2147483647, %v2109_v32  ;;  %vm2146_vm15 = vweird.f32 %v2109_v32 }
 0xb7c   : > { %v2134_v33 = vsel %vm2133_vm11, %v2531_v19, %v2130_v34 }
 0xb7d   : > { %v2139_v39 = vsel %vm2136_vm12, %v2138_v35, %v2134_v33  ;;  %v2153_v37 = vor.u32 1.1754944e-38, %v2152_v7  ;;  %vm2151_vm2 = vcmp.eq.f32.partialorder %v2150_v25, 8.507059e+37 }
 0xb7e   : > { %v2172_v40 = vmul.f32 %v2139_v39, %v2087_v62 }
 0xb7f   : > { %v2092_v41 = vpop.f32.mrf.mxu3 }
 0xb80   : > { %v2093_v42 = vadd.f32 %v2442_v46, %v2092_v41  ;;  %2359 = vmatmul.msk.f32.gmra.mxu2 %vm2187_vm0, %v2172_v40 }
 0xb81   : > { %v2535_v14 = vpop.eup %2534 }
 0xb82   : > { %v2142_v44 = vmul.f32 %v2535_v14, %v2109_v32  ;;  %v2357_v4 = vmul.f32 -1.442695, %v2093_v42  ;;  %vm2147_vm14 = vweird.f32 %v2535_v14 }
 0xb83   : > { %vm2148_vm1 = vmor %vm2146_vm15, %vm2147_vm14 }
 0xb84   : > { %v2143_v31 = vsub.f32 1.0, %v2142_v44  ;;  %2536 = vpow2.f32 %v2357_v4 }
 0xb86   : > { %v2144_v45 = vmul.f32 %v2535_v14, %v2143_v31 }
 0xb88   : > { %v2145_v47 = vadd.f32 %v2535_v14, %v2144_v45 }
 0xb8a   : > { %v2537_v49 = vpop.eup %2536  ;;  %v2149_v20 = vsel %vm2148_vm1, %v2535_v14, %v2145_v47 }
 0xb8b   : > { %v2154_v50 = vsel %vm2151_vm2, %v2153_v37, %v2149_v20  ;;  %v2110_v38 = vadd.f32 1.0, %v2537_v49 }
 0xb8c   : > { %v2173_v16 = vmul.f32 %v2154_v50, %v2090_v55 }
 0xb8d   : > { %2538 = vrcp.f32 %v2110_v38  ;;  %v2167_v46 = vand.u32 2147483648, %v2110_v38  ;;  %v2165_v52 = vand.u32 2147483647, %v2110_v38  ;;  %vm2161_vm4 = vweird.f32 %v2110_v38 }
 0xb8e   : > { %2360 = vmatmul.msk.f32.gmra.mxu2 %vm2187_vm0, %v2173_v16 }
 0xb8f   : > { %v2168_v56 = vor.u32 1.1754944e-38, %v2167_v46  ;;  %vm2166_vm6 = vcmp.eq.f32.partialorder %v2165_v52, 8.507059e+37 }
 0xb93   : > { %v2539_v12 = vpop.eup %2538 }
 0xb94   : > { %v2157_v36 = vmul.f32 %v2539_v12, %v2110_v38  ;;  %vm2162_vm3 = vweird.f32 %v2539_v12 }
 0xb95   : > { %vm2163_vm5 = vmor %vm2161_vm4, %vm2162_vm3 }
 0xb96   : > { %v2158_v30 = vsub.f32 1.0, %v2157_v36 }
 0xb98   : > { %v2159_v51 = vmul.f32 %v2539_v12, %v2158_v30 }
 0xb9a   : > { %v2160_v54 = vadd.f32 %v2539_v12, %v2159_v51 }
 0xb9c   : > { %v2164_v57 = vsel %vm2163_vm5, %v2539_v12, %v2160_v54 }
 0xb9d   : > { %v2169_v27 = vsel %vm2166_vm6, %v2168_v56, %v2164_v57 }
 0xb9e   : > { %v2174_v58 = vmul.f32 %v2169_v27, %v2093_v42 }
 0xba0   : > { %2361 = vmatmul.msk.f32.gmra.mxu2 %vm2187_vm0, %v2174_v58 }
 0xbf9   : > { %v2217_v62 = vpop.f32.mrf.mxu2 }
 0xbfa   : > { %v2218_v63 = vadd.f32 %v2443_v61, %v2217_v62 }
 0xbfc   : > { %v2229_v1 = vadd.f32 %v2218_v63, %v3021_v5 }
 0xbfe   : > { %2233 = vst [vmem:[%s415_s30] sm:$0xff] %v2229_v1 }
 0xc03   : > { %v2220_v24 = vpop.f32.mrf.mxu2 }
 0xc04   : > { %v2221_v53 = vadd.f32 %v2443_v61, %v2220_v24 }
 0xc06   : > { %v2230_v2 = vadd.f32 %v2221_v53, %v3025_v43 }
 0xc08   : > { %2234 = vst [vmem:[%s415_s30 + $0x8] sm:$0xff] %v2230_v2 }
 0xc11   : > { %v2223_v3 = vpop.f32.mrf.mxu2 }
 0xc12   : > { %v2224_v15 = vadd.f32 %v2443_v61, %v2223_v3 }
 0xc14   : > { %v2231_v6 = vadd.f32 %v2224_v15, %v3029_v10 }
 0xc16   : > { %2235 = vst [vmem:[%s415_s30 + $0x10] sm:$0xff] %v2231_v6 }
 0xc23   : > { %v2226_v60 = vpop.f32.mrf.mxu2 }
 0xc24   : > { %v2227_v8 = vadd.f32 %v2443_v61, %v2226_v60 }
 0xc26   : > { %v2232_v9 = vadd.f32 %v2227_v8, %v3033_v18 }
 0xc28   : > { %2236 = vst [vmem:[%s415_s30 + $0x18] sm:$0xff] %v2232_v9 }
 0xc29 PF: > { %s22_s21 = sadd.s32 1, %s2550_s21  }
 0xc2a   : > { %p19_p4 = scmp.ge.s32.totalorder %s22_s21, 4  }
 0xc2c   :  { %21 = sbr.rel (!%p19_p4) target bundleno = 1 (0x1), region = 98 }

// kernel: transformer_forward.3
= control target key start
LH: loop header
LB: loop body
LE: loop exit
PB: predicated region body
PF: predicated region fallthrough
CT: control target
= control target key end

     0   :  { %s3344_s0 = inlined_call_operand.vmem [shape: f32[8,8,128], index: 0, kind: input, shape index: {}]   ;;  %s3345_s1 = inlined_call_operand.vmem [shape: f32[1,128], index: 1, kind: input, shape index: {}]   ;;  %s3346_s2 = inlined_call_operand.vmem [shape: f32[1,128], index: 2, kind: input, shape index: {}]   ;;  %s3347_s3 = inlined_call_operand.vmem [shape: f32[128,96], index: 3, kind: input, shape index: {}]   ;;  %s3348_s4 = inlined_call_operand.vmem [shape: f32[32,128], index: 4, kind: input, shape index: {}]   ;;  %s3349_s5 = inlined_call_operand.vmem [shape: f32[1,128], index: 5, kind: input, shape index: {}]   ;;  %s3350_s6 = inlined_call_operand.vmem [shape: f32[1,128], index: 6, kind: input, shape index: {}]   ;;  %s3351_s7 = inlined_call_operand.vmem [shape: f32[1,128], index: 7, kind: input, shape index: {}]   ;;  %s3352_s8 = inlined_call_operand.vmem [shape: f32[128,64], index: 8, kind: input, shape index: {}]   ;;  %s3353_s9 = inlined_call_operand.vmem [shape: f32[1,64], index: 9, kind: input, shape index: {}]   ;;  %s3354_s10 = inlined_call_operand.vmem [shape: f32[64,128], index: 10, kind: input, shape index: {}]   ;;  %s3355_s11 = inlined_call_operand.vmem [shape: f32[1,128], index: 11, kind: input, shape index: {}]   ;;  %s3356_s12 = inlined_call_operand.hbm [shape: f32[8,8,128], index: 12, kind: output, shape index: {}]  }
   0x1   :  { %3358 = sst [smem:[#allocation6_spill]] %s3344_s0 }
   0x2   :  { %17 = vsyncpa [#allocation3], 0 }
   0x3   :  { %19 = vsyncpa [#allocation3 + $0x1], 0  ;;  %s2742_s21 = smov 0   ;;  %s2744_s22 = smov 0  }
   0x4   :  { %s2746_s23 = smov 0   ;;  %s2748_s24 = smov 0  }
   0x5 LB: > { %s2763_s25 = sadd.s32 4294967295, %s2660_s24   ;;  %s2313_s26 = sadd.s32 4294967294, %s2660_s24   ;;  %s2660_s24 = sphi %s2748_s24, %s3368_s24   ;;  %s2656_s23 = sphi %s2746_s23, %s3367_s23   ;;  %s2652_s22 = sphi %s2744_s22, %s3366_s22   ;;  %s2648_s21 = sphi %s2742_s21, %s3365_s21  }
   0x6   : > { %s2767_s27 = sadd.s32 1, %s2660_s24   ;;  %s289_s28 = sadd.s32 1, %s2656_s23 }
   0x7   : > { %s286_s29 = ssub.s32 %s2660_s24, %s2767_s27  ;;  %p299_p0 = scmp.ne.s32.totalorder %s2656_s23, %s2652_s22 }
   0x8   : > { %p287_p1 = scmp.eq.s32.totalorder %s286_s29, 0  ;;  %p300_p2 = scmp.eq.s32.totalorder %s2763_s25, 1 }
   0x9   : > { %p305_p3 = scmp.ne.s32.totalorder %s2652_s22, %s2648_s21  ;;  %p306_p4 = scmp.eq.s32.totalorder %s2313_s26, 1 }
   0xa   : > { %s2778_s30 = scalar_select %p287_p1, %s2656_s23, %s289_s28  }
   0xb   : > { %p2780_p5 = por %p300_p2, %p299_p0  ;;  %p2784_p6 = por %p306_p4, %p305_p3 }
   0xc   : > { %3359 = sst [smem:[#allocation5_spill]] %s2778_s30  ;;  %p2316_p7 = scmp.ge.s32.totalorder %s2660_s24, 1 }
   0xd   : > { %p366_p8 = scmp.lt.s32.totalorder %s2660_s24, 3 }
   0xf   : > { %p367_p9 = pnand %p2316_p7, %p366_p8 }
  0x10   : > { %s2318_s15 = sshll.u32 (!%p367_p9), %s2763_s25, 2  ;;  %s3362_s0 = sld [smem:[#allocation6_spill]] (!%p367_p9) }
  0x11   : > { %370 = sbr.rel (%p367_p9) target bundleno = 3127 (0xc37), region = 68  ;;  %p409_p10 = scmp.lt.s32.totalorder (!%p367_p9), %s2318_s15, 7 }
  0x12   : > { %s2662_s17 = smov (!%p367_p9), 96   ;;  %s2663_s18 = smov (!%p367_p9), 120  }
  0x13   : > { %s2664_s20 = smov (!%p367_p9), 64   ;;  %s2665_s26 = smov (!%p367_p9), 88  }
  0x14   : > { %s2666_s28 = smov (!%p367_p9), 56   ;;  %s2667_s29 = smov (!%p367_p9), 112  }
  0x15   : > { %s2669_s30 = smov (!%p367_p9), 48  }
  0x16   : > { %s3370_s15 = smov (!%p409_p10, %s2318_s15), 7  ;;  %v537_v4 = vld [vmem:[%s3347_s3 + $0x78] sm:$0xff]  ;;  %v536_v5 = vld [vmem:[%s3347_s3 + $0x70] sm:$0xff]  ;;  %v433_v6 = vlaneseq  ;;  %v535_v28 = vld [vmem:[%s3347_s3 + $0x68] sm:$0xff]  ;;  %vm570_vm13 = vcmask 64512  }
  0x17   : > { %s2319_s16 = sshll.u32 %s3370_s15, 3  ;;  %538 = vmatpush.msra.mxu0 %v537_v4  ;;  %v534_v29 = vld [vmem:[%s3347_s3 + $0x60] sm:$0xff]  ;;  %v533_v30 = vld [vmem:[%s3347_s3 + $0x58] sm:$0xff]  ;;  %v532_v31 = vld [vmem:[%s3347_s3 + $0x50] sm:$0xff]  ;;  %s2670_s15 = smov 104  }
  0x18   : > { %s2794_s19 = scalar_lea.vmem %s3362_s0, %s2319_s16  ;;  %v2806_v7 = vand.u32 127, %v433_v6  ;;  %v531_v32 = vld [vmem:[%s3347_s3 + $0x48] sm:$0xff]  ;;  %v530_v33 = vld [vmem:[%s3347_s3 + $0x40] sm:$0xff]  ;;  %v529_v34 = vld [vmem:[%s3347_s3 + $0x38] sm:$0xff]  ;;  %s2668_s0 = smov 80  }
  0x19   : > { %v417_v0 = vld [vmem:[%s2794_s19 + $0x10] sm:$0xff]  ;;  %v415_v1 = vld [vmem:[%s2794_s19] sm:$0xff]  ;;  %v418_v2 = vld [vmem:[%s2794_s19 + $0x18] sm:$0xff]  ;;  %539 = vmatpush.msra.mxu0 %v536_v5  ;;  %s2671_s16 = smov 72  }
  0x1a   : > { %425 = vadd.xlane.f32.xlu1 %v417_v0  ;;  %421 = vadd.xlane.f32.xlu0 %v415_v1  ;;  %v416_v3 = vld [vmem:[%s2794_s19 + $0x8] sm:$0xff]  ;;  %vm435_vm0 = vcmp.lt.s32.totalorder %v2806_v7, 32  ;;  %v528_v35 = vld [vmem:[%s3347_s3 + $0x30] sm:$0xff]  ;;  %v526_v37 = vld [vmem:[%s3347_s3 + $0x20] sm:$0xff] }
  0x1b   : > { %540 = vmatpush.msra.mxu0 %v535_v28  ;;  %v527_v36 = vld [vmem:[%s3347_s3 + $0x28] sm:$0xff]  ;;  %v525_v38 = vld [vmem:[%s3347_s3 + $0x18] sm:$0xff]  ;;  %v524_v39 = vld [vmem:[%s3347_s3 + $0x10] sm:$0xff] }
  0x1c   : > { %v523_v40 = vld [vmem:[%s3347_s3 + $0x8] sm:$0xff]  ;;  %v522_v41 = vld [vmem:[%s3347_s3] sm:$0xff]  ;;  %v2055_v7 = vld [vmem:[%s3352_s8 + $0x58] sm:$0xff] }
  0x1d   : > { %541 = vmatpush.msra.mxu0 %v534_v29  ;;  %v2491_v4 = vld [vmem:[%s3345_s1] ss:$0 sm:$0xff] }
  0x1f   : > { %542 = vmatpush.msra.mxu0 %v533_v30 }
  0x21   : > { %543 = vmatpush.msra.mxu0 %v532_v31 }
  0x22   : > { %427 = vadd.xlane.f32.xlu1 %v418_v2  ;;  %423 = vadd.xlane.f32.xlu0 %v416_v3 }
  0x23   : > { %544 = vmatpush.msra.mxu0 %v531_v32 }
  0x25   : > { %545 = vmatpush.msra.mxu0 %v530_v33 }
  0x27   : > { %546 = vmatpush.msra.mxu0 %v529_v34 }
  0x29   : > { %547 = vmatpush.msra.mxu0 %v528_v35 }
  0x2b   : > { %548 = vmatpush.msra.mxu0 %v527_v36 }
  0x2d   : > { %549 = vmatpush.msra.mxu0 %v526_v37 }
  0x2f   : > { %550 = vmatpush.msra.mxu0 %v525_v38 }
  0x31   : > { %551 = vmatpush.msra.mxu0 %v524_v39 }
  0x33   : > { %552 = vmatpush.msra.mxu0 %v523_v40 }
  0x35   : > { %553 = vmatpush.msra.mxu0 %v522_v41 }
  0x8d   : > { %v426_v8 = vpop.xlane.xlu1 %425  ;;  %v422_v9 = vpop.xlane.xlu0 %421 }
  0x8e   : > { %v431_v10 = vmul.f32 0.03125, %v426_v8  ;;  %v429_v11 = vmul.f32 0.03125, %v422_v9  ;;  %v2492_v9 = vld [vmem:[%s3346_s2] ss:$0 sm:$0xff] }
  0x90   : > { %v438_v12 = vsub.f32 %v417_v0, %v431_v10  ;;  %v436_v13 = vsub.f32 %v415_v1, %v429_v11 }
  0x92   : > { %v2811_v14 = vsel %vm435_vm0, %v438_v12, 0.0  ;;  %v2815_v15 = vsel %vm435_vm0, %v436_v13, 0.0 }
  0x93   : > { %v446_v16 = vmul.f32 %v2811_v14, %v2811_v14  ;;  %v444_v17 = vmul.f32 %v2815_v15, %v2815_v15 }
  0x95   : > { %v428_v18 = vpop.xlane.xlu1 %427  ;;  %452 = vadd.xlane.f32.xlu0 %v446_v16  ;;  %448 = vadd.xlane.f32.xlu2 %v444_v17  ;;  %v424_v19 = vpop.xlane.xlu0 %423 }
  0x96   : > { %v432_v20 = vmul.f32 0.03125, %v428_v18  ;;  %v430_v21 = vmul.f32 0.03125, %v424_v19 }
  0x98   : > { %v439_v22 = vsub.f32 %v418_v2, %v432_v20  ;;  %v437_v23 = vsub.f32 %v416_v3, %v430_v21 }
  0x9a   : > { %v2823_v24 = vsel %vm435_vm0, %v439_v22, 0.0  ;;  %v2827_v25 = vsel %vm435_vm0, %v437_v23, 0.0 }
  0x9b   : > { %v447_v26 = vmul.f32 %v2823_v24, %v2823_v24  ;;  %v445_v27 = vmul.f32 %v2827_v25, %v2827_v25 }
  0x9d   : > { %454 = vadd.xlane.f32.xlu1 %v447_v26  ;;  %450 = vadd.xlane.f32.xlu2 %v445_v27 }
 0x108   : > { %v449_v42 = vpop.xlane.xlu2 %448  ;;  %v453_v43 = vpop.xlane.xlu0 %452 }
 0x109   : > { %v456_v44 = vmul.f32 0.03125, %v449_v42  ;;  %v458_v45 = vmul.f32 0.03125, %v453_v43 }
 0x10b   : > { %v460_v46 = vadd.f32 1e-05, %v456_v44  ;;  %v462_v47 = vadd.f32 1e-05, %v458_v45 }
 0x10d   : > { %2498 = vrsqrt.f32 %v460_v46  ;;  %vm470_vm2 = vweird.f32 %v460_v46  ;;  %vm490_vm4 = vweird.f32 %v462_v47 }
 0x10e   : > { %2500 = vrsqrt.f32 %v462_v47 }
 0x110   : > { %v455_v48 = vpop.xlane.xlu1 %454  ;;  %v451_v49 = vpop.xlane.xlu2 %450 }
 0x111   : > { %v459_v50 = vmul.f32 0.03125, %v455_v48  ;;  %v457_v51 = vmul.f32 0.03125, %v451_v49 }
 0x113   : > { %v2499_v52 = vpop.eup %2498  ;;  %v463_v53 = vadd.f32 1e-05, %v459_v50  ;;  %v461_v54 = vadd.f32 1e-05, %v457_v51 }
 0x114   : > { %v2501_v55 = vpop.eup %2500  ;;  %v465_v56 = vmul.f32 %v2499_v52, %v460_v46  ;;  %vm471_vm1 = vweird.f32 %v2499_v52 }
 0x115   : > { %v485_v57 = vmul.f32 %v2501_v55, %v462_v47  ;;  %2502 = vrsqrt.f32 %v463_v53  ;;  %vm472_vm3 = vmor %vm470_vm2, %vm471_vm1  ;;  %vm491_vm5 = vweird.f32 %v2501_v55  ;;  %vm480_vm8 = vweird.f32 %v461_v54 }
 0x116   : > { %v466_v58 = vmul.f32 %v2499_v52, %v465_v56  ;;  %2504 = vrsqrt.f32 %v461_v54  ;;  %vm492_vm7 = vmor %vm490_vm4, %vm491_vm5  ;;  %vm500_vm10 = vweird.f32 %v463_v53 }
 0x117   : > { %v486_v60 = vmul.f32 %v2501_v55, %v485_v57 }
 0x118   : > { %v467_v59 = vmul.f32 0.5, %v466_v58 }
 0x119   : > { %v487_v1 = vmul.f32 0.5, %v486_v60 }
 0x11a   : > { %v468_v61 = vsub.f32 1.5, %v467_v59 }
 0x11b   : > { %v2503_v62 = vpop.eup %2502  ;;  %v488_v10 = vsub.f32 1.5, %v487_v1 }
 0x11c   : > { %v2505_v63 = vpop.eup %2504  ;;  %v469_v0 = vmul.f32 %v2499_v52, %v468_v61  ;;  %v495_v2 = vmul.f32 %v2503_v62, %v463_v53  ;;  %vm501_vm11 = vweird.f32 %v2503_v62 }
 0x11d   : > { %v475_v3 = vmul.f32 %v2505_v63, %v461_v54  ;;  %vm481_vm6 = vweird.f32 %v2505_v63  ;;  %v489_v18 = vmul.f32 %v2501_v55, %v488_v10  ;;  %vm502_vm12 = vmor %vm500_vm10, %vm501_vm11 }
 0x11e   : > { %v473_v5 = vsel %vm472_vm3, %v2499_v52, %v469_v0  ;;  %v496_v11 = vmul.f32 %v2503_v62, %v495_v2  ;;  %vm482_vm9 = vmor %vm480_vm8, %vm481_vm6 }
 0x11f   : > { %v476_v6 = vmul.f32 %v2505_v63, %v475_v3  ;;  %v504_v8 = vmul.f32 %v473_v5, %v2815_v15  ;;  %v493_v23 = vsel %vm492_vm7, %v2501_v55, %v489_v18 }
 0x120   : > { %v497_v19 = vmul.f32 0.5, %v496_v11  ;;  %v506_v28 = vmul.f32 %v493_v23, %v2811_v14 }
 0x121   : > { %v477_v12 = vmul.f32 0.5, %v476_v6  ;;  %v511_v13 = vmul.f32 %v2491_v4, %v504_v8 }
 0x122   : > { %v498_v22 = vsub.f32 1.5, %v497_v19  ;;  %v513_v30 = vmul.f32 %v2491_v4, %v506_v28 }
 0x123   : > { %v478_v16 = vsub.f32 1.5, %v477_v12  ;;  %v518_v17 = vadd.f32 %v2492_v9, %v511_v13 }
 0x124   : > { %v499_v29 = vmul.f32 %v2503_v62, %v498_v22  ;;  %v520_v32 = vadd.f32 %v2492_v9, %v513_v30 }
 0x125   : > { %v479_v20 = vmul.f32 %v2505_v63, %v478_v16  ;;  %554 = vmatmul.f32.vlgmr.msra.gmra.mxu0 %v518_v17 }
 0x126   : > { %v503_v31 = vsel %vm502_vm12, %v2503_v62, %v499_v29 }
 0x127   : > { %v483_v15 = vsel %vm482_vm9, %v2505_v63, %v479_v20  ;;  %v507_v33 = vmul.f32 %v503_v31, %v2823_v24 }
 0x128   : > { %v505_v21 = vmul.f32 %v483_v15, %v2827_v25 }
 0x129   : > { %v514_v34 = vmul.f32 %v2491_v4, %v507_v33 }
 0x12a   : > { %v512_v26 = vmul.f32 %v2491_v4, %v505_v21 }
 0x12b   : > { %v521_v35 = vadd.f32 %v2492_v9, %v514_v34 }
 0x12c   : > { %v519_v27 = vadd.f32 %v2492_v9, %v512_v26 }
 0x12e   : > { %557 = vmatmul.f32.gmra.mxu0 %v519_v27 }
 0x136   : > { %560 = vmatmul.f32.gmra.mxu0 %v520_v32 }
 0x13e   : > { %563 = vmatmul.f32.gmra.mxu0 %v521_v35 }
 0x1a2   : > { %v2885_v25 = vpop.f32.mrf.mxu0 }
 0x1a3   : > { %568 = vrot.lane.b32.xlu0 %v2885_v25, %s2662_s17 }
 0x1ab   : > { %v2888_v36 = vpop.f32.mrf.mxu0  ;;  %880 = vrot.lane.b32.xlu0 %v2885_v25, %s2663_s18 }
 0x1ac   : > { %596 = vrot.lane.b32.xlu2 %v2888_v36, %s2662_s17  ;;  %v2898_v24 = vpack.i.bf16 %v2888_v36, %v2885_v25 }
 0x1b3   : > { %v2893_v14 = vpop.f32.mrf.mxu0 }
 0x1b4   : > { %623 = vrot.lane.b32.xlu1 %v2893_v14, %s2662_s17 }
 0x1bb   : > { %v2900_v37 = vpop.f32.mrf.mxu0 }
 0x1bc   : > { %2457 = vrot.lane.b32.xlu1 %v2898_v24, %s2664_s20  ;;  %650 = vrot.lane.b32.xlu2 %v2900_v37, %s2662_s17  ;;  %v2461_v38 = vpack.i.bf16 %v2893_v14, %v2900_v37  ;;  %v2471_v22 = vpack.i.bf16 %v2900_v37, %v2893_v14  ;;  %s2672_s17 = smov 40  }
 0x1be   : > { %2462 = vrot.lane.b32.xlu0 %v2461_v38, %s2664_s20  ;;  %s2674_s20 = smov 16  }
 0x1c4   : > { %882 = vrot.lane.b32.xlu2 %v2885_v25, %s2665_s26 }
 0x206   : > { %v597_v39 = vpop.permute.xlu2 %596 }
 0x207   : > { %2322 = vmatpush.xpose.msk.msra.mxu2 %vm570_vm13, %v597_v39 }
 0x20a   : > { %2323 = vmatmul.msk.f32.vlgmr.msra.gmra.mxu2 %vm570_vm13, %v2888_v36 }
 0x215   : > { %v569_v40 = vpop.permute.xlu0 %568 }
 0x216   : > { %v651_v41 = vpop.permute.xlu2 %650  ;;  %2320 = vmatpush.xpose.msk.msrb.mxu0 %vm570_vm13, %v569_v40 }
 0x217   : > { %2326 = vmatpush.xpose.msk.msra.mxu1 %vm570_vm13, %v651_v41 }
 0x219   : > { %2321 = vmatmul.msk.f32.vlgmr.msrb.gmra.mxu0 %vm570_vm13, %v2885_v25 }
 0x21a   : > { %2327 = vmatmul.msk.f32.vlgmr.msra.gmra.mxu1 %vm570_vm13, %v2900_v37 }
 0x21d   : > { %v2918_v43 = vpop.permute.xlu0 %880 }
 0x21e   : > { %v883_v48 = vpop.permute.xlu2 %882 }
 0x226   : > { %v624_v42 = vpop.permute.xlu1 %623 }
 0x227   : > { %2324 = vmatpush.xpose.msk.msra.mxu3 %vm570_vm13, %v624_v42 }
 0x22a   : > { %2325 = vmatmul.msk.f32.vlgmr.msra.gmra.mxu3 %vm570_vm13, %v2893_v14 }
 0x22e   : > { %v2458_v44 = vpop.permute.xlu1 %2457 }
 0x22f   : > { %v2459_v45 = vunpack.i.l.bf16 %v2458_v44  ;;  %v2460_v46 = vunpack.i.h.bf16 %v2458_v44 }
 0x230   : > { %v2463_v47 = vpop.permute.xlu0 %2462 }
 0x231   : > { %v2464_v49 = vunpack.i.l.bf16 %v2463_v47  ;;  %797 = vmatpush.msrb.mxu2 %v2459_v45  ;;  %823 = vmatpush.msrb.mxu3 %v2460_v46  ;;  %v2465_v50 = vunpack.i.h.bf16 %v2463_v47 }
 0x233   : > { %2332 = vmatpush.xpose.msk.msra.mxu3 %vm570_vm13, %v883_v48  ;;  %849 = vmatpush.msrb.mxu1 %v2465_v50 }
 0x234   : > { %875 = vmatpush.msra.mxu2 %v2464_v49 }
 0x28d   : > { %v619_v51 = vpop.f32.mrf.mxu2 }
 0x28e   : > { %v677_v52 = vmul.f32 0.35355338, %v619_v51 }
 0x290   : > { %v683_v53 = vsel %vm570_vm13, %v677_v52, -inf }
 0x291   : > { %684 = vmax.xlane.f32.xlu2 %v683_v53 }
 0x296   : > { %v592_v54 = vpop.f32.mrf.mxu0 }
 0x297   : > { %v676_v55 = vmul.f32 0.35355338, %v592_v54  ;;  %v673_v56 = vpop.f32.mrf.mxu1 }
 0x298   : > { %v679_v57 = vmul.f32 0.35355338, %v673_v56 }
 0x299   : > { %v680_v58 = vsel %vm570_vm13, %v676_v55, -inf }
 0x29a   : > { %v689_v59 = vsel %vm570_vm13, %v679_v57, -inf  ;;  %681 = vmax.xlane.f32.xlu0 %v680_v58 }
 0x29b   : > { %690 = vmax.xlane.f32.xlu1 %v689_v59 }
 0x2a9   : > { %910 = vrot.lane.b32.xlu2 %v2888_v36, %s2665_s26 }
 0x2ad   : > { %v646_v60 = vpop.f32.mrf.mxu3 }
 0x2ae   : > { %v678_v61 = vmul.f32 0.35355338, %v646_v60 }
 0x2b0   : > { %v686_v62 = vsel %vm570_vm13, %v678_v61, -inf }
 0x2b1   : > { %687 = vmax.xlane.f32.xlu0 %v686_v62 }
 0x2b4   : > { %938 = vrot.lane.b32.xlu1 %v2893_v14, %s2665_s26 }
 0x2c5   : > { %966 = vrot.lane.b32.xlu0 %v2900_v37, %s2665_s26  ;;  %s2675_s26 = smov 24  }
 0x304   : > { %v685_v63 = vpop.xlane.xlu2 %684 }
 0x305   : > { %v693_v0 = vsub.f32 %v677_v52, %v685_v63 }
 0x307   : > { %v698_v1 = vmul.f32 1.442695, %v693_v0 }
 0x309   : > { %2506 = vpow2.f32 %v698_v1 }
 0x30c   : > { %v911_v2 = vpop.permute.xlu2 %910 }
 0x30d   : > { %2334 = vmatpush.xpose.msk.msra.mxu1 %vm570_vm13, %v911_v2  ;;  %v682_v3 = vpop.xlane.xlu0 %681 }
 0x30e   : > { %v691_v4 = vpop.xlane.xlu1 %690  ;;  %v692_v5 = vsub.f32 %v676_v55, %v682_v3 }
 0x30f   : > { %v2507_v6 = vpop.eup %2506  ;;  %v695_v8 = vsub.f32 %v679_v57, %v691_v4 }
 0x310   : > { %v696_v9 = vmul.f32 1.442695, %v692_v5  ;;  %v707_v10 = vsel %vm570_vm13, %v2507_v6, 0.0 }
 0x311   : > { %v702_v11 = vmul.f32 1.442695, %v695_v8  ;;  %708 = vadd.xlane.f32.xlu1 %v707_v10 }
 0x312   : > { %2508 = vpow2.f32 %v696_v9 }
 0x313   : > { %2510 = vpow2.f32 %v702_v11 }
 0x318   : > { %v2935_v12 = vpop.eup %2508 }
 0x319   : > { %v2937_v13 = vpop.eup %2510  ;;  %v704_v16 = vsel %vm570_vm13, %v2935_v12, 0.0 }
 0x31a   : > { %v713_v17 = vsel %vm570_vm13, %v2937_v13, 0.0  ;;  %705 = vadd.xlane.f32.xlu2 %v704_v16 }
 0x31b   : > { %714 = vadd.xlane.f32.xlu0 %v713_v17 }
 0x324   : > { %v688_v18 = vpop.xlane.xlu0 %687 }
 0x325   : > { %v694_v19 = vsub.f32 %v678_v61, %v688_v18 }
 0x326   : > { %v939_v23 = vpop.permute.xlu1 %938 }
 0x327   : > { %v700_v20 = vmul.f32 1.442695, %v694_v19 }
 0x329   : > { %2512 = vpow2.f32 %v700_v20 }
 0x32a   : > { %936 = vrot.lane.b32.xlu1 %v2893_v14, %s2663_s18 }
 0x32f   : > { %v2945_v15 = vpop.eup %2512  ;;  %964 = vrot.lane.b32.xlu0 %v2900_v37, %s2663_s18 }
 0x330   : > { %v710_v21 = vsel %vm570_vm13, %v2945_v15, 0.0 }
 0x331   : > { %711 = vadd.xlane.f32.xlu2 %v710_v21 }
 0x332   : > { %2472 = vrot.lane.b32.xlu1 %v2471_v22, %s2666_s28 }
 0x337   : > { %2467 = vrot.lane.b32.xlu0 %v2898_v24, %s2666_s28  ;;  %v967_v27 = vpop.permute.xlu0 %966  ;;  %s2385_s28 = sshll.u32 %s2763_s25, 5 }
 0x33f   : > { %1196 = vrot.lane.b32.xlu0 %v2885_v25, %s2667_s29 }
 0x349   : > { %908 = vrot.lane.b32.xlu2 %v2888_v36, %s2663_s18  ;;  %s3357_s18 = smov 8  }
 0x351   : > { %1198 = vrot.lane.b32.xlu2 %v2885_v25, %s2668_s0 }
 0x384   : > { %v709_v26 = vpop.xlane.xlu1 %708 }
 0x385   : > { %2514 = vrcp.f32 %v709_v26  ;;  %v742_v33 = vand.u32 2147483648, %v709_v26  ;;  %v740_v35 = vand.u32 2147483647, %v709_v26  ;;  %vm736_vm15 = vweird.f32 %v709_v26 }
 0x387   : > { %v743_v38 = vor.u32 1.1754944e-38, %v742_v33  ;;  %vm741_vm2 = vcmp.eq.f32.partialorder %v740_v35, 8.507059e+37 }
 0x38b   : > { %v2515_v28 = vpop.eup %2514 }
 0x38c   : > { %v732_v29 = vmul.f32 %v2515_v28, %v709_v26  ;;  %vm737_vm14 = vweird.f32 %v2515_v28 }
 0x38d   : > { %v706_v30 = vpop.xlane.xlu2 %705  ;;  %vm738_vm1 = vmor %vm736_vm15, %vm737_vm14 }
 0x38e   : > { %v733_v31 = vsub.f32 1.0, %v732_v29  ;;  %2516 = vrcp.f32 %v706_v30  ;;  %v715_v32 = vpop.xlane.xlu0 %714  ;;  %v727_v48 = vand.u32 2147483648, %v706_v30  ;;  %v725_v51 = vand.u32 2147483647, %v706_v30 }
 0x38f   : > { %2518 = vrcp.f32 %v715_v32  ;;  %vm721_vm4 = vweird.f32 %v706_v30  ;;  %v772_v58 = vand.u32 2147483648, %v715_v32  ;;  %vm766_vm8 = vweird.f32 %v715_v32 }
 0x390   : > { %v734_v34 = vmul.f32 %v2515_v28, %v733_v31  ;;  %v728_v54 = vor.u32 1.1754944e-38, %v727_v48  ;;  %vm726_vm6 = vcmp.eq.f32.partialorder %v725_v51, 8.507059e+37  ;;  %v770_v60 = vand.u32 2147483647, %v715_v32 }
 0x391   : > { %v773_v0 = vor.u32 1.1754944e-38, %v772_v58 }
 0x392   : > { %v735_v24 = vadd.f32 %v2515_v28, %v734_v34  ;;  %vm771_vm10 = vcmp.eq.f32.partialorder %v770_v60, 8.507059e+37 }
 0x394   : > { %v2517_v39 = vpop.eup %2516  ;;  %v739_v40 = vsel %vm738_vm1, %v2515_v28, %v735_v24 }
 0x395   : > { %v2519_v41 = vpop.eup %2518  ;;  %v717_v42 = vmul.f32 %v2517_v39, %v706_v30  ;;  %v744_v44 = vsel %vm741_vm2, %v743_v38, %v739_v40  ;;  %vm722_vm3 = vweird.f32 %v2517_v39 }
 0x396   : > { %v762_v45 = vmul.f32 %v2519_v41, %v715_v32  ;;  %v745_v46 = vmul.f32 %v2507_v6, %v744_v44  ;;  %vm723_vm5 = vmor %vm721_vm4, %vm722_vm3  ;;  %vm767_vm7 = vweird.f32 %v2519_v41 }
 0x397   : > { %v718_v47 = vsub.f32 1.0, %v717_v42  ;;  %vm768_vm9 = vmor %vm766_vm8, %vm767_vm7 }
 0x398   : > { %v763_v49 = vsub.f32 1.0, %v762_v45  ;;  %2329 = vmatmul.msk.f32.vlgmr.msrb.gmra.mxu3 %vm570_vm13, %v745_v46 }
 0x399   : > { %v719_v50 = vmul.f32 %v2517_v39, %v718_v47  ;;  %2338 = vmatpush.xpose.msk.msrb.mxu3 %vm570_vm13, %v967_v27 }
 0x39a   : > { %v764_v52 = vmul.f32 %v2519_v41, %v763_v49 }
 0x39b   : > { %v720_v53 = vadd.f32 %v2517_v39, %v719_v50 }
 0x39c   : > { %v937_v55 = vpop.permute.xlu1 %936  ;;  %v765_v56 = vadd.f32 %v2519_v41, %v764_v52 }
 0x39d   : > { %v724_v57 = vsel %vm723_vm5, %v2517_v39, %v720_v53 }
 0x39e   : > { %v729_v59 = vsel %vm726_vm6, %v728_v54, %v724_v57  ;;  %v769_v62 = vsel %vm768_vm9, %v2519_v41, %v765_v56 }
 0x39f   : > { %v730_v61 = vmul.f32 %v2935_v12, %v729_v59  ;;  %v774_v1 = vsel %vm771_vm10, %v773_v0, %v769_v62 }
 0x3a0   : > { %2333 = vmatmul.msk.f32.vlgmr.msra.gmra.mxu3 %vm570_vm13, %v2918_v43  ;;  %v775_v5 = vmul.f32 %v2937_v13, %v774_v1 }
 0x3a1   : > { %v965_v63 = vpop.permute.xlu0 %964  ;;  %2328 = vmatmul.msk.f32.vlgmr.msrb.gmra.mxu2 %vm570_vm13, %v730_v61 }
 0x3a2   : > { %2336 = vmatpush.xpose.msk.msrb.mxu2 %vm570_vm13, %v939_v23 }
 0x3a4   : > { %v2473_v2 = vpop.permute.xlu1 %2472  ;;  %v712_v3 = vpop.xlane.xlu2 %711 }
 0x3a5   : > { %v2474_v4 = vunpack.i.l.bf16 %v2473_v2  ;;  %2520 = vrcp.f32 %v712_v3  ;;  %v757_v12 = vand.u32 2147483648, %v712_v3  ;;  %v755_v17 = vand.u32 2147483647, %v712_v3 }
 0x3a6   : > { %vm751_vm12 = vweird.f32 %v712_v3  ;;  %v2475_v26 = vunpack.i.h.bf16 %v2473_v2  ;;  %v2476_v2 = vpack.i.bf16 %v2893_v14, %v2885_v25 }
 0x3a7   : > { %1165 = vmatpush.msra.mxu3 %v2474_v4  ;;  %v758_v13 = vor.u32 1.1754944e-38, %v757_v12  ;;  %vm756_vm15 = vcmp.eq.f32.partialorder %v755_v17, 8.507059e+37 }
 0x3a8   : > { %2339 = vmatmul.msk.f32.vlgmr.msrb.gmra.mxu3 %vm570_vm13, %v965_v63 }
 0x3a9   : > { %v2468_v6 = vpop.permute.xlu0 %2467  ;;  %2331 = vmatmul.msk.f32.vlgmr.msra.gmra.mxu2 %vm570_vm13, %v775_v5 }
 0x3aa   : > { %v2470_v43 = vunpack.i.h.bf16 %v2468_v6  ;;  %v2469_v23 = vunpack.i.l.bf16 %v2468_v6 }
 0x3ab   : > { %v2521_v8 = vpop.eup %2520 }
 0x3ac   : > { %v747_v9 = vmul.f32 %v2521_v8, %v712_v3  ;;  %v909_v10 = vpop.permute.xlu2 %908  ;;  %1139 = vmatpush.msra.mxu2 %v2470_v43  ;;  %vm752_vm11 = vweird.f32 %v2521_v8  ;;  %v2481_v3 = vpack.i.bf16 %v2900_v37, %v2888_v36 }
 0x3ad   : > { %vm753_vm14 = vmor %vm751_vm12, %vm752_vm11 }
 0x3ae   : > { %v748_v11 = vsub.f32 1.0, %v747_v9 }
 0x3b0   : > { %v749_v16 = vmul.f32 %v2521_v8, %v748_v11 }
 0x3b1   : > { %2337 = vmatmul.msk.f32.vlgmr.msrb.gmra.mxu2 %vm570_vm13, %v937_v55  ;;  %v2993_v48 = vpop.permute.xlu0 %1196 }
 0x3b2   : > { %v750_v18 = vadd.f32 %v2521_v8, %v749_v16 }
 0x3b4   : > { %v1199_v19 = vpop.permute.xlu2 %1198  ;;  %v754_v20 = vsel %vm753_vm14, %v2521_v8, %v750_v18 }
 0x3b5   : > { %2344 = vmatpush.xpose.msk.msrb.mxu2 %vm570_vm13, %v1199_v19  ;;  %v759_v21 = vsel %vm756_vm15, %v758_v13, %v754_v20 }
 0x3b6   : > { %v760_v22 = vmul.f32 %v2945_v15, %v759_v21 }
 0x3b8   : > { %2330 = vmatmul.msk.f32.vlgmr.msrb.gmra.mxu1 %vm570_vm13, %v760_v22 }
 0x3b9   : > { %1113 = vmatpush.msrb.mxu1 %v2469_v23 }
 0x3c0   : > { %2335 = vmatmul.msk.f32.vlgmr.msra.gmra.mxu1 %vm570_vm13, %v909_v10 }
 0x3c1   : > { %1191 = vmatpush.msra.mxu1 %v2475_v26 }
 0x41b   : > { %v2975_v27 = vpop.f32.mrf.mxu3 }
 0x423   : > { %v905_v28 = vpop.f32.mrf.mxu3 }
 0x424   : > { %v992_v29 = vmul.f32 0.35355338, %v905_v28  ;;  %v2977_v30 = vpop.f32.mrf.mxu2 }
 0x426   : > { %v996_v31 = vsel %vm570_vm13, %v992_v29, -inf }
 0x427   : > { %997 = vmax.xlane.f32.xlu1 %v996_v31 }
 0x42b   : > { %v989_v32 = vpop.f32.mrf.mxu3 }
 0x42c   : > { %v995_v33 = vmul.f32 0.35355338, %v989_v32  ;;  %v2980_v15 = vpop.f32.mrf.mxu2 }
 0x42e   : > { %v1005_v34 = vsel %vm570_vm13, %v995_v33, -inf }
 0x42f   : > { %1006 = vmax.xlane.f32.xlu1 %v1005_v34 }
 0x434   : > { %v961_v35 = vpop.f32.mrf.mxu2 }
 0x435   : > { %v2983_v24 = vpop.f32.mrf.mxu1  ;;  %v994_v38 = vmul.f32 0.35355338, %v961_v35 }
 0x437   : > { %v1002_v39 = vsel %vm570_vm13, %v994_v38, -inf }
 0x438   : > { %1003 = vmax.xlane.f32.xlu0 %v1002_v39 }
 0x43d   : > { %v933_v40 = vpop.f32.mrf.mxu1 }
 0x43e   : > { %v993_v41 = vmul.f32 0.35355338, %v933_v40 }
 0x440   : > { %v999_v42 = vsel %vm570_vm13, %v993_v41, -inf }
 0x441   : > { %1000 = vmax.xlane.f32.xlu2 %v999_v42 }
 0x448   : > { %1226 = vrot.lane.b32.xlu1 %v2888_v36, %s2668_s0 }
 0x44c   : > { %1254 = vrot.lane.b32.xlu0 %v2893_v14, %s2668_s0 }
 0x459   : > { %1224 = vrot.lane.b32.xlu2 %v2888_v36, %s2667_s29 }
 0x49a   : > { %v998_v44 = vpop.xlane.xlu1 %997 }
 0x49b   : > { %v1008_v45 = vsub.f32 %v992_v29, %v998_v44 }
 0x49d   : > { %v1012_v46 = vmul.f32 1.442695, %v1008_v45 }
 0x49f   : > { %2522 = vpow2.f32 %v1012_v46 }
 0x4a2   : > { %v1007_v47 = vpop.xlane.xlu1 %1006 }
 0x4a3   : > { %v1011_v49 = vsub.f32 %v995_v33, %v1007_v47 }
 0x4a5   : > { %v2523_v50 = vpop.eup %2522  ;;  %v1018_v51 = vmul.f32 1.442695, %v1011_v49 }
 0x4a6   : > { %v1020_v52 = vsel %vm570_vm13, %v2523_v50, 0.0 }
 0x4a7   : > { %2524 = vpow2.f32 %v1018_v51  ;;  %1021 = vadd.xlane.f32.xlu2 %v1020_v52 }
 0x4ab   : > { %v1004_v53 = vpop.xlane.xlu0 %1003 }
 0x4ac   : > { %v1010_v54 = vsub.f32 %v994_v38, %v1004_v53 }
 0x4ad   : > { %v2996_v55 = vpop.eup %2524 }
 0x4ae   : > { %v1016_v56 = vmul.f32 1.442695, %v1010_v54  ;;  %v1029_v57 = vsel %vm570_vm13, %v2996_v55, 0.0 }
 0x4af   : > { %1030 = vadd.xlane.f32.xlu2 %v1029_v57 }
 0x4b0   : > { %2526 = vpow2.f32 %v1016_v56 }
 0x4b4   : > { %v1001_v58 = vpop.xlane.xlu2 %1000 }
 0x4b5   : > { %v1009_v59 = vsub.f32 %v993_v41, %v1001_v58 }
 0x4b6   : > { %v3000_v60 = vpop.eup %2526 }
 0x4b7   : > { %v1014_v61 = vmul.f32 1.442695, %v1009_v59  ;;  %v1026_v62 = vsel %vm570_vm13, %v3000_v60, 0.0 }
 0x4b8   : > { %1027 = vadd.xlane.f32.xlu1 %v1026_v62 }
 0x4b9   : > { %2528 = vpow2.f32 %v1014_v61 }
 0x4ba   : > { %v1227_v63 = vpop.permute.xlu1 %1226 }
 0x4bb   : > { %2346 = vmatpush.xpose.msk.msrb.mxu3 %vm570_vm13, %v1227_v63 }
 0x4bc   : > { %v3023_v4 = vpop.permute.xlu2 %1224 }
 0x4be   : > { %v1255_v22 = vpop.permute.xlu0 %1254 }
 0x4bf   : > { %v3005_v0 = vpop.eup %2528 }
 0x4c0   : > { %v1023_v1 = vsel %vm570_vm13, %v3005_v0, 0.0 }
 0x4c1   : > { %1024 = vadd.xlane.f32.xlu0 %v1023_v1 }
 0x4c7   : > { %1280 = vrot.lane.b32.xlu2 %v2900_v37, %s2667_s29 }
 0x4cf   : > { %2477 = vrot.lane.b32.xlu2 %v2476_v2, %s2669_s30 }
 0x4d1   : > { %1282 = vrot.lane.b32.xlu1 %v2900_v37, %s2668_s0  ;;  %s2247_s0 = scalar_lea.hbm %s3356_s12, %s2385_s28  ;;  %s2618_s28 = scalar_lea.hbm %s3356_s12, 64 }
 0x4d5   : > { %1252 = vrot.lane.b32.xlu0 %v2893_v14, %s2667_s29 }
 0x4d7   : > { %1512 = vrot.lane.b32.xlu2 %v2885_v25, %s2670_s15 }
 0x4d9   : > { %1514 = vrot.lane.b32.xlu1 %v2885_v25, %s2671_s16 }
 0x4dd   : > { %2482 = vrot.lane.b32.xlu0 %v2481_v3, %s2669_s30 }
 0x51a   : > { %v1022_v5 = vpop.xlane.xlu2 %1021 }
 0x51b   : > { %2530 = vrcp.f32 %v1022_v5  ;;  %v1043_v10 = vand.u32 2147483648, %v1022_v5  ;;  %v1041_v12 = vand.u32 2147483647, %v1022_v5  ;;  %vm1037_vm2 = vweird.f32 %v1022_v5 }
 0x51d   : > { %v1044_v18 = vor.u32 1.1754944e-38, %v1043_v10  ;;  %vm1042_vm4 = vcmp.eq.f32.partialorder %v1041_v12, 8.507059e+37 }
 0x521   : > { %v2531_v6 = vpop.eup %2530 }
 0x522   : > { %v1033_v43 = vmul.f32 %v2531_v6, %v1022_v5  ;;  %v1031_v8 = vpop.xlane.xlu2 %1030  ;;  %vm1038_vm1 = vweird.f32 %v2531_v6 }
 0x523   : > { %2532 = vrcp.f32 %v1031_v8  ;;  %vm1039_vm3 = vmor %vm1037_vm2, %vm1038_vm1  ;;  %v1088_v26 = vand.u32 2147483648, %v1031_v8  ;;  %v1086_v31 = vand.u32 2147483647, %v1031_v8  ;;  %vm1082_vm6 = vweird.f32 %v1031_v8 }
 0x524   : > { %v1034_v9 = vsub.f32 1.0, %v1033_v43 }
 0x525   : > { %v1089_v33 = vor.u32 1.1754944e-38, %v1088_v26  ;;  %vm1087_vm8 = vcmp.eq.f32.partialorder %v1086_v31, 8.507059e+37 }
 0x526   : > { %v1035_v11 = vmul.f32 %v2531_v6, %v1034_v9 }
 0x528   : > { %v1036_v16 = vadd.f32 %v2531_v6, %v1035_v11 }
 0x529   : > { %v2533_v17 = vpop.eup %2532 }
 0x52a   : > { %v1040_v13 = vsel %vm1039_vm3, %v2531_v6, %v1036_v16  ;;  %v1078_v19 = vmul.f32 %v2533_v17, %v1031_v8  ;;  %vm1083_vm5 = vweird.f32 %v2533_v17  ;;  %v1281_v34 = vpop.permute.xlu2 %1280 }
 0x52b   : > { %v1045_v20 = vsel %vm1042_vm4, %v1044_v18, %v1040_v13  ;;  %v1028_v21 = vpop.xlane.xlu1 %1027  ;;  %vm1084_vm7 = vmor %vm1082_vm6, %vm1083_vm5 }
 0x52c   : > { %v1079_v23 = vsub.f32 1.0, %v1078_v19  ;;  %2534 = vrcp.f32 %v1028_v21  ;;  %v1046_v28 = vmul.f32 %v2523_v50, %v1045_v20  ;;  %v1073_v45 = vand.u32 2147483648, %v1028_v21 }
 0x52d   : > { %v1071_v47 = vand.u32 2147483647, %v1028_v21  ;;  %vm1067_vm10 = vweird.f32 %v1028_v21 }
 0x52e   : > { %v1080_v29 = vmul.f32 %v2533_v17, %v1079_v23  ;;  %2340 = vmatmul.msk.f32.vlgmr.msrb.gmra.mxu1 %vm570_vm13, %v1046_v28  ;;  %v1074_v50 = vor.u32 1.1754944e-38, %v1073_v45 }
 0x52f   : > { %2348 = vmatpush.xpose.msk.msrb.mxu1 %vm570_vm13, %v1255_v22  ;;  %vm1072_vm12 = vcmp.eq.f32.partialorder %v1071_v47, 8.507059e+37 }
 0x530   : > { %v1081_v32 = vadd.f32 %v2533_v17, %v1080_v29 }
 0x532   : > { %v2535_v35 = vpop.eup %2534  ;;  %v1085_v38 = vsel %vm1084_vm7, %v2533_v17, %v1081_v32  ;;  %v2478_v53 = vpop.permute.xlu2 %2477 }
 0x533   : > { %v1090_v39 = vsel %vm1087_vm8, %v1089_v33, %v1085_v38  ;;  %v1063_v40 = vmul.f32 %v2535_v35, %v1028_v21  ;;  %vm1068_vm9 = vweird.f32 %v2535_v35  ;;  %v2479_v57 = vunpack.i.l.bf16 %v2478_v53 }
 0x534   : > { %v1025_v41 = vpop.xlane.xlu0 %1024  ;;  %v1091_v42 = vmul.f32 %v2996_v55, %v1090_v39  ;;  %vm1069_vm11 = vmor %vm1067_vm10, %vm1068_vm9  ;;  %v2480_v9 = vunpack.i.h.bf16 %v2478_v53 }
 0x535   : > { %v1064_v44 = vsub.f32 1.0, %v1063_v40  ;;  %2536 = vrcp.f32 %v1025_v41  ;;  %v1058_v59 = vand.u32 2147483648, %v1025_v41  ;;  %v1056_v62 = vand.u32 2147483647, %v1025_v41 }
 0x536   : > { %2343 = vmatmul.msk.f32.vlgmr.msra.gmra.mxu1 %vm570_vm13, %v1091_v42  ;;  %vm1052_vm15 = vweird.f32 %v1025_v41 }
 0x537   : > { %v1065_v46 = vmul.f32 %v2535_v35, %v1064_v44  ;;  %v1059_v1 = vor.u32 1.1754944e-38, %v1058_v59  ;;  %vm1057_vm2 = vcmp.eq.f32.partialorder %v1056_v62, 8.507059e+37 }
 0x539   : > { %v1066_v49 = vadd.f32 %v2535_v35, %v1065_v46 }
 0x53a   : > { %v1513_v8 = vpop.permute.xlu2 %1512 }
 0x53b   : > { %v2537_v51 = vpop.eup %2536  ;;  %v1070_v52 = vsel %vm1069_vm11, %v2535_v35, %v1066_v49 }
 0x53c   : > { %v1075_v54 = vsel %vm1072_vm12, %v1074_v50, %v1070_v52  ;;  %v1048_v56 = vmul.f32 %v2537_v51, %v1025_v41  ;;  %vm1053_vm14 = vweird.f32 %v2537_v51 }
 0x53d   : > { %v1076_v55 = vmul.f32 %v3000_v60, %v1075_v54  ;;  %vm1054_vm1 = vmor %vm1052_vm15, %vm1053_vm14 }
 0x53e   : > { %v1049_v58 = vsub.f32 1.0, %v1048_v56 }
 0x53f   : > { %2342 = vmatmul.msk.f32.vlgmr.msra.gmra.mxu3 %vm570_vm13, %v1076_v55 }
 0x540   : > { %v1050_v61 = vmul.f32 %v2537_v51, %v1049_v58  ;;  %1429 = vmatpush.msra.mxu3 %v2479_v57 }
 0x542   : > { %v1051_v63 = vadd.f32 %v2537_v51, %v1050_v61 }
 0x543   : > { %v1283_v2 = vpop.permute.xlu1 %1282 }
 0x544   : > { %v1055_v3 = vsel %vm1054_vm1, %v2537_v51, %v1051_v63 }
 0x545   : > { %v1060_v5 = vsel %vm1057_vm2, %v1059_v1, %v1055_v3 }
 0x546   : > { %v1061_v6 = vmul.f32 %v3005_v0, %v1060_v5 }
 0x547   : > { %v1253_v60 = vpop.permute.xlu0 %1252  ;;  %2347 = vmatmul.msk.f32.vlgmr.msrb.gmra.mxu3 %vm570_vm13, %v3023_v4 }
 0x548   : > { %2341 = vmatmul.msk.f32.vlgmr.msra.gmra.mxu2 %vm570_vm13, %v1061_v6  ;;  %2349 = vmatmul.msk.f32.vlgmr.msrb.gmra.mxu1 %vm570_vm13, %v1253_v60 }
 0x549   : > { %2350 = vmatpush.xpose.msk.msra.mxu2 %vm570_vm13, %v1283_v2 }
 0x54b   : > { %v1515_v43 = vpop.permute.xlu1 %1514 }
 0x54c   : > { %2356 = vmatpush.xpose.msk.msra.mxu0 %vm570_vm13, %v1515_v43 }
 0x54f   : > { %v2483_v10 = vpop.permute.xlu0 %2482  ;;  %2357 = vmatmul.msk.f32.vlgmr.msra.gmra.mxu0 %vm570_vm13, %v1513_v8 }
 0x550   : > { %v2485_v11 = vunpack.i.h.bf16 %v2483_v10  ;;  %v2484_v0 = vunpack.i.l.bf16 %v2483_v10  ;;  %2345 = vmatmul.msk.f32.vlgmr.msrb.gmra.mxu2 %vm570_vm13, %v2993_v48 }
 0x551   : > { %1481 = vmatpush.msrb.mxu2 %v2480_v9 }
 0x552   : > { %1455 = vmatpush.msra.mxu1 %v2484_v0  ;;  %1507 = vmatpush.msrb.mxu3 %v2485_v11 }
 0x558   : > { %2351 = vmatmul.msk.f32.vlgmr.msra.gmra.mxu2 %vm570_vm13, %v1281_v34 }
 0x5ab   : > { %v3042_v4 = vpop.f32.mrf.mxu1 }
 0x5b3   : > { %v3044_v12 = vpop.f32.mrf.mxu1 }
 0x5c2   : > { %v3046_v16 = vpop.f32.mrf.mxu3 }
 0x5c5   : > { %v1277_v17 = vpop.f32.mrf.mxu1 }
 0x5c6   : > { %v1310_v18 = vmul.f32 0.35355338, %v1277_v17 }
 0x5c8   : > { %v1318_v13 = vsel %vm570_vm13, %v1310_v18, -inf }
 0x5c9   : > { %1319 = vmax.xlane.f32.xlu0 %v1318_v13 }
 0x5ca   : > { %v1249_v19 = vpop.f32.mrf.mxu3 }
 0x5cb   : > { %v3049_v20 = vpop.f32.mrf.mxu2  ;;  %v1309_v48 = vmul.f32 0.35355338, %v1249_v19 }
 0x5cc   : > { %v1537_v58 = vpop.f32.mrf.mxu0 }
 0x5cd   : > { %v1315_v21 = vsel %vm570_vm13, %v1309_v48, -inf  ;;  %v3081_v59 = vmul.f32 0.35355338, %v1537_v58 }
 0x5ce   : > { %1316 = vmax.xlane.f32.xlu2 %v1315_v21 }
 0x5cf   : > { %v1628_v61 = vsel %vm570_vm13, %v3081_v59, -inf }
 0x5d3   : > { %v1221_v22 = vpop.f32.mrf.mxu2 }
 0x5d4   : > { %v1308_v23 = vmul.f32 0.35355338, %v1221_v22 }
 0x5d6   : > { %v1312_v26 = vsel %vm570_vm13, %v1308_v23, -inf }
 0x5d7   : > { %1313 = vmax.xlane.f32.xlu1 %v1312_v26 }
 0x5db   : > { %v1305_v28 = vpop.f32.mrf.mxu2 }
 0x5dc   : > { %v1311_v29 = vmul.f32 0.35355338, %v1305_v28 }
 0x5dd   : > { %1570 = vrot.lane.b32.xlu0 %v2893_v14, %s2671_s16 }
 0x5de   : > { %v1321_v31 = vsel %vm570_vm13, %v1311_v29, -inf }
 0x5df   : > { %1322 = vmax.xlane.f32.xlu1 %v1321_v31 }
 0x5e6   : > { %1542 = vrot.lane.b32.xlu2 %v2888_v36, %s2671_s16 }
 0x5f8   : > { %1568 = vrot.lane.b32.xlu1 %v2893_v14, %s2670_s15 }
 0x63c   : > { %v1320_v32 = vpop.xlane.xlu0 %1319 }
 0x63d   : > { %v1326_v33 = vsub.f32 %v1310_v18, %v1320_v32 }
 0x63f   : > { %v1332_v34 = vmul.f32 1.442695, %v1326_v33 }
 0x641   : > { %2538 = vpow2.f32 %v1332_v34  ;;  %v1317_v35 = vpop.xlane.xlu2 %1316 }
 0x642   : > { %v1325_v38 = vsub.f32 %v1309_v48, %v1317_v35 }
 0x644   : > { %v1330_v39 = vmul.f32 1.442695, %v1325_v38 }
 0x646   : > { %2540 = vpow2.f32 %v1330_v39 }
 0x647   : > { %v2539_v40 = vpop.eup %2538 }
 0x648   : > { %v1342_v41 = vsel %vm570_vm13, %v2539_v40, 0.0 }
 0x649   : > { %1343 = vadd.xlane.f32.xlu2 %v1342_v41  ;;  %v1543_v42 = vpop.permute.xlu2 %1542 }
 0x64a   : > { %v1314_v44 = vpop.xlane.xlu1 %1313  ;;  %2358 = vmatpush.xpose.msk.msrb.mxu1 %vm570_vm13, %v1543_v42 }
 0x64b   : > { %v1324_v45 = vsub.f32 %v1308_v23, %v1314_v44 }
 0x64c   : > { %v3062_v46 = vpop.eup %2540 }
 0x64d   : > { %v1328_v47 = vmul.f32 1.442695, %v1324_v45  ;;  %v1339_v49 = vsel %vm570_vm13, %v3062_v46, 0.0 }
 0x64e   : > { %1340 = vadd.xlane.f32.xlu1 %v1339_v49 }
 0x64f   : > { %2542 = vpow2.f32 %v1328_v47  ;;  %v1571_v50 = vpop.permute.xlu0 %1570 }
 0x650   : > { %2360 = vmatpush.xpose.msk.msra.mxu2 %vm570_vm13, %v1571_v50 }
 0x652   : > { %v1323_v51 = vpop.xlane.xlu1 %1322 }
 0x653   : > { %v1327_v52 = vsub.f32 %v1311_v29, %v1323_v51 }
 0x655   : > { %v3067_v53 = vpop.eup %2542  ;;  %v1334_v54 = vmul.f32 1.442695, %v1327_v52 }
 0x656   : > { %v1336_v56 = vsel %vm570_vm13, %v3067_v53, 0.0 }
 0x657   : > { %2544 = vpow2.f32 %v1334_v54  ;;  %1337 = vadd.xlane.f32.xlu0 %v1336_v56 }
 0x65d   : > { %v3071_v55 = vpop.eup %2544 }
 0x65e   : > { %v1345_v57 = vsel %vm570_vm13, %v3071_v55, 0.0 }
 0x65f   : > { %1346 = vadd.xlane.f32.xlu0 %v1345_v57 }
 0x661   : > { %1596 = vrot.lane.b32.xlu2 %v2900_v37, %s2670_s15 }
 0x667   : > { %1598 = vrot.lane.b32.xlu1 %v2900_v37, %s2671_s16  ;;  %s2250_s16 = sshll.u32 %s2247_s0, 4  ;;  %s2251_s16 = int_to_ptr.hbm [resolvable:$true] %s2250_s16 }
 0x66a   : > { %v1569_v62 = vpop.permute.xlu1 %1568 }
 0x673   : > { %1540 = vrot.lane.b32.xlu0 %v2888_v36, %s2670_s15  ;;  %s405_s15 = sand.u32 1, %s2652_s22  }
 0x69d   : > { %1629 = vmax.xlane.f32.xlu0 %v1628_v61 }
 0x6bc   : > { %v1344_v63 = vpop.xlane.xlu2 %1343 }
 0x6bd   : > { %2546 = vrcp.f32 %v1344_v63  ;;  %v1389_v6 = vand.u32 2147483648, %v1344_v63  ;;  %v1387_v8 = vand.u32 2147483647, %v1344_v63  ;;  %vm1383_vm4 = vweird.f32 %v1344_v63 }
 0x6bf   : > { %v1390_v0 = vor.u32 1.1754944e-38, %v1389_v6  ;;  %vm1388_vm6 = vcmp.eq.f32.partialorder %v1387_v8, 8.507059e+37 }
 0x6c1   : > { %v1341_v1 = vpop.xlane.xlu1 %1340 }
 0x6c2   : > { %2548 = vrcp.f32 %v1341_v1  ;;  %v1374_v13 = vand.u32 2147483648, %v1341_v1  ;;  %v1372_v21 = vand.u32 2147483647, %v1341_v1  ;;  %vm1368_vm8 = vweird.f32 %v1341_v1 }
 0x6c3   : > { %v2547_v2 = vpop.eup %2546 }
 0x6c4   : > { %v1379_v3 = vmul.f32 %v2547_v2, %v1344_v63  ;;  %vm1384_vm3 = vweird.f32 %v2547_v2  ;;  %v1375_v26 = vor.u32 1.1754944e-38, %v1374_v13  ;;  %vm1373_vm10 = vcmp.eq.f32.partialorder %v1372_v21, 8.507059e+37 }
 0x6c5   : > { %vm1385_vm5 = vmor %vm1383_vm4, %vm1384_vm3 }
 0x6c6   : > { %v1380_v5 = vsub.f32 1.0, %v1379_v3 }
 0x6c8   : > { %v2549_v60 = vpop.eup %2548  ;;  %v1381_v43 = vmul.f32 %v2547_v2, %v1380_v5 }
 0x6c9   : > { %v1364_v9 = vmul.f32 %v2549_v60, %v1341_v1  ;;  %vm1369_vm7 = vweird.f32 %v2549_v60 }
 0x6ca   : > { %v1382_v10 = vadd.f32 %v2547_v2, %v1381_v43  ;;  %v1338_v11 = vpop.xlane.xlu0 %1337  ;;  %vm1370_vm9 = vmor %vm1368_vm8, %vm1369_vm7 }
 0x6cb   : > { %v1365_v17 = vsub.f32 1.0, %v1364_v9  ;;  %2550 = vrcp.f32 %v1338_v11  ;;  %v1359_v38 = vand.u32 2147483648, %v1338_v11  ;;  %vm1353_vm12 = vweird.f32 %v1338_v11 }
 0x6cc   : > { %v1386_v18 = vsel %vm1385_vm5, %v2547_v2, %v1382_v10 }
 0x6cd   : > { %v1391_v19 = vsel %vm1388_vm6, %v1390_v0, %v1386_v18  ;;  %v1366_v48 = vmul.f32 %v2549_v60, %v1365_v17  ;;  %v1360_v44 = vor.u32 1.1754944e-38, %v1359_v38 }
 0x6ce   : > { %v1392_v22 = vmul.f32 %v2539_v40, %v1391_v19  ;;  %v1357_v40 = vand.u32 2147483647, %v1338_v11 }
 0x6cf   : > { %v1367_v23 = vadd.f32 %v2549_v60, %v1366_v48 }
 0x6d0   : > { %2354 = vmatmul.msk.f32.vlgmr.msrb.gmra.mxu2 %vm570_vm13, %v1392_v22  ;;  %vm1358_vm15 = vcmp.eq.f32.partialorder %v1357_v40, 8.507059e+37  ;;  %v2486_v40 = vpack.i.bf16 %v2893_v14, %v2888_v36 }
 0x6d1   : > { %v2551_v28 = vpop.eup %2550  ;;  %v1371_v29 = vsel %vm1370_vm9, %v2549_v60, %v1367_v23 }
 0x6d2   : > { %v1376_v31 = vsel %vm1373_vm10, %v1375_v26, %v1371_v29  ;;  %v1349_v32 = vmul.f32 %v2551_v28, %v1338_v11  ;;  %v1347_v33 = vpop.xlane.xlu0 %1346  ;;  %vm1354_vm11 = vweird.f32 %v2551_v28 }
 0x6d3   : > { %2552 = vrcp.f32 %v1347_v33  ;;  %v1377_v35 = vmul.f32 %v3062_v46, %v1376_v31  ;;  %vm1355_vm14 = vmor %vm1353_vm12, %vm1354_vm11  ;;  %v1404_v51 = vand.u32 2147483648, %v1347_v33  ;;  %v1402_v54 = vand.u32 2147483647, %v1347_v33 }
 0x6d4   : > { %v1350_v34 = vsub.f32 1.0, %v1349_v32  ;;  %vm1398_vm2 = vweird.f32 %v1347_v33 }
 0x6d5   : > { %2353 = vmatmul.msk.f32.vlgmr.msra.gmra.mxu1 %vm570_vm13, %v1377_v35  ;;  %v1405_v58 = vor.u32 1.1754944e-38, %v1404_v51  ;;  %vm1403_vm4 = vcmp.eq.f32.partialorder %v1402_v54, 8.507059e+37 }
 0x6d6   : > { %v1351_v39 = vmul.f32 %v2551_v28, %v1350_v34 }
 0x6d8   : > { %v1352_v41 = vadd.f32 %v2551_v28, %v1351_v39  ;;  %2361 = vmatmul.msk.f32.vlgmr.msra.gmra.mxu2 %vm570_vm13, %v1569_v62 }
 0x6d9   : > { %v2553_v42 = vpop.eup %2552  ;;  %v1599_v56 = vpop.permute.xlu1 %1598 }
 0x6da   : > { %v1356_v45 = vsel %vm1355_vm14, %v2551_v28, %v1352_v41  ;;  %v1394_v47 = vmul.f32 %v2553_v42, %v1347_v33  ;;  %vm1399_vm1 = vweird.f32 %v2553_v42 }
 0x6db   : > { %v1361_v49 = vsel %vm1358_vm15, %v1360_v44, %v1356_v45  ;;  %vm1400_vm3 = vmor %vm1398_vm2, %vm1399_vm1 }
 0x6dc   : > { %v1395_v50 = vsub.f32 1.0, %v1394_v47  ;;  %v1362_v46 = vmul.f32 %v3067_v53, %v1361_v49  ;;  %v1597_v53 = vpop.permute.xlu2 %1596 }
 0x6de   : > { %v1396_v52 = vmul.f32 %v2553_v42, %v1395_v50  ;;  %2352 = vmatmul.msk.f32.vlgmr.msra.gmra.mxu3 %vm570_vm13, %v1362_v46 }
 0x6df   : > { %2362 = vmatpush.xpose.msk.msra.mxu3 %vm570_vm13, %v1599_v56 }
 0x6e0   : > { %v1397_v57 = vadd.f32 %v2553_v42, %v1396_v52 }
 0x6e2   : > { %v1401_v61 = vsel %vm1400_vm3, %v2553_v42, %v1397_v57 }
 0x6e3   : > { %v1406_v62 = vsel %vm1403_vm4, %v1405_v58, %v1401_v61 }
 0x6e4   : > { %v1407_v63 = vmul.f32 %v3071_v55, %v1406_v62 }
 0x6e5   : > { %v1541_v1 = vpop.permute.xlu0 %1540 }
 0x6e6   : > { %2355 = vmatmul.msk.f32.vlgmr.msrb.gmra.mxu3 %vm570_vm13, %v1407_v63  ;;  %2359 = vmatmul.msk.f32.vlgmr.msrb.gmra.mxu1 %vm570_vm13, %v1541_v1 }
 0x6ee   : > { %2363 = vmatmul.msk.f32.vlgmr.msra.gmra.mxu3 %vm570_vm13, %v1597_v53 }
 0x710   : > { %v1630_v3 = vpop.xlane.xlu0 %1629 }
 0x711   : > { %v1640_v43 = vsub.f32 %v3081_v59, %v1630_v3 }
 0x713   : > { %v1644_v9 = vmul.f32 1.442695, %v1640_v43 }
 0x715   : > { %2554 = vpow2.f32 %v1644_v9 }
 0x71b   : > { %v3099_v18 = vpop.eup %2554 }
 0x71c   : > { %v1652_v13 = vsel %vm570_vm13, %v3099_v18, 0.0 }
 0x752   : > { %v1457_v5 = vpop.f32.mrf.mxu1 }
 0x753   : > { %v1483_v2 = vpop.f32.mrf.mxu2 }
 0x75b   : > { %v1593_v6 = vpop.f32.mrf.mxu2 }
 0x75c   : > { %v1626_v60 = vmul.f32 0.35355338, %v1593_v6 }
 0x75e   : > { %v1634_v8 = vsel %vm570_vm13, %v1626_v60, -inf }
 0x75f   : > { %1635 = vmax.xlane.f32.xlu2 %v1634_v8 }
 0x761   : > { %v1431_v55 = vpop.f32.mrf.mxu3 }
 0x763   : > { %v1565_v10 = vpop.f32.mrf.mxu1 }
 0x764   : > { %v1625_v11 = vmul.f32 0.35355338, %v1565_v10 }
 0x766   : > { %v1631_v0 = vsel %vm570_vm13, %v1625_v11, -inf }
 0x767   : > { %1632 = vmax.xlane.f32.xlu1 %v1631_v0 }
 0x769   : > { %v1509_v17 = vpop.f32.mrf.mxu3 }
 0x76f   : > { %1653 = vadd.xlane.f32.xlu1 %v1652_v13 }
 0x771   : > { %v1621_v19 = vpop.f32.mrf.mxu3 }
 0x772   : > { %v1627_v59 = vmul.f32 0.35355338, %v1621_v19 }
 0x774   : > { %v1637_v48 = vsel %vm570_vm13, %v1627_v59, -inf }
 0x775   : > { %1638 = vmax.xlane.f32.xlu0 %v1637_v48 }
 0x7d2   : > { %v1636_v21 = vpop.xlane.xlu2 %1635 }
 0x7d3   : > { %v1642_v22 = vsub.f32 %v1626_v60, %v1636_v21 }
 0x7d5   : > { %v1648_v23 = vmul.f32 1.442695, %v1642_v22 }
 0x7d7   : > { %2556 = vpow2.f32 %v1648_v23 }
 0x7da   : > { %v1633_v26 = vpop.xlane.xlu1 %1632 }
 0x7db   : > { %v1641_v28 = vsub.f32 %v1625_v11, %v1633_v26 }
 0x7dd   : > { %v3104_v29 = vpop.eup %2556  ;;  %v1646_v31 = vmul.f32 1.442695, %v1641_v28 }
 0x7de   : > { %v1658_v32 = vsel %vm570_vm13, %v3104_v29, 0.0 }
 0x7df   : > { %2558 = vpow2.f32 %v1646_v31  ;;  %1659 = vadd.xlane.f32.xlu0 %v1658_v32 }
 0x7e2   : > { %v1654_v36 = vpop.xlane.xlu1 %1653 }
 0x7e3   : > { %v1675_v47 = vand.u32 2147483648, %v1654_v36  ;;  %vm1669_vm6 = vweird.f32 %v1654_v36  ;;  %v1673_v49 = vand.u32 2147483647, %v1654_v36 }
 0x7e5   : > { %v3108_v33 = vpop.eup %2558  ;;  %v1676_v51 = vor.u32 1.1754944e-38, %v1675_v47  ;;  %vm1674_vm8 = vcmp.eq.f32.partialorder %v1673_v49, 8.507059e+37 }
 0x7e6   : > { %v1655_v34 = vsel %vm570_vm13, %v3108_v33, 0.0 }
 0x7e7   : > { %1656 = vadd.xlane.f32.xlu2 %v1655_v34 }
 0x7e8   : > { %v1639_v35 = vpop.xlane.xlu0 %1638 }
 0x7e9   : > { %v1643_v38 = vsub.f32 %v1627_v59, %v1639_v35 }
 0x7eb   : > { %v1650_v39 = vmul.f32 1.442695, %v1643_v38  ;;  %v1893_v38 = vld [vmem:[%s3348_s4 + $0x18] sm:$0xff] }
 0x7ed   : > { %2560 = vpow2.f32 %v1650_v39  ;;  %v1892_v39 = vld [vmem:[%s3348_s4 + $0x10] sm:$0xff] }
 0x7ee   : > { %2562 = vrcp.f32 %v1654_v36 }
 0x7f3   : > { %v3114_v41 = vpop.eup %2560  ;;  %2487 = vrot.lane.b32.xlu0 %v2486_v40, %s2672_s17  ;;  %v1891_v40 = vld [vmem:[%s3348_s4 + $0x8] sm:$0xff] }
 0x7f4   : > { %v1661_v42 = vsel %vm570_vm13, %v3114_v41, 0.0  ;;  %v2563_v14 = vpop.eup %2562 }
 0x7f5   : > { %1662 = vadd.xlane.f32.xlu1 %v1661_v42  ;;  %vm1670_vm5 = vweird.f32 %v2563_v14 }
 0x7f6   : > { %vm1671_vm7 = vmor %vm1669_vm6, %vm1670_vm5 }
 0x7fb   : > { %1832 = vrot.lane.b32.xlu0 %v3042_v4, %s3357_s18 }
 0x7ff   : > { %1724 = vrot.lane.b32.xlu2 %v2885_v25, %s2672_s17  ;;  %v1665_v25 = vmul.f32 %v2563_v14, %v1654_v36 }
 0x801   : > { %v1666_v4 = vsub.f32 1.0, %v1665_v25 }
 0x807   : > { %1848 = vrot.lane.b32.xlu2 %v1431_v55, %s2674_s20 }
 0x80e   : > { %1802 = vrot.lane.b32.xlu1 %v2900_v37, %s2672_s17  ;;  %v1667_v37 = vmul.f32 %v2563_v14, %v1666_v4  ;;  %s2236_s17 = scalar_lea.sflag [#allocation3], %s405_s15 }
 0x80f   : > { %1834 = vrot.lane.b32.xlu2 %v3049_v20, %s3357_s18 }
 0x810   : > { %v1668_v45 = vadd.f32 %v2563_v14, %v1667_v37 }
 0x816   : > { %1850 = vrot.lane.b32.xlu1 %v1457_v5, %s2674_s20 }
 0x817   : > { %1836 = vrot.lane.b32.xlu2 %v3046_v16, %s3357_s18 }
 0x81e   : > { %1852 = vrot.lane.b32.xlu1 %v1483_v2, %s2674_s20 }
 0x81f   : > { %1838 = vrot.lane.b32.xlu2 %v3044_v12, %s3357_s18  ;;  %v1672_v12 = vsel %vm1671_vm7, %v2563_v14, %v1668_v45  ;;  %v1890_v14 = vld [vmem:[%s3348_s4] sm:$0xff]  ;;  %vm1880_vm7 = vcmask 130048  }
 0x820   : > { %v1677_v56 = vsel %vm1674_vm8, %v1676_v51, %v1672_v12  ;;  %vm1885_vm8 = vcmask 195584  }
 0x821   : > { %v1678_v2 = vmul.f32 %v3099_v18, %v1677_v56 }
 0x826   : > { %1854 = vrot.lane.b32.xlu1 %v1509_v17, %s2674_s20  ;;  %s2317_s20 = sshll.u32 %s405_s15, 5 }
 0x852   : > { %v1660_v44 = vpop.xlane.xlu0 %1659 }
 0x853   : > { %2564 = vrcp.f32 %v1660_v44  ;;  %v1705_v54 = vand.u32 2147483648, %v1660_v44  ;;  %v1703_v57 = vand.u32 2147483647, %v1660_v44  ;;  %vm1699_vm10 = vweird.f32 %v1660_v44 }
 0x855   : > { %v1706_v63 = vor.u32 1.1754944e-38, %v1705_v54  ;;  %vm1704_vm12 = vcmp.eq.f32.partialorder %v1703_v57, 8.507059e+37 }
 0x859   : > { %v2565_v20 = vpop.eup %2564 }
 0x85a   : > { %v1695_v16 = vmul.f32 %v2565_v20, %v1660_v44  ;;  %v1657_v50 = vpop.xlane.xlu2 %1656  ;;  %vm1700_vm9 = vweird.f32 %v2565_v20 }
 0x85b   : > { %2566 = vrcp.f32 %v1657_v50  ;;  %vm1701_vm11 = vmor %vm1699_vm10, %vm1700_vm9  ;;  %v1688_v6 = vand.u32 2147483647, %v1657_v50  ;;  %v1690_v60 = vand.u32 2147483648, %v1657_v50  ;;  %vm1684_vm15 = vweird.f32 %v1657_v50 }
 0x85c   : > { %v1696_v46 = vsub.f32 1.0, %v1695_v16  ;;  %vm1898_vm9 = vcmask 261120  }
 0x85d   : > { %v1691_v17 = vor.u32 1.1754944e-38, %v1690_v60  ;;  %vm1689_vm2 = vcmp.eq.f32.partialorder %v1688_v6, 8.507059e+37  ;;  %v2595_v60 = vld [vmem:[%s2794_s19 + $0x8] sm:$0xff] }
 0x85e   : > { %v1697_v52 = vmul.f32 %v2565_v20, %v1696_v46 }
 0x860   : > { %v1698_v58 = vadd.f32 %v2565_v20, %v1697_v52 }
 0x861   : > { %v2567_v61 = vpop.eup %2566 }
 0x862   : > { %v1702_v62 = vsel %vm1701_vm11, %v2565_v20, %v1698_v58  ;;  %v1680_v1 = vmul.f32 %v2567_v61, %v1657_v50  ;;  %v1725_v53 = vpop.permute.xlu2 %1724  ;;  %vm1685_vm14 = vweird.f32 %v2567_v61 }
 0x863   : > { %1745 = vmatpush.msrb.mxu0 %v1725_v53  ;;  %v1707_v3 = vsel %vm1704_vm12, %v1706_v63, %v1702_v62  ;;  %vm1686_vm1 = vmor %vm1684_vm15, %vm1685_vm14 }
 0x864   : > { %v1681_v5 = vsub.f32 1.0, %v1680_v1  ;;  %2364 = vmatmul.msk.f32.vlgmr.msrb.gmra.mxu0 %vm570_vm13, %v1678_v2  ;;  %v1708_v10 = vmul.f32 %v3104_v29, %v1707_v3  ;;  %v2594_v3 = vld [vmem:[%s2794_s19] sm:$0xff] }
 0x865   : > { %v2488_v43 = vpop.permute.xlu0 %2487  ;;  %1923 = vmatpush.msra.mxu0 %v1893_v38 }
 0x866   : > { %v1682_v8 = vmul.f32 %v2567_v61, %v1681_v5  ;;  %v2490_v9 = vunpack.i.h.bf16 %v2488_v43  ;;  %v2489_v55 = vunpack.i.l.bf16 %v2488_v43 }
 0x867   : > { %1924 = vmatpush.msra.mxu0 %v1892_v39 }
 0x868   : > { %v1683_v11 = vadd.f32 %v2567_v61, %v1682_v8  ;;  %1771 = vmatpush.msra.mxu1 %v2489_v55  ;;  %1797 = vmatpush.msrb.mxu2 %v2490_v9  ;;  %v1663_v0 = vpop.xlane.xlu1 %1662  ;;  %v2596_v55 = vld [vmem:[%s2794_s19 + $0x10] sm:$0xff] }
 0x869   : > { %2568 = vrcp.f32 %v1663_v0  ;;  %2366 = vmatmul.msk.f32.vlgmr.msrb.gmra.mxu2 %vm570_vm13, %v1708_v10  ;;  %v1720_v26 = vand.u32 2147483648, %v1663_v0  ;;  %vm1714_vm4 = vweird.f32 %v1663_v0  ;;  %v1718_v28 = vand.u32 2147483647, %v1663_v0  ;;  %1925 = vmatpush.msra.mxu0 %v1891_v40 }
 0x86a   : > { %v1687_v18 = vsel %vm1686_vm1, %v2567_v61, %v1683_v11  ;;  %v1849_v4 = vpop.permute.xlu2 %1848 }
 0x86b   : > { %v1692_v13 = vsel %vm1689_vm2, %v1691_v17, %v1687_v18  ;;  %v1721_v31 = vor.u32 1.1754944e-38, %v1720_v26  ;;  %vm1719_vm6 = vcmp.eq.f32.partialorder %v1718_v28, 8.507059e+37  ;;  %1926 = vmatpush.msra.mxu0 %v1890_v14  ;;  %v2597_v17 = vld [vmem:[%s2794_s19 + $0x18] sm:$0xff]  ;;  %v2058_v28 = vld [vmem:[%s3352_s8 + $0x70] sm:$0xff] }
 0x86c   : > { %v1693_v19 = vmul.f32 %v3108_v33, %v1692_v13  ;;  %v2059_v26 = vld [vmem:[%s3352_s8 + $0x78] sm:$0xff] }
 0x86d   : > { %v1833_v25 = vpop.permute.xlu0 %1832  ;;  %2064 = vmatpush.msrb.mxu1 %v2059_v26 }
 0x86e   : > { %2365 = vmatmul.msk.f32.vlgmr.msra.gmra.mxu1 %vm570_vm13, %v1693_v19  ;;  %v1876_v44 = vsel %vm570_vm13, %v2977_v30, %v1833_v25  ;;  %v2057_v25 = vld [vmem:[%s3352_s8 + $0x68] sm:$0xff] }
 0x86f   : > { %v2569_v59 = vpop.eup %2568  ;;  %v1881_v37 = vsel %vm1880_vm7, %v1876_v44, %v1849_v4  ;;  %2065 = vmatpush.msrb.mxu1 %v2058_v28  ;;  %v2056_v4 = vld [vmem:[%s3352_s8 + $0x60] sm:$0xff]  ;;  %v2054_v44 = vld [vmem:[%s3352_s8 + $0x50] sm:$0xff] }
 0x870   : > { %v1710_v48 = vmul.f32 %v2569_v59, %v1663_v0  ;;  %vm1715_vm3 = vweird.f32 %v2569_v59 }
 0x871   : > { %vm1716_vm5 = vmor %vm1714_vm4, %vm1715_vm3  ;;  %2066 = vmatpush.msrb.mxu1 %v2057_v25 }
 0x872   : > { %v1711_v21 = vsub.f32 1.0, %v1710_v48  ;;  %v1835_v47 = vpop.permute.xlu2 %1834 }
 0x873   : > { %v1877_v16 = vsel %vm570_vm13, %v2975_v27, %v1835_v47  ;;  %2067 = vmatpush.msrb.mxu1 %v2056_v4  ;;  %v2050_v47 = vld [vmem:[%s3352_s8 + $0x30] sm:$0xff] }
 0x874   : > { %v1712_v22 = vmul.f32 %v2569_v59, %v1711_v21 }
 0x875   : > { %2068 = vmatpush.msrb.mxu1 %v2055_v7 }
 0x876   : > { %v1713_v23 = vadd.f32 %v2569_v59, %v1712_v22 }
 0x877   : > { %2069 = vmatpush.msrb.mxu1 %v2054_v44 }
 0x878   : > { %v1717_v29 = vsel %vm1716_vm5, %v2569_v59, %v1713_v23 }
 0x879   : > { %v1722_v32 = vsel %vm1719_vm6, %v1721_v31, %v1717_v29 }
 0x87a   : > { %v1723_v35 = vmul.f32 %v3114_v41, %v1722_v32  ;;  %v1837_v46 = vpop.permute.xlu2 %1836 }
 0x87b   : > { %v1878_v52 = vsel %vm570_vm13, %v2983_v24, %v1837_v46  ;;  %v2493_v24 = vld [vmem:[%s3349_s5] ss:$0 sm:$0xff] }
 0x87c   : > { %v2044_v46 = vld [vmem:[%s3352_s8] sm:$0xff] }
 0x880   : > { %v1803_v34 = vpop.permute.xlu1 %1802 }
 0x881   : > { %1823 = vmatpush.msrb.mxu3 %v1803_v34 }
 0x882   : > { %2367 = vmatmul.msk.f32.vlgmr.msrb.gmra.mxu3 %vm570_vm13, %v1723_v35  ;;  %v1839_v27 = vpop.permute.xlu2 %1838 }
 0x883   : > { %v1879_v61 = vsel %vm570_vm13, %v2980_v15, %v1839_v27  ;;  %2386 = vmatpush.msra.mxu3 %v2059_v26 }
 0x885   : > { %2387 = vmatpush.msra.mxu3 %v2058_v28 }
 0x887   : > { %2388 = vmatpush.msra.mxu3 %v2057_v25 }
 0x888   : > { %v1851_v49 = vpop.permute.xlu1 %1850 }
 0x889   : > { %v1882_v50 = vsel %vm1880_vm7, %v1877_v16, %v1851_v49  ;;  %2389 = vmatpush.msra.mxu3 %v2056_v4  ;;  %v2049_v49 = vld [vmem:[%s3352_s8 + $0x28] sm:$0xff]  ;;  %v2048_v16 = vld [vmem:[%s3352_s8 + $0x20] sm:$0xff] }
 0x88b   : > { %2390 = vmatpush.msra.mxu3 %v2055_v7 }
 0x88d   : > { %2391 = vmatpush.msra.mxu3 %v2054_v44 }
 0x890   : > { %v1853_v51 = vpop.permute.xlu1 %1852 }
 0x891   : > { %v1883_v54 = vsel %vm1880_vm7, %v1878_v52, %v1853_v51 }
 0x898   : > { %v1855_v58 = vpop.permute.xlu1 %1854 }
 0x899   : > { %v1884_v62 = vsel %vm1880_vm7, %v1879_v61, %v1855_v58 }
 0x8e1   : > { %v1747_v33 = vpop.f32.mrf.mxu0 }
 0x8e2   : > { %1864 = vrot.lane.b32.xlu0 %v1747_v33, %s2675_s26 }
 0x8eb   : > { %v1773_v41 = vpop.f32.mrf.mxu1 }
 0x8ec   : > { %1866 = vrot.lane.b32.xlu0 %v1773_v41, %s2675_s26  ;;  %v1799_v42 = vpop.f32.mrf.mxu2 }
 0x8f4   : > { %1868 = vrot.lane.b32.xlu0 %v1799_v42, %s2675_s26 }
 0x905   : > { %v1825_v36 = vpop.f32.mrf.mxu3 }
 0x906   : > { %1870 = vrot.lane.b32.xlu0 %v1825_v36, %s2675_s26  ;;  %s407_s26 = scalar_lea.vmem [#allocation2], %s2317_s20  ;;  %s2612_s20 = sshra.s32 %s2251_s16, 4  ;;  %s2613_s20 = int_to_ptr.hbm [resolvable:$true] %s2612_s20 }
 0x907   : > { %s2248_s30 = sshll.u32 %s407_s26, 4  ;;  %s2614_s18 = scalar_lea.hbm %s2613_s20, 32  ;;  %s2249_s30 = int_to_ptr.vmem [resolvable:$true] %s2248_s30 }
 0x908   : > { %p2615_p11 = scmp.ne.s32.totalorder %s2613_s20, %s2614_s18  ;;  %p2619_p0 = scmp.lt.s32.totalorder %s2613_s20, %s3356_s12 }
 0x909   : > { %p2620_p1 = scmp.lt.s32.totalorder %s2618_s28, %s2614_s18 }
 0x90a   : > { %p2616_p12 = pnand %p2615_p11, %p2780_p5 }
 0x90b   : > { %p2621_p2 = por %p2620_p1, %p2619_p0 }
 0x90c   : > { %p2617_p13 = pneg %p2616_p12 }
 0x90e   : > { %p2622_p3 = pnand %p2621_p2, %p2617_p13 }
 0x954   : > { %v1865_v45 = vpop.permute.xlu0 %1864 }
 0x955   : > { %v1886_v20 = vsel %vm1885_vm8, %v1881_v37, %v1865_v45  ;;  %v2053_v37 = vld [vmem:[%s3352_s8 + $0x48] sm:$0xff]  ;;  %v2052_v45 = vld [vmem:[%s3352_s8 + $0x40] sm:$0xff] }
 0x956   : > { %2368 = vmatmul.msk.f32.vlgmr.msra.gmra.mxu0 %vm1898_vm9, %v1886_v20  ;;  %2070 = vmatpush.msrb.mxu1 %v2053_v37  ;;  %v2051_v20 = vld [vmem:[%s3352_s8 + $0x38] sm:$0xff] }
 0x957   : > { %2392 = vmatpush.msra.mxu3 %v2053_v37 }
 0x958   : > { %2071 = vmatpush.msrb.mxu1 %v2052_v45 }
 0x959   : > { %2393 = vmatpush.msra.mxu3 %v2052_v45 }
 0x95a   : > { %2072 = vmatpush.msrb.mxu1 %v2051_v20 }
 0x95b   : > { %2394 = vmatpush.msra.mxu3 %v2051_v20 }
 0x95c   : > { %2073 = vmatpush.msrb.mxu1 %v2050_v47 }
 0x95d   : > { %2395 = vmatpush.msra.mxu3 %v2050_v47 }
 0x95e   : > { %v1867_v12 = vpop.permute.xlu0 %1866  ;;  %2074 = vmatpush.msrb.mxu1 %v2049_v49 }
 0x95f   : > { %v1887_v30 = vsel %vm1885_vm8, %v1882_v50, %v1867_v12  ;;  %2396 = vmatpush.msra.mxu3 %v2049_v49  ;;  %v2047_v50 = vld [vmem:[%s3352_s8 + $0x18] sm:$0xff]  ;;  %v2046_v12 = vld [vmem:[%s3352_s8 + $0x10] sm:$0xff] }
 0x960   : > { %2369 = vmatmul.msk.f32.gmra.mxu0 %vm1898_vm9, %v1887_v30  ;;  %2075 = vmatpush.msrb.mxu1 %v2048_v16  ;;  %v2045_v30 = vld [vmem:[%s3352_s8 + $0x8] sm:$0xff] }
 0x961   : > { %2397 = vmatpush.msra.mxu3 %v2048_v16 }
 0x962   : > { %2076 = vmatpush.msrb.mxu1 %v2047_v50 }
 0x963   : > { %2398 = vmatpush.msra.mxu3 %v2047_v50  ;;  %v2179_v50 = vld [vmem:[%s3354_s10 + $0x30] sm:$0xff] }
 0x964   : > { %2077 = vmatpush.msrb.mxu1 %v2046_v12 }
 0x965   : > { %2399 = vmatpush.msra.mxu3 %v2046_v12  ;;  %v2178_v12 = vld [vmem:[%s3354_s10 + $0x28] sm:$0xff] }
 0x966   : > { %v1869_v56 = vpop.permute.xlu0 %1868  ;;  %2078 = vmatpush.msrb.mxu1 %v2045_v30 }
 0x967   : > { %v1888_v57 = vsel %vm1885_vm8, %v1883_v54, %v1869_v56  ;;  %2400 = vmatpush.msra.mxu3 %v2045_v30  ;;  %v2176_v30 = vld [vmem:[%s3354_s10 + $0x18] sm:$0xff] }
 0x968   : > { %2370 = vmatmul.msk.f32.gmra.mxu0 %vm1898_vm9, %v1888_v57  ;;  %2079 = vmatpush.msrb.mxu1 %v2044_v46 }
 0x969   : > { %2401 = vmatpush.msra.mxu3 %v2044_v46  ;;  %v2496_v46 = vld [vmem:[%s3353_s9] ss:$0 sm:$0xff] }
 0x978   : > { %v1871_v63 = vpop.permute.xlu0 %1870 }
 0x979   : > { %v1889_v1 = vsel %vm1885_vm8, %v1884_v62, %v1871_v63 }
 0x97a   : > { %2371 = vmatmul.msk.f32.gmra.mxu0 %vm1898_vm9, %v1889_v1 }
 0x9d3   : > { %v1928_v53 = vpop.f32.mrf.mxu0 }
 0x9d4   : > { %v1929_v2 = vadd.f32 %v2493_v24, %v1928_v53 }
 0x9d6   : > { %v3172_v5 = vadd.f32 %v2594_v3, %v1929_v2 }
 0x9d8   : > { %1946 = vadd.xlane.f32.xlu2 %v3172_v5 }
 0x9dd   : > { %v1931_v15 = vpop.f32.mrf.mxu0 }
 0x9de   : > { %v1932_v6 = vadd.f32 %v2493_v24, %v1931_v15 }
 0x9e0   : > { %v3176_v43 = vadd.f32 %v2595_v60, %v1932_v6  ;;  %v2494_v6 = vld [vmem:[%s3350_s6] ss:$0 sm:$0xff] }
 0x9e2   : > { %1948 = vadd.xlane.f32.xlu1 %v3176_v43 }
 0x9e5   : > { %v1934_v8 = vpop.f32.mrf.mxu0 }
 0x9e6   : > { %v1935_v9 = vadd.f32 %v2493_v24, %v1934_v8 }
 0x9e8   : > { %v3180_v10 = vadd.f32 %v2596_v55, %v1935_v9  ;;  %v2495_v55 = vld [vmem:[%s3351_s7] ss:$0 sm:$0xff] }
 0x9ea   : > { %1950 = vadd.xlane.f32.xlu0 %v3180_v10 }
 0x9f7   : > { %v1937_v11 = vpop.f32.mrf.mxu0 }
 0x9f8   : > { %v1938_v0 = vadd.f32 %v2493_v24, %v1937_v11 }
 0x9fa   : > { %v3184_v18 = vadd.f32 %v2597_v17, %v1938_v0 }
 0x9fc   : > { %1952 = vadd.xlane.f32.xlu2 %v3184_v18 }
 0xa4b   : > { %v1947_v13 = vpop.xlane.xlu2 %1946 }
 0xa4c   : > { %v1954_v19 = vmul.f32 0.03125, %v1947_v13 }
 0xa4e   : > { %v1958_v59 = vsub.f32 %v3172_v5, %v1954_v19 }
 0xa50   : > { %v3190_v48 = vsel %vm435_vm0, %v1958_v59, 0.0 }
 0xa51   : > { %v1966_v21 = vmul.f32 %v3190_v48, %v3190_v48 }
 0xa53   : > { %1970 = vadd.xlane.f32.xlu1 %v1966_v21 }
 0xa55   : > { %v1949_v22 = vpop.xlane.xlu1 %1948 }
 0xa56   : > { %v1955_v23 = vmul.f32 0.03125, %v1949_v22 }
 0xa58   : > { %v1959_v29 = vsub.f32 %v3176_v43, %v1955_v23 }
 0xa5a   : > { %v3203_v31 = vsel %vm435_vm0, %v1959_v29, 0.0 }
 0xa5b   : > { %v1967_v32 = vmul.f32 %v3203_v31, %v3203_v31 }
 0xa5d   : > { %v1951_v34 = vpop.xlane.xlu0 %1950  ;;  %1972 = vadd.xlane.f32.xlu2 %v1967_v32 }
 0xa5e   : > { %v1956_v35 = vmul.f32 0.03125, %v1951_v34 }
 0xa60   : > { %v1960_v33 = vsub.f32 %v3180_v10, %v1956_v35 }
 0xa62   : > { %v3210_v38 = vsel %vm435_vm0, %v1960_v33, 0.0 }
 0xa63   : > { %v1968_v39 = vmul.f32 %v3210_v38, %v3210_v38 }
 0xa65   : > { %1974 = vadd.xlane.f32.xlu0 %v1968_v39 }
 0xa6f   : > { %v1953_v40 = vpop.xlane.xlu2 %1952 }
 0xa70   : > { %v1957_v41 = vmul.f32 0.03125, %v1953_v40 }
 0xa72   : > { %v1961_v42 = vsub.f32 %v3184_v18, %v1957_v41 }
 0xa74   : > { %v3217_v36 = vsel %vm435_vm0, %v1961_v42, 0.0 }
 0xa75   : > { %v1969_v14 = vmul.f32 %v3217_v36, %v3217_v36 }
 0xa77   : > { %1976 = vadd.xlane.f32.xlu1 %v1969_v14 }
 0xac6   : > { %v1971_v51 = vpop.xlane.xlu1 %1970 }
 0xac7   : > { %v1978_v52 = vmul.f32 0.03125, %v1971_v51  ;;  %v2175_v51 = vld [vmem:[%s3354_s10 + $0x10] sm:$0xff] }
 0xac9   : > { %v1982_v54 = vadd.f32 1e-05, %v1978_v52  ;;  %v2174_v52 = vld [vmem:[%s3354_s10 + $0x8] sm:$0xff] }
 0xacb   : > { %2570 = vrsqrt.f32 %v1982_v54  ;;  %vm1992_vm13 = vweird.f32 %v1982_v54 }
 0xad0   : > { %v1973_v56 = vpop.xlane.xlu2 %1972 }
 0xad1   : > { %v2571_v57 = vpop.eup %2570  ;;  %v1979_v27 = vmul.f32 0.03125, %v1973_v56 }
 0xad2   : > { %v1987_v58 = vmul.f32 %v2571_v57, %v1982_v54  ;;  %vm1993_vm0 = vweird.f32 %v2571_v57 }
 0xad3   : > { %v1983_v61 = vadd.f32 1e-05, %v1979_v27  ;;  %vm1994_vm10 = vmor %vm1992_vm13, %vm1993_vm0  ;;  %vm2185_vm0 = vcmask 523264  }
 0xad4   : > { %v1988_v62 = vmul.f32 %v2571_v57, %v1987_v58 }
 0xad5   : > { %2572 = vrsqrt.f32 %v1983_v61  ;;  %vm2002_vm12 = vweird.f32 %v1983_v61 }
 0xad6   : > { %v1989_v63 = vmul.f32 0.5, %v1988_v62 }
 0xad8   : > { %v1990_v1 = vsub.f32 1.5, %v1989_v63  ;;  %v1975_v24 = vpop.xlane.xlu0 %1974 }
 0xad9   : > { %v1980_v53 = vmul.f32 0.03125, %v1975_v24 }
 0xada   : > { %v1991_v2 = vmul.f32 %v2571_v57, %v1990_v1 }
 0xadb   : > { %v2573_v3 = vpop.eup %2572  ;;  %v1984_v15 = vadd.f32 1e-05, %v1980_v53 }
 0xadc   : > { %v1995_v60 = vsel %vm1994_vm10, %v2571_v57, %v1991_v2  ;;  %v1997_v8 = vmul.f32 %v2573_v3, %v1983_v61  ;;  %vm2003_vm11 = vweird.f32 %v2573_v3  ;;  %v2173_v57 = vld [vmem:[%s3354_s10] sm:$0xff] }
 0xadd   : > { %v2026_v9 = vmul.f32 %v1995_v60, %v3190_v48  ;;  %2574 = vrsqrt.f32 %v1984_v15  ;;  %vm2004_vm14 = vmor %vm2002_vm12, %vm2003_vm11  ;;  %vm2012_vm1 = vweird.f32 %v1984_v15 }
 0xade   : > { %v1998_v11 = vmul.f32 %v2573_v3, %v1997_v8 }
 0xadf   : > { %v2033_v0 = vmul.f32 %v2494_v6, %v2026_v9 }
 0xae0   : > { %v1999_v17 = vmul.f32 0.5, %v1998_v11 }
 0xae1   : > { %v2040_v13 = vadd.f32 %v2495_v55, %v2033_v0 }
 0xae2   : > { %v2000_v19 = vsub.f32 1.5, %v1999_v17 }
 0xae3   : > { %v2575_v59 = vpop.eup %2574  ;;  %2080 = vmatmul.f32.vlgmr.msrb.gmra.mxu1 %v2040_v13 }
 0xae4   : > { %v2001_v21 = vmul.f32 %v2573_v3, %v2000_v19  ;;  %v2007_v22 = vmul.f32 %v2575_v59, %v1984_v15  ;;  %vm2013_vm15 = vweird.f32 %v2575_v59 }
 0xae5   : > { %vm2014_vm2 = vmor %vm2012_vm1, %vm2013_vm15 }
 0xae6   : > { %v2008_v23 = vmul.f32 %v2575_v59, %v2007_v22  ;;  %v2005_v26 = vsel %vm2004_vm14, %v2573_v3, %v2001_v21 }
 0xae7   : > { %v2027_v48 = vmul.f32 %v2005_v26, %v3203_v31 }
 0xae8   : > { %v2009_v28 = vmul.f32 0.5, %v2008_v23 }
 0xae9   : > { %v2034_v29 = vmul.f32 %v2494_v6, %v2027_v48 }
 0xaea   : > { %v2010_v32 = vsub.f32 1.5, %v2009_v28  ;;  %v1977_v34 = vpop.xlane.xlu1 %1976 }
 0xaeb   : > { %v1981_v35 = vmul.f32 0.03125, %v1977_v34  ;;  %v2041_v33 = vadd.f32 %v2495_v55, %v2034_v29 }
 0xaec   : > { %v2011_v39 = vmul.f32 %v2575_v59, %v2010_v32 }
 0xaed   : > { %v1985_v40 = vadd.f32 1e-05, %v1981_v35  ;;  %2083 = vmatmul.f32.gmra.mxu1 %v2041_v33 }
 0xaee   : > { %v2015_v41 = vsel %vm2014_vm2, %v2575_v59, %v2011_v39 }
 0xaef   : > { %v2028_v42 = vmul.f32 %v2015_v41, %v3210_v38  ;;  %2576 = vrsqrt.f32 %v1985_v40  ;;  %vm2022_vm4 = vweird.f32 %v1985_v40  ;;  %v2180_v38 = vld [vmem:[%s3354_s10 + $0x38] sm:$0xff] }
 0xaf0   : > { %2206 = vmatpush.msra.mxu2 %v2180_v38 }
 0xaf1   : > { %v2035_v14 = vmul.f32 %v2494_v6, %v2028_v42 }
 0xaf2   : > { %2207 = vmatpush.msra.mxu2 %v2179_v50 }
 0xaf3   : > { %v2042_v25 = vadd.f32 %v2495_v55, %v2035_v14 }
 0xaf4   : > { %2208 = vmatpush.msra.mxu2 %v2178_v12 }
 0xaf5   : > { %v2577_v4 = vpop.eup %2576  ;;  %2086 = vmatmul.f32.vlgmr.msra.gmra.mxu3 %v2042_v25 }
 0xaf6   : > { %v2017_v31 = vmul.f32 %v2577_v4, %v1985_v40  ;;  %vm2023_vm3 = vweird.f32 %v2577_v4 }
 0xaf7   : > { %vm2024_vm5 = vmor %vm2022_vm4, %vm2023_vm3 }
 0xaf8   : > { %v2018_v7 = vmul.f32 %v2577_v4, %v2017_v31 }
 0xafa   : > { %v2019_v44 = vmul.f32 0.5, %v2018_v7 }
 0xafc   : > { %v2020_v37 = vsub.f32 1.5, %v2019_v44 }
 0xafe   : > { %v2021_v45 = vmul.f32 %v2577_v4, %v2020_v37 }
 0xb00   : > { %v2025_v20 = vsel %vm2024_vm5, %v2577_v4, %v2021_v45 }
 0xb01   : > { %v2029_v47 = vmul.f32 %v2025_v20, %v3217_v36  ;;  %v2177_v36 = vld [vmem:[%s3354_s10 + $0x20] sm:$0xff] }
 0xb02   : > { %2209 = vmatpush.msra.mxu2 %v2177_v36 }
 0xb03   : > { %v2036_v49 = vmul.f32 %v2494_v6, %v2029_v47 }
 0xb04   : > { %2210 = vmatpush.msra.mxu2 %v2176_v30 }
 0xb05   : > { %v2043_v16 = vadd.f32 %v2495_v55, %v2036_v49 }
 0xb06   : > { %2211 = vmatpush.msra.mxu2 %v2175_v51 }
 0xb07   : > { %2089 = vmatmul.f32.gmra.mxu3 %v2043_v16 }
 0xb08   : > { %2212 = vmatpush.msra.mxu2 %v2174_v52 }
 0xb0a   : > { %2213 = vmatpush.msra.mxu2 %v2173_v57 }
 0xb60   : > { %v2081_v54 = vpop.f32.mrf.mxu1 }
 0xb61   : > { %v2082_v56 = vadd.f32 %v2496_v46, %v2081_v54 }
 0xb63   : > { %v2372_v27 = vmul.f32 -1.442695, %v2082_v56 }
 0xb65   : > { %2578 = vpow2.f32 %v2372_v27 }
 0xb6a   : > { %v2084_v58 = vpop.f32.mrf.mxu1 }
 0xb6b   : > { %v2579_v61 = vpop.eup %2578  ;;  %v2085_v62 = vadd.f32 %v2496_v46, %v2084_v58 }
 0xb6c   : > { %v2105_v63 = vadd.f32 1.0, %v2579_v61  ;;  %v2497_v61 = vld [vmem:[%s3355_s11] ss:$0 sm:$0xff] }
 0xb6d   : > { %v2373_v1 = vmul.f32 -1.442695, %v2085_v62 }
 0xb6e   : > { %2580 = vrcp.f32 %v2105_v63  ;;  %v2120_v6 = vand.u32 2147483648, %v2105_v63  ;;  %v2118_v9 = vand.u32 2147483647, %v2105_v63  ;;  %vm2114_vm7 = vweird.f32 %v2105_v63 }
 0xb6f   : > { %2582 = vpow2.f32 %v2373_v1 }
 0xb70   : > { %v2121_v17 = vor.u32 1.1754944e-38, %v2120_v6  ;;  %vm2119_vm9 = vcmp.eq.f32.partialorder %v2118_v9, 8.507059e+37 }
 0xb74   : > { %v2581_v24 = vpop.eup %2580 }
 0xb75   : > { %v2583_v53 = vpop.eup %2582  ;;  %v2110_v2 = vmul.f32 %v2581_v24, %v2105_v63  ;;  %vm2115_vm6 = vweird.f32 %v2581_v24 }
 0xb76   : > { %v2106_v3 = vadd.f32 1.0, %v2583_v53  ;;  %vm2116_vm8 = vmor %vm2114_vm7, %vm2115_vm6 }
 0xb77   : > { %v2111_v15 = vsub.f32 1.0, %v2110_v2 }
 0xb78   : > { %2584 = vrcp.f32 %v2106_v3  ;;  %v2087_v60 = vpop.f32.mrf.mxu3  ;;  %v2135_v26 = vand.u32 2147483648, %v2106_v3  ;;  %v2133_v29 = vand.u32 2147483647, %v2106_v3  ;;  %vm2129_vm10 = vweird.f32 %v2106_v3 }
 0xb79   : > { %v2112_v8 = vmul.f32 %v2581_v24, %v2111_v15  ;;  %v2088_v55 = vadd.f32 %v2496_v46, %v2087_v60 }
 0xb7a   : > { %v2136_v35 = vor.u32 1.1754944e-38, %v2135_v26  ;;  %vm2134_vm12 = vcmp.eq.f32.partialorder %v2133_v29, 8.507059e+37 }
 0xb7b   : > { %v2113_v11 = vadd.f32 %v2581_v24, %v2112_v8  ;;  %v2374_v0 = vmul.f32 -1.442695, %v2088_v55 }
 0xb7d   : > { %v2117_v13 = vsel %vm2116_vm8, %v2581_v24, %v2113_v11  ;;  %2586 = vpow2.f32 %v2374_v0 }
 0xb7e   : > { %v2585_v19 = vpop.eup %2584  ;;  %v2122_v59 = vsel %vm2119_vm9, %v2121_v17, %v2117_v13 }
 0xb7f   : > { %v2169_v21 = vmul.f32 %v2122_v59, %v2082_v56  ;;  %v2125_v22 = vmul.f32 %v2585_v19, %v2106_v3  ;;  %vm2130_vm13 = vweird.f32 %v2585_v19 }
 0xb80   : > { %vm2131_vm11 = vmor %vm2129_vm10, %vm2130_vm13 }
 0xb81   : > { %v2126_v23 = vsub.f32 1.0, %v2125_v22  ;;  %2376 = vmatmul.msk.f32.vlgmr.msra.gmra.mxu2 %vm2185_vm0, %v2169_v21 }
 0xb83   : > { %v2587_v48 = vpop.eup %2586  ;;  %v2127_v28 = vmul.f32 %v2585_v19, %v2126_v23 }
 0xb84   : > { %v2107_v32 = vadd.f32 1.0, %v2587_v48 }
 0xb85   : > { %v2128_v34 = vadd.f32 %v2585_v19, %v2127_v28 }
 0xb86   : > { %2588 = vrcp.f32 %v2107_v32  ;;  %v2150_v7 = vand.u32 2147483648, %v2107_v32  ;;  %v2148_v37 = vand.u32 2147483647, %v2107_v32  ;;  %vm2144_vm15 = vweird.f32 %v2107_v32 }
 0xb87   : > { %v2132_v33 = vsel %vm2131_vm11, %v2585_v19, %v2128_v34 }
 0xb88   : > { %v2137_v39 = vsel %vm2134_vm12, %v2136_v35, %v2132_v33  ;;  %v2151_v20 = vor.u32 1.1754944e-38, %v2150_v7  ;;  %vm2149_vm2 = vcmp.eq.f32.partialorder %v2148_v37, 8.507059e+37 }
 0xb89   : > { %v2170_v40 = vmul.f32 %v2137_v39, %v2085_v62 }
 0xb8a   : > { %v2090_v41 = vpop.f32.mrf.mxu3 }
 0xb8b   : > { %v2091_v42 = vadd.f32 %v2496_v46, %v2090_v41  ;;  %2377 = vmatmul.msk.f32.gmra.mxu2 %vm2185_vm0, %v2170_v40 }
 0xb8c   : > { %v2589_v14 = vpop.eup %2588 }
 0xb8d   : > { %v2140_v25 = vmul.f32 %v2589_v14, %v2107_v32  ;;  %v2375_v4 = vmul.f32 -1.442695, %v2091_v42  ;;  %vm2145_vm14 = vweird.f32 %v2589_v14 }
 0xb8e   : > { %vm2146_vm1 = vmor %vm2144_vm15, %vm2145_vm14 }
 0xb8f   : > { %v2141_v31 = vsub.f32 1.0, %v2140_v25  ;;  %2590 = vpow2.f32 %v2375_v4 }
 0xb91   : > { %v2142_v44 = vmul.f32 %v2589_v14, %v2141_v31 }
 0xb93   : > { %v2143_v45 = vadd.f32 %v2589_v14, %v2142_v44 }
 0xb95   : > { %v2591_v47 = vpop.eup %2590  ;;  %v2147_v49 = vsel %vm2146_vm1, %v2589_v14, %v2143_v45 }
 0xb96   : > { %v2152_v16 = vsel %vm2149_vm2, %v2151_v20, %v2147_v49  ;;  %v2108_v38 = vadd.f32 1.0, %v2591_v47 }
 0xb97   : > { %v2171_v50 = vmul.f32 %v2152_v16, %v2088_v55 }
 0xb98   : > { %2592 = vrcp.f32 %v2108_v38  ;;  %v2165_v46 = vand.u32 2147483648, %v2108_v38  ;;  %v2163_v52 = vand.u32 2147483647, %v2108_v38  ;;  %vm2159_vm4 = vweird.f32 %v2108_v38 }
 0xb99   : > { %2378 = vmatmul.msk.f32.gmra.mxu2 %vm2185_vm0, %v2171_v50 }
 0xb9a   : > { %v2166_v56 = vor.u32 1.1754944e-38, %v2165_v46  ;;  %vm2164_vm6 = vcmp.eq.f32.partialorder %v2163_v52, 8.507059e+37 }
 0xb9e   : > { %v2593_v12 = vpop.eup %2592 }
 0xb9f   : > { %v2155_v36 = vmul.f32 %v2593_v12, %v2108_v38  ;;  %vm2160_vm3 = vweird.f32 %v2593_v12 }
 0xba0   : > { %vm2161_vm5 = vmor %vm2159_vm4, %vm2160_vm3 }
 0xba1   : > { %v2156_v30 = vsub.f32 1.0, %v2155_v36 }
 0xba3   : > { %v2157_v51 = vmul.f32 %v2593_v12, %v2156_v30 }
 0xba5   : > { %v2158_v54 = vadd.f32 %v2593_v12, %v2157_v51 }
 0xba7   : > { %v2162_v57 = vsel %vm2161_vm5, %v2593_v12, %v2158_v54 }
 0xba8   : > { %v2167_v27 = vsel %vm2164_vm6, %v2166_v56, %v2162_v57 }
 0xba9   : > { %v2172_v58 = vmul.f32 %v2167_v27, %v2091_v42 }
 0xbab   : > { %2379 = vmatmul.msk.f32.gmra.mxu2 %vm2185_vm0, %v2172_v58 }
 0xc04   : > { %v2215_v62 = vpop.f32.mrf.mxu2 }
 0xc05   : > { %v2216_v63 = vadd.f32 %v2497_v61, %v2215_v62 }
 0xc07   : > { %v2227_v1 = vadd.f32 %v2216_v63, %v3172_v5 }
 0xc09   : > { %2231 = vst [vmem:[%s407_s26] sm:$0xff] %v2227_v1 }
 0xc0e   : > { %v2218_v24 = vpop.f32.mrf.mxu2 }
 0xc0f   : > { %v2219_v53 = vadd.f32 %v2497_v61, %v2218_v24 }
 0xc11   : > { %v2228_v2 = vadd.f32 %v2219_v53, %v3176_v43 }
 0xc13   : > { %2232 = vst [vmem:[%s407_s26 + $0x8] sm:$0xff] %v2228_v2 }
 0xc1c   : > { %v2221_v3 = vpop.f32.mrf.mxu2 }
 0xc1d   : > { %v2222_v15 = vadd.f32 %v2497_v61, %v2221_v3 }
 0xc1f   : > { %v2229_v6 = vadd.f32 %v2222_v15, %v3180_v10 }
 0xc21   : > { %2233 = vst [vmem:[%s407_s26 + $0x10] sm:$0xff] %v2229_v6 }
 0xc2e   : > { %v2224_v5 = vpop.f32.mrf.mxu2 }
 0xc2f   : > { %v2225_v60 = vadd.f32 %v2497_v61, %v2224_v5 }
 0xc31   : > { %v2230_v8 = vadd.f32 %v2225_v60, %v3184_v18 }
 0xc33   : > { %2234 = vst [vmem:[%s407_s26 + $0x18] sm:$0xff] %v2230_v8 }
 0xc34   : > { %2625 = shalt.err (!%p2622_p3)
}
 0xc35   : > { %s2676_s15 = smov 128   ;;  %s3363_s26 = smov 8  }
 0xc36   : > { %2402 = dma.vmem_to_hbm [thread:$0]  (%p2780_p5), %s2249_s30, 512, %s2251_s16, %s2236_s17, %s2676_s15, %s2676_s15, %s3363_s26  }
 0xc37 PF: > { %p2408_p4 = scmp.ge.s32.totalorder %s2660_s24, 2  ;;  %s2265_s25 = sand.u32 1, %s2648_s21  }
 0xc38   : > { %s2266_s29 = scalar_lea.sflag [#allocation3], %s2265_s25 }
 0xc39   : > { %p2405_p7 = pnand %p2408_p4, %p2784_p6 }
 0xc3b   : > { %p2406_p8 = pneg %p2405_p7 }
 0xc3d   : > { %2643 = dma.done.wait (%p2406_p8), %s2266_s29, 512  }
 0xc3e   : > { %2645 = vsyncadd (%p2406_p8), %s2266_s29, 4294966784  ;;  %s3364_s18 = sld [smem:[#allocation5_spill]]  ;;  %p22_p9 = scmp.ge.s32.totalorder %s2767_s27, 4  }
 0xc3f   : > { %s3365_s21 = smov %s2652_s22  ;;  %s3366_s22 = smov %s2656_s23 }
 0xc40   : > { %s3368_s24 = smov %s2767_s27  ;;  %24 = sbr.rel (!%p22_p9) target bundleno = 5 (0x5), region = 103 }
 0xc44   : > { %s3367_s23 = smov %s3364_s18 }
 0xc45   :  { %2272 = vsyncpa [#allocation3], 1 }
 0xc46   :  { %2274 = vsyncpa [#allocation3 + $0x1], 1 }

</bundles_post_ra>
